<compile_context>
chip_gen: v5e
topology: v5e:2x2
jax: 0.10.0
libtpu: 0.0.40
codegen_flags: <defaults>
</compile_context>

<pallas_src>
import functools

import jax
import jax.numpy as jnp
from jax.experimental import pallas as pl
from jax.experimental.pallas import tpu as pltpu

LN_EPS = 1e-5  # PyTorch nn.LayerNorm default


def _round_up(x, m):
    return ((x + m - 1) // m) * m


def critic_kernel(x_ref, a_ref, w1_ref, pack1_ref, w2s_ref, w2a_ref, pack2_ref,
                  q_ref, *, fc2_real):
    x = x_ref[...]                      # (block_b, obs)  bf16
    a = a_ref[...]                      # (block_b, act)  bf16

    # ---- fc1 + ln1 + relu ----------------------------------------------------
    b1, g1, be1 = pack1_ref[0:1, :], pack1_ref[1:2, :], pack1_ref[2:3, :]
    h1 = jnp.dot(x, w1_ref[...], preferred_element_type=jnp.float32) + b1
    inv_n1 = jnp.float32(1.0 / h1.shape[-1])
    m1 = jnp.sum(h1, axis=-1, keepdims=True) * inv_n1
    v1 = jnp.sum(h1 * h1, axis=-1, keepdims=True) * inv_n1 - m1 * m1
    h1 = (h1 - m1) * jax.lax.rsqrt(v1 + LN_EPS) * g1 + be1
    h1 = jnp.maximum(h1, 0.0)

    # ---- cat + fc2 + ln2 + relu ----------------------------------------------
    # torch.cat((h1, a), 1) @ W2  ==  h1 @ W2[:fc1] + a @ W2[fc1:]
    b2, g2, be2 = pack2_ref[0:1, :], pack2_ref[1:2, :], pack2_ref[2:3, :]
    wq_row = pack2_ref[3:4, :]
    bq = pack2_ref[4:5, 0:1]

    h2 = (jnp.dot(h1.astype(jnp.bfloat16), w2s_ref[...],
                  preferred_element_type=jnp.float32)
          + jnp.dot(a, w2a_ref[...], preferred_element_type=jnp.float32)
          + b2)

    # fc2 is lane-padded 254 -> 256.  Pad lanes of h2 are exactly 0 (zero weight
    # columns + zero bias), so raw sums over all lanes already equal the sums over
    # the 254 real features -> E[x^2] - m^2 variance needs no lane mask at all.
    inv_n2 = jnp.float32(1.0 / fc2_real)
    m2 = jnp.sum(h2, axis=-1, keepdims=True) * inv_n2
    v2 = jnp.sum(h2 * h2, axis=-1, keepdims=True) * inv_n2 - m2 * m2
    h2 = (h2 - m2) * jax.lax.rsqrt(v2 + LN_EPS) * g2 + be2   # gamma/beta pad = 0
    h2 = jnp.maximum(h2, 0.0)

    # ---- q head: N=1 output -> VPU multiply + lane reduction (no MXU) ---------
    q = jnp.sum(h2 * wq_row, axis=-1)              # (block_b,)
    q_ref[...] = (q[None, :] + bq).astype(q_ref.dtype)   # lane-dense (1, block_b)


def _choose_block_b(B):
    b128 = _round_up(max(B, 1), 128)
    blk = min(b128, 2048)
    # Prefer >= 2 grid steps (megacore sharding on v7x) when the batch allows it.
    if b128 >= 256 and b128 // blk < 2:
        blk = _round_up(pl.cdiv(b128, 2), 128)
    return blk


def critic_forward(state, action, params, config, *, block_b=None):
    """Runs CriticNetwork.forward inside one Pallas kernel (batch-tiled grid)."""
    obs = config["obs_dims"]
    act = config["actions_dims"]
    fc1 = config["fc1_dims"]
    fc2_real = config["fc2_dims"]
    fc2_pad = config["fc2_pad"]

    B = state.shape[0]
    if block_b is None:
        block_b = _choose_block_b(B)
    else:
        block_b = _round_up(block_b, 128)
    B_pad = _round_up(B, block_b)
    grid_n = B_pad // block_b

    x = state.astype(jnp.bfloat16)
    a = action.astype(jnp.bfloat16)
    if B_pad != B:
        x = jnp.pad(x, ((0, B_pad - B), (0, 0)))
        a = jnp.pad(a, ((0, B_pad - B), (0, 0)))

    kernel = functools.partial(critic_kernel, fc2_real=fc2_real)

    flops = 2 * B_pad * (obs * fc1 + (fc1 + act) * fc2_pad + fc2_pad)
    bytes_accessed = (params["w1"].size * 2 + params["w2s"].size * 2
                      + params["w2a"].size * 2 + params["pack1"].size * 4
                      + params["pack2"].size * 4 + (x.size + a.size) * 2
                      + B_pad * 4)

    q = pl.pallas_call(
        kernel,
        out_shape=jax.ShapeDtypeStruct((grid_n, 1, block_b), jnp.float32),
        grid_spec=pltpu.PrefetchScalarGridSpec(
            num_scalar_prefetch=0,
            grid=(grid_n,),
            in_specs=[
                pl.BlockSpec((block_b, obs), lambda i: (i, 0)),   # state (bf16)
                pl.BlockSpec((block_b, act), lambda i: (i, 0)),   # action (bf16)
                pl.BlockSpec((obs, fc1), lambda i: (0, 0)),       # VMEM-resident
                pl.BlockSpec((3, fc1), lambda i: (0, 0)),
                pl.BlockSpec((fc1, fc2_pad), lambda i: (0, 0)),
                pl.BlockSpec((act, fc2_pad), lambda i: (0, 0)),
                pl.BlockSpec((5, fc2_pad), lambda i: (0, 0)),
            ],
            # Lane-dense output block: leading grid dim squeezed, (1, block_b) tile.
            out_specs=pl.BlockSpec((None, 1, block_b), lambda i: (i, 0, 0)),
        ),
        compiler_params=pltpu.CompilerParams(
            dimension_semantics=("parallel",),
            vmem_limit_bytes=48 * 1024 * 1024),
        cost_estimate=pl.CostEstimate(
            flops=int(flops), transcendentals=int(2 * B_pad),
            bytes_accessed=int(bytes_accessed)),
    )(x, a, params["w1"], params["pack1"], params["w2s"], params["w2a"],
      params["pack2"])

    return q.reshape(B_pad, 1)[:B]


def init_params(key, obs_dims, actions_dims, fc1_dims=512, fc2_dims=254,
                init_weight=0.003, init_bias=0.0003):
    """Mirrors CriticNetwork.__init__: fan_in_uniform_init uses 1/sqrt(size(-1))
    of each tensor (weights AND biases), q head uses +/-init_weight, +/-init_bias."""
    ks = jax.random.split(key, 6)

    def u(k, shape, bound):
        return jax.random.uniform(k, shape, jnp.float32, -bound, bound)

    fc2_pad = _round_up(fc2_dims, 128)
    pad = fc2_pad - fc2_dims

    w1 = u(ks[0], (obs_dims, fc1_dims), 1.0 / float(obs_dims) ** 0.5)
    b1 = u(ks[1], (fc1_dims,), 1.0 / float(fc1_dims) ** 0.5)
    in2 = fc1_dims + actions_dims
    w2 = u(ks[2], (in2, fc2_dims), 1.0 / float(in2) ** 0.5)
    b2 = u(ks[3], (fc2_dims,), 1.0 / float(fc2_dims) ** 0.5)
    wq = u(ks[4], (fc2_dims,), init_weight)
    bq = u(ks[5], (), init_bias)

    w2 = jnp.pad(w2, ((0, 0), (0, pad)))   # zero pad columns -> h2 pad lanes == 0

    params = {
        "w1": w1.astype(jnp.bfloat16),
        "pack1": jnp.stack([b1,
                            jnp.ones((fc1_dims,), jnp.float32),     # gamma1
                            jnp.zeros((fc1_dims,), jnp.float32)]),  # beta1
        "w2s": w2[:fc1_dims].astype(jnp.bfloat16),
        "w2a": w2[fc1_dims:].astype(jnp.bfloat16),
        "pack2": jnp.stack([
            jnp.pad(b2, (0, pad)),
            jnp.pad(jnp.ones((fc2_dims,), jnp.float32), (0, pad)),  # gamma2 (pad=0)
            jnp.zeros((fc2_pad,), jnp.float32),                     # beta2
            jnp.pad(wq, (0, pad)),                                  # q weight row
            jnp.full((fc2_pad,), bq, jnp.float32),                  # q bias (bcast)
        ]),
    }
    config = {"obs_dims": obs_dims, "actions_dims": actions_dims,
              "fc1_dims": fc1_dims, "fc2_dims": fc2_dims, "fc2_pad": fc2_pad}
    return params, config


def reference_forward(state, action, params, config):
    """Pure-JAX replica of CriticNetwork.forward (unpadded 254-wide fc2), using the
    same bf16-operand / f32-accumulate matmul path as the kernel but the standard
    two-pass LayerNorm variance (validates the in-kernel E[x^2]-m^2 rewrite)."""
    fc2 = config["fc2_dims"]
    p1, p2 = params["pack1"], params["pack2"]
    b1, g1, be1 = p1[0], p1[1], p1[2]
    b2, g2, be2 = p2[0, :fc2], p2[1, :fc2], p2[2, :fc2]
    wq, bq = p2[3, :fc2], p2[4, 0]

    def mm(x, w):
        return jnp.dot(x.astype(jnp.bfloat16), w,
                       preferred_element_type=jnp.float32)

    def ln(x, g, b):
        m = jnp.mean(x, -1, keepdims=True)
        v = jnp.mean((x - m) ** 2, -1, keepdims=True)
        return (x - m) * jax.lax.rsqrt(v + LN_EPS) * g + b

    h1 = mm(state, params["w1"]) + b1
    h1 = jnp.maximum(ln(h1, g1, be1), 0.0)
    cat = jnp.concatenate([h1.astype(jnp.bfloat16),
                           action.astype(jnp.bfloat16)], axis=1)
    w2 = jnp.concatenate([params["w2s"][:, :fc2], params["w2a"][:, :fc2]], axis=0)
    h2 = mm(cat, w2) + b2
    h2 = jnp.maximum(ln(h2, g2, be2), 0.0)
    return h2 @ wq[:, None] + bq


if __name__ == "__main__":
    OBS, ACT = 32, 8
    key = jax.random.PRNGKey(0)
    k_state, k_action, k_params, k_big = jax.random.split(key, 4)

    params, config = init_params(k_params, OBS, ACT)

    # Small demo batch (single grid step, block_b=128).
    B = 8
    state = jax.random.normal(k_state, (B, OBS), jnp.float32)
    action = jax.random.normal(k_action, (B, ACT), jnp.float32)
    q = critic_forward(state, action, params, config)
    jax.block_until_ready(q)
    q_ref = reference_forward(state, action, params, config)
    assert q.shape == (B, 1)
    assert jnp.allclose(q, q_ref, atol=1e-3, rtol=1e-3), "small-batch mismatch"

    # Exercise the multi-step grid + batch padding path (B=300 -> block_b=256,
    # grid=2, padded to 512), plus the lane-dense output reshape.
    Bb = 300
    kbs, kba = jax.random.split(k_big)
    state_b = jax.random.normal(kbs, (Bb, OBS), jnp.float32)
    action_b = jax.random.normal(kba, (Bb, ACT), jnp.float32)
    q_b = critic_forward(state_b, action_b, params, config)
    jax.block_until_ready(q_b)
    q_b_ref = reference_forward(state_b, action_b, params, config)
    assert q_b.shape == (Bb, 1)
    assert jnp.allclose(q_b, q_b_ref, atol=1e-3, rtol=1e-3), "batched mismatch"

    print("KERNEL_OK")
</pallas_src>

<mosaic_0001>
module attributes {stable_mosaic.version = 11 : i64} {
  func.func @critic_kernel(%arg0: i32, %arg1: memref<128x32xbf16, #tpu.memory_space<vmem>>, %arg2: memref<128x8xbf16, #tpu.memory_space<vmem>>, %arg3: memref<32x512xbf16, #tpu.memory_space<vmem>>, %arg4: memref<3x512xf32, #tpu.memory_space<vmem>>, %arg5: memref<512x256xbf16, #tpu.memory_space<vmem>>, %arg6: memref<8x256xbf16, #tpu.memory_space<vmem>>, %arg7: memref<5x256xf32, #tpu.memory_space<vmem>>, %arg8: memref<1x1x128xf32, #tpu.memory_space<vmem>>) attributes {dimension_semantics = [#tpu.dimension_semantics<parallel>], iteration_bounds = array<i64: 1>, scalar_prefetch = 0 : i64, scratch_operands = 0 : i64, tpu.core_type = #tpu.core_type<tc>, window_params = [{transform_indices = @transform_0, window_bounds = array<i64: 128, 32>}, {transform_indices = @transform_1, window_bounds = array<i64: 128, 8>}, {pipeline_mode = #tpu.pipeline_mode<synchronous>, transform_indices = @transform_2, window_bounds = array<i64: 32, 512>}, {pipeline_mode = #tpu.pipeline_mode<synchronous>, transform_indices = @transform_3, window_bounds = array<i64: 3, 512>}, {pipeline_mode = #tpu.pipeline_mode<synchronous>, transform_indices = @transform_4, window_bounds = array<i64: 512, 256>}, {pipeline_mode = #tpu.pipeline_mode<synchronous>, transform_indices = @transform_5, window_bounds = array<i64: 8, 256>}, {pipeline_mode = #tpu.pipeline_mode<synchronous>, transform_indices = @transform_6, window_bounds = array<i64: 5, 256>}, {transform_indices = @transform_7, window_bounds = array<i64: 1, 1, 128>}]} {
    %c0 = arith.constant 0 : index
    %c0_0 = arith.constant 0 : index
    %0 = vector.load %arg1[%c0, %c0_0] : memref<128x32xbf16, #tpu.memory_space<vmem>>, vector<128x32xbf16>
    %c0_1 = arith.constant 0 : index
    %c0_2 = arith.constant 0 : index
    %1 = vector.load %arg2[%c0_1, %c0_2] : memref<128x8xbf16, #tpu.memory_space<vmem>>, vector<128x8xbf16>
    %c0_3 = arith.constant 0 : index
    %c0_4 = arith.constant 0 : index
    %2 = vector.load %arg4[%c0_3, %c0_4] : memref<3x512xf32, #tpu.memory_space<vmem>>, vector<1x512xf32>
    %c1 = arith.constant 1 : index
    %c0_5 = arith.constant 0 : index
    %3 = vector.load %arg4[%c1, %c0_5] : memref<3x512xf32, #tpu.memory_space<vmem>>, vector<1x512xf32>
    %c2 = arith.constant 2 : index
    %c0_6 = arith.constant 0 : index
    %4 = vector.load %arg4[%c2, %c0_6] : memref<3x512xf32, #tpu.memory_space<vmem>>, vector<1x512xf32>
    %c0_7 = arith.constant 0 : index
    %c0_8 = arith.constant 0 : index
    %5 = vector.load %arg3[%c0_7, %c0_8] : memref<32x512xbf16, #tpu.memory_space<vmem>>, vector<32x512xbf16>
    %cst = arith.constant dense<0.000000e+00> : vector<128x512xf32>
    %6 = tpu.matmul %0, %5, %cst {dimension_numbers = #tpu.dot_dimension_numbers<[1], [0], [0], [1], [0, 0, 1, 1], [], []>} : vector<128x32xbf16>, vector<32x512xbf16>, vector<128x512xf32> -> vector<128x512xf32>
    %7 = vector.broadcast %2 : vector<1x512xf32> to vector<128x512xf32>
    %8 = arith.addf %6, %7 : vector<128x512xf32>
    %cst_9 = arith.constant dense<0.000000e+00> : vector<128xf32>
    %9 = vector.multi_reduction <add>, %8, %cst_9 [1] : vector<128x512xf32> to vector<128xf32>
    %10 = vector.shape_cast %9 : vector<128xf32> to vector<128x1xf32>
    %cst_10 = arith.constant 0.001953125 : f32
    %11 = vector.broadcast %cst_10 : f32 to vector<128x1xf32>
    %12 = arith.mulf %10, %11 : vector<128x1xf32>
    %13 = arith.mulf %8, %8 : vector<128x512xf32>
    %cst_11 = arith.constant dense<0.000000e+00> : vector<128xf32>
    %14 = vector.multi_reduction <add>, %13, %cst_11 [1] : vector<128x512xf32> to vector<128xf32>
    %15 = vector.shape_cast %14 : vector<128xf32> to vector<128x1xf32>
    %cst_12 = arith.constant 0.001953125 : f32
    %16 = vector.broadcast %cst_12 : f32 to vector<128x1xf32>
    %17 = arith.mulf %15, %16 : vector<128x1xf32>
    %18 = arith.mulf %12, %12 : vector<128x1xf32>
    %19 = arith.subf %17, %18 : vector<128x1xf32>
    %20 = vector.broadcast %12 : vector<128x1xf32> to vector<128x512xf32>
    %21 = arith.subf %8, %20 : vector<128x512xf32>
    %cst_13 = arith.constant 9.99999974E-6 : f32
    %22 = vector.broadcast %cst_13 : f32 to vector<128x1xf32>
    %23 = arith.addf %19, %22 : vector<128x1xf32>
    %24 = math.rsqrt %23 : vector<128x1xf32>
    %25 = vector.broadcast %24 : vector<128x1xf32> to vector<128x512xf32>
    %26 = arith.mulf %21, %25 : vector<128x512xf32>
    %27 = vector.broadcast %3 : vector<1x512xf32> to vector<128x512xf32>
    %28 = arith.mulf %26, %27 : vector<128x512xf32>
    %29 = vector.broadcast %4 : vector<1x512xf32> to vector<128x512xf32>
    %30 = arith.addf %28, %29 : vector<128x512xf32>
    %cst_14 = arith.constant 0.000000e+00 : f32
    %31 = vector.broadcast %cst_14 : f32 to vector<128x512xf32>
    %32 = arith.maximumf %30, %31 : vector<128x512xf32>
    %c0_15 = arith.constant 0 : index
    %c0_16 = arith.constant 0 : index
    %33 = vector.load %arg7[%c0_15, %c0_16] : memref<5x256xf32, #tpu.memory_space<vmem>>, vector<1x256xf32>
    %c1_17 = arith.constant 1 : index
    %c0_18 = arith.constant 0 : index
    %34 = vector.load %arg7[%c1_17, %c0_18] : memref<5x256xf32, #tpu.memory_space<vmem>>, vector<1x256xf32>
    %c2_19 = arith.constant 2 : index
    %c0_20 = arith.constant 0 : index
    %35 = vector.load %arg7[%c2_19, %c0_20] : memref<5x256xf32, #tpu.memory_space<vmem>>, vector<1x256xf32>
    %c3 = arith.constant 3 : index
    %c0_21 = arith.constant 0 : index
    %36 = vector.load %arg7[%c3, %c0_21] : memref<5x256xf32, #tpu.memory_space<vmem>>, vector<1x256xf32>
    %c4 = arith.constant 4 : index
    %c0_22 = arith.constant 0 : index
    %37 = vector.load %arg7[%c4, %c0_22] : memref<5x256xf32, #tpu.memory_space<vmem>>, vector<1x1xf32>
    %38 = arith.truncf %32 : vector<128x512xf32> to vector<128x512xbf16>
    %c0_23 = arith.constant 0 : index
    %c0_24 = arith.constant 0 : index
    %39 = vector.load %arg5[%c0_23, %c0_24] : memref<512x256xbf16, #tpu.memory_space<vmem>>, vector<512x256xbf16>
    %cst_25 = arith.constant dense<0.000000e+00> : vector<128x256xf32>
    %40 = tpu.matmul %38, %39, %cst_25 {dimension_numbers = #tpu.dot_dimension_numbers<[1], [0], [0], [1], [0, 0, 1, 1], [], []>} : vector<128x512xbf16>, vector<512x256xbf16>, vector<128x256xf32> -> vector<128x256xf32>
    %c0_26 = arith.constant 0 : index
    %c0_27 = arith.constant 0 : index
    %41 = vector.load %arg6[%c0_26, %c0_27] : memref<8x256xbf16, #tpu.memory_space<vmem>>, vector<8x256xbf16>
    %cst_28 = arith.constant dense<0.000000e+00> : vector<128x256xf32>
    %42 = tpu.matmul %1, %41, %cst_28 {dimension_numbers = #tpu.dot_dimension_numbers<[1], [0], [0], [1], [0, 0, 1, 1], [], []>} : vector<128x8xbf16>, vector<8x256xbf16>, vector<128x256xf32> -> vector<128x256xf32>
    %43 = arith.addf %40, %42 : vector<128x256xf32>
    %44 = vector.broadcast %33 : vector<1x256xf32> to vector<128x256xf32>
    %45 = arith.addf %43, %44 : vector<128x256xf32>
    %cst_29 = arith.constant dense<0.000000e+00> : vector<128xf32>
    %46 = vector.multi_reduction <add>, %45, %cst_29 [1] : vector<128x256xf32> to vector<128xf32>
    %47 = vector.shape_cast %46 : vector<128xf32> to vector<128x1xf32>
    %cst_30 = arith.constant 0.00393700786 : f32
    %48 = vector.broadcast %cst_30 : f32 to vector<128x1xf32>
    %49 = arith.mulf %47, %48 : vector<128x1xf32>
    %50 = arith.mulf %45, %45 : vector<128x256xf32>
    %cst_31 = arith.constant dense<0.000000e+00> : vector<128xf32>
    %51 = vector.multi_reduction <add>, %50, %cst_31 [1] : vector<128x256xf32> to vector<128xf32>
    %52 = vector.shape_cast %51 : vector<128xf32> to vector<128x1xf32>
    %cst_32 = arith.constant 0.00393700786 : f32
    %53 = vector.broadcast %cst_32 : f32 to vector<128x1xf32>
    %54 = arith.mulf %52, %53 : vector<128x1xf32>
    %55 = arith.mulf %49, %49 : vector<128x1xf32>
    %56 = arith.subf %54, %55 : vector<128x1xf32>
    %57 = vector.broadcast %49 : vector<128x1xf32> to vector<128x256xf32>
    %58 = arith.subf %45, %57 : vector<128x256xf32>
    %cst_33 = arith.constant 9.99999974E-6 : f32
    %59 = vector.broadcast %cst_33 : f32 to vector<128x1xf32>
    %60 = arith.addf %56, %59 : vector<128x1xf32>
    %61 = math.rsqrt %60 : vector<128x1xf32>
    %62 = vector.broadcast %61 : vector<128x1xf32> to vector<128x256xf32>
    %63 = arith.mulf %58, %62 : vector<128x256xf32>
    %64 = vector.broadcast %34 : vector<1x256xf32> to vector<128x256xf32>
    %65 = arith.mulf %63, %64 : vector<128x256xf32>
    %66 = vector.broadcast %35 : vector<1x256xf32> to vector<128x256xf32>
    %67 = arith.addf %65, %66 : vector<128x256xf32>
    %cst_34 = arith.constant 0.000000e+00 : f32
    %68 = vector.broadcast %cst_34 : f32 to vector<128x256xf32>
    %69 = arith.maximumf %67, %68 : vector<128x256xf32>
    %70 = vector.broadcast %36 : vector<1x256xf32> to vector<128x256xf32>
    %71 = arith.mulf %69, %70 : vector<128x256xf32>
    %cst_35 = arith.constant dense<0.000000e+00> : vector<128xf32>
    %72 = vector.multi_reduction <add>, %71, %cst_35 [1] : vector<128x256xf32> to vector<128xf32>
    %73 = vector.shape_cast %72 : vector<128xf32> to vector<1x128xf32>
    %74 = vector.broadcast %37 : vector<1x1xf32> to vector<1x128xf32>
    %75 = arith.addf %73, %74 : vector<1x128xf32>
    %c0_36 = arith.constant 0 : index
    %c0_37 = arith.constant 0 : index
    %c0_38 = arith.constant 0 : index
    %76 = vector.load %arg8[%c0_36, %c0_37, %c0_38] : memref<1x1x128xf32, #tpu.memory_space<vmem>>, vector<1x1x128xf32>
    %77 = vector.shape_cast %76 : vector<1x1x128xf32> to vector<1x128xf32>
    %78 = vector.shape_cast %75 : vector<1x128xf32> to vector<1x1x128xf32>
    tpu.vector_store %arg8[%c0_36, %c0_37, %c0_38], %78 {strides = array<i32>} : memref<1x1x128xf32, #tpu.memory_space<vmem>>, vector<1x1x128xf32>,
    return
  }
  func.func @transform_0(%arg0: i32) -> (i32, i32) {
    %c0_i32 = arith.constant 0 : i32
    %c0_i32_0 = arith.constant 0 : i32
    return %arg0, %c0_i32 : i32, i32
  }
  func.func @transform_1(%arg0: i32) -> (i32, i32) {
    %c0_i32 = arith.constant 0 : i32
    %c0_i32_0 = arith.constant 0 : i32
    return %arg0, %c0_i32 : i32, i32
  }
  func.func @transform_2(%arg0: i32) -> (i32, i32) {
    %c0_i32 = arith.constant 0 : i32
    %c0_i32_0 = arith.constant 0 : i32
    %c0_i32_1 = arith.constant 0 : i32
    return %c0_i32, %c0_i32_0 : i32, i32
  }
  func.func @transform_3(%arg0: i32) -> (i32, i32) {
    %c0_i32 = arith.constant 0 : i32
    %c0_i32_0 = arith.constant 0 : i32
    %c0_i32_1 = arith.constant 0 : i32
    return %c0_i32, %c0_i32_0 : i32, i32
  }
  func.func @transform_4(%arg0: i32) -> (i32, i32) {
    %c0_i32 = arith.constant 0 : i32
    %c0_i32_0 = arith.constant 0 : i32
    %c0_i32_1 = arith.constant 0 : i32
    return %c0_i32, %c0_i32_0 : i32, i32
  }
  func.func @transform_5(%arg0: i32) -> (i32, i32) {
    %c0_i32 = arith.constant 0 : i32
    %c0_i32_0 = arith.constant 0 : i32
    %c0_i32_1 = arith.constant 0 : i32
    return %c0_i32, %c0_i32_0 : i32, i32
  }
  func.func @transform_6(%arg0: i32) -> (i32, i32) {
    %c0_i32 = arith.constant 0 : i32
    %c0_i32_0 = arith.constant 0 : i32
    %c0_i32_1 = arith.constant 0 : i32
    return %c0_i32, %c0_i32_0 : i32, i32
  }
  func.func @transform_7(%arg0: i32) -> (i32, i32, i32) {
    %c0_i32 = arith.constant 0 : i32
    %c0_i32_0 = arith.constant 0 : i32
    %c0_i32_1 = arith.constant 0 : i32
    return %arg0, %c0_i32, %c0_i32_0 : i32, i32, i32
  }
}

</mosaic_0001>

<bundles_post_ra>
// kernel: tpu_custom_call.1
= control target key start
LH: loop header
LB: loop body
LE: loop exit
PB: predicated region body
PF: predicated region fallthrough
CT: control target
= control target key end

     0   :  { %12 = vsyncpa [#allocation3], 0  ;;  %s5730_s0 = inlined_call_operand.vmem [shape: bf16[128,32], index: 0, kind: input, shape index: {}]   ;;  %s5731_s1 = inlined_call_operand.vmem [shape: bf16[128,8], index: 1, kind: input, shape index: {}]   ;;  %s5732_s2 = inlined_call_operand.vmem [shape: bf16[32,512], index: 2, kind: input, shape index: {}]   ;;  %s5733_s3 = inlined_call_operand.vmem [shape: f32[3,512], index: 3, kind: input, shape index: {}]   ;;  %s5734_s4 = inlined_call_operand.hbm [shape: bf16[512,256], index: 4, kind: input, shape index: {}]   ;;  %s5735_s5 = inlined_call_operand.vmem [shape: bf16[8,256], index: 5, kind: input, shape index: {}]   ;;  %s5736_s6 = inlined_call_operand.vmem [shape: f32[5,256], index: 6, kind: input, shape index: {}]   ;;  %s5737_s7 = inlined_call_operand.hbm [shape: f32[1,1,128], index: 7, kind: output, shape index: {}]  }
   0x1   :  { %13 = vsyncpa [#allocation4], 0  ;;  %s26_s26 = sshll.u32 %s5734_s4, 4  ;;  %s3592_s27 = smov [#allocation2]   ;;  %s27_s26 = int_to_ptr.hbm [resolvable:$true] %s26_s26 }
   0x2   :  { %s28_s28 = sshll.u32 %s3592_s27, 4  ;;  %s3593_s29 = smov 128   ;;  %s29_s28 = int_to_ptr.vmem [resolvable:$true] %s28_s28 }
   0x3   :  { %s3594_s30 = smov 8  }
   0x4   :  { %34 = dma.hbm_to_vmem [thread:$0]  %s27_s26, 8192, %s29_s28, [#allocation3], %s3593_s29, %s3593_s29, %s3594_s30  }
   0x5   :  { %3588 = dma.done.wait [#allocation3], 8192  }
   0x6   :  { %3589 = vsyncadd [#allocation3], 4294959104  ;;  %v3024_v0 = vld [vmem:[%s5732_s2 + $0x20] sm:$0xf]  ;;  %v3399_v1 = vld [vmem:[%s5732_s2 + $0x2c] sm:$0xf0] }
   0x7   :  { %v3397_v2 = vld [vmem:[%s5732_s2 + $0x24] sm:$0xf]  ;;  %v3025_v3 = vor.u32 %v3399_v1, %v3024_v0  ;;  %v3026_v4 = vld [vmem:[%s5732_s2 + $0x30] sm:$0xf0]  ;;  %v3008_v5 = vld [vmem:[%s5732_s2] sm:$0xf] }
   0x8   :  { %v3395_v6 = vld [vmem:[%s5732_s2 + $0xc] sm:$0xf0]  ;;  %v3029_v7 = vor.u32 %v3397_v2, %v3026_v4  ;;  %v3393_v8 = vld [vmem:[%s5732_s2 + $0x4] sm:$0xf]  ;;  %v3010_v9 = vld [vmem:[%s5732_s2 + $0x10] sm:$0xf0] }
   0x9   :  { %3465 = vmatpush.bf16.msra.mxu2 %v3025_v3  ;;  %v3009_v10 = vor.u32 %v3395_v6, %v3008_v5  ;;  %v3032_v11 = vld [vmem:[%s5732_s2 + $0x28] sm:$0xf]  ;;  %v3400_v12 = vld [vmem:[%s5732_s2 + $0x34] sm:$0xf0]  ;;  %v3398_v13 = vld [vmem:[%s5732_s2 + $0x2c] sm:$0xf]  ;;  %209 = vmatpush.bf16.msra.mxu0 %v3025_v3  ;;  %v3013_v14 = vor.u32 %v3393_v8, %v3010_v9 }
   0xa   :  { %3467 = vmatpush.bf16.msra.mxu3 %v3029_v7  ;;  %v3033_v15 = vor.u32 %v3400_v12, %v3032_v11  ;;  %v3034_v16 = vld [vmem:[%s5732_s2 + $0x38] sm:$0xf0]  ;;  %258 = vmatpush.bf16.msra.mxu1 %v3029_v7  ;;  %v3381_v18 = vld [vmem:[%s5730_s0 + $0x20] sm:$0xff]  ;;  %vm178_vm0 = vcmask 261120   ;;  %v3016_v19 = vld [vmem:[%s5732_s2 + $0x8] sm:$0xf] }
   0xb   :  { %v3037_v17 = vor.u32 %v3398_v13, %v3034_v16  ;;  %v3396_v20 = vld [vmem:[%s5732_s2 + $0x14] sm:$0xf0]  ;;  %v3394_v21 = vld [vmem:[%s5732_s2 + $0xc] sm:$0xf]  ;;  %v3018_v23 = vld [vmem:[%s5732_s2 + $0x18] sm:$0xf0] }
   0xc   :  { %v3017_v22 = vor.u32 %v3396_v20, %v3016_v19  ;;  %v3021_v24 = vor.u32 %v3394_v21, %v3018_v23  ;;  %v3382_v25 = vld [vmem:[%s5730_s0 + $0x28] sm:$0xff]  ;;  %v3377_v26 = vld [vmem:[%s5730_s0] sm:$0xff]  ;;  %v3383_v27 = vld [vmem:[%s5730_s0 + $0x30] sm:$0xff]  ;;  %vm1376_vm1 = vcmask 1043456   ;;  %vm1351_vm2 = vcmask 64512   ;;  %s2962_s13 = sshll.u32 %s5737_s7, 4  ;;  %s2963_s13 = int_to_ptr.hbm [resolvable:$true] %s2962_s13 }
   0xd   :  { %3466 = vmatpush.bf16.msra.mxu2 %v3009_v10  ;;  %210 = vmatpush.bf16.msra.mxu0 %v3009_v10  ;;  %v3378_v28 = vld [vmem:[%s5730_s0 + $0x8] sm:$0xff]  ;;  %v3384_v29 = vld [vmem:[%s5730_s0 + $0x38] sm:$0xff]  ;;  %v3379_v30 = vld [vmem:[%s5730_s0 + $0x10] sm:$0xff] }
   0xe   :  { %3468 = vmatpush.bf16.msra.mxu3 %v3013_v14  ;;  %259 = vmatpush.bf16.msra.mxu1 %v3013_v14  ;;  %v3380_v31 = vld [vmem:[%s5730_s0 + $0x18] sm:$0xff]  ;;  %v1305_v38 = vld [vmem:[%s5735_s5] sm:$0xff] }
   0xf   :  { %v1347_v39 = vunpack.c.l.b16 %v1305_v38  ;;  %v1348_v40 = vunpack.c.h.b16 %v1305_v38  ;;  %v76_v56 = vld [vmem:[%s5733_s3] ss:$4 sm:$0xf] }
  0x10   :  { %3042 = vmatmul.msk.bf16.vlgmr.msra.gmra.mxu2 %vm178_vm0, %v3381_v18  ;;  %3038 = vmatmul.msk.bf16.vlgmr.msra.gmra.mxu0 %vm178_vm0, %v3377_v26  ;;  %v3778_v58 = vperm.slane %v76_v56, 0  ;;  %v3780_v59 = vperm.slane %v76_v56, 1  ;;  %v3796_v2 = vperm.slane %v76_v56, 2  ;;  %v3798_v4 = vperm.slane %v76_v56, 3  ;;  %v3385_v16 = vld [vmem:[%s5731_s1] sm:$0xff] }
  0x11   :  { %307 = vmatpush.bf16.msrb.mxu2 %v3033_v15  ;;  %3050 = vmatmul.msk.bf16.vlgmr.msra.gmra.mxu3 %vm178_vm0, %v3381_v18  ;;  %v1349_v41 = vpack.c.b16 %v1347_v39, %v1347_v39  ;;  %v1350_v42 = vpack.c.b16 %v1348_v40, %v1348_v40 }
  0x12   :  { %356 = vmatpush.bf16.msrb.mxu3 %v3037_v17  ;;  %3046 = vmatmul.msk.bf16.vlgmr.msra.gmra.mxu1 %vm178_vm0, %v3377_v26  ;;  %v3179_v17 = vld [vmem:[#allocation2 + $0x70] sm:$0xf] }
  0x13   :  { %v1378_v45 = vsel %vm1376_vm1, %v1349_v41, 0  ;;  %v1381_v46 = vsel %vm1376_vm1, %v1350_v42, 0  ;;  %v3243_v41 = vld [vmem:[#allocation2 + $0xf0] sm:$0xf]  ;;  %v3432_v42 = vld [vmem:[#allocation2 + $0xf4] sm:$0xf0] }
  0x14   :  { %1390 = vmatpush.bf16.msrb.mxu0 %v1378_v45  ;;  %1439 = vmatpush.bf16.msrb.mxu1 %v1381_v46 }
  0x15   :  { %308 = vmatpush.bf16.msrb.mxu2 %v3017_v22 }
  0x16   :  { %357 = vmatpush.bf16.msrb.mxu3 %v3021_v24 }
  0x20   :  { %3043 = vmatmul.msk.bf16.gmra.mxu2 %vm178_vm0, %v3382_v25  ;;  %3039 = vmatmul.msk.bf16.gmra.mxu0 %vm178_vm0, %v3378_v28 }
  0x21   :  { %3051 = vmatmul.msk.bf16.gmra.mxu3 %vm178_vm0, %v3382_v25 }
  0x22   :  { %3047 = vmatmul.msk.bf16.gmra.mxu1 %vm178_vm0, %v3378_v28 }
  0x30   :  { %3044 = vmatmul.msk.bf16.gmra.mxu2 %vm178_vm0, %v3383_v27  ;;  %3040 = vmatmul.msk.bf16.gmra.mxu0 %vm178_vm0, %v3379_v30 }
  0x31   :  { %3052 = vmatmul.msk.bf16.gmra.mxu3 %vm178_vm0, %v3383_v27 }
  0x32   :  { %3048 = vmatmul.msk.bf16.gmra.mxu1 %vm178_vm0, %v3379_v30 }
  0x40   :  { %3045 = vmatmul.msk.bf16.gmra.mxu2 %vm178_vm0, %v3384_v29  ;;  %3041 = vmatmul.msk.bf16.gmra.mxu0 %vm178_vm0, %v3380_v31 }
  0x41   :  { %3053 = vmatmul.msk.bf16.gmra.mxu3 %vm178_vm0, %v3384_v29 }
  0x42   :  { %3049 = vmatmul.msk.bf16.gmra.mxu1 %vm178_vm0, %v3380_v31 }
  0x50   :  { %3054 = vmatmul.msk.bf16.vlgmr.msrb.gmra.mxu2 %vm178_vm0, %v3377_v26  ;;  %3105 = vmatmul.msk.bf16.vlgmr.msrb.gmra.mxu0 %vm1351_vm2, %v3385_v16 }
  0x51   :  { %3062 = vmatmul.msk.bf16.vlgmr.msrb.gmra.mxu3 %vm178_vm0, %v3377_v26 }
  0x52   :  { %3113 = vmatmul.msk.bf16.vlgmr.msrb.gmra.mxu1 %vm1351_vm2, %v3385_v16 }
  0x60   :  { %3055 = vmatmul.msk.bf16.gmra.mxu2 %vm178_vm0, %v3378_v28 }
  0x61   :  { %3063 = vmatmul.msk.bf16.gmra.mxu3 %vm178_vm0, %v3378_v28 }
  0x70   :  { %3056 = vmatmul.msk.bf16.gmra.mxu2 %vm178_vm0, %v3379_v30 }
  0x71   :  { %3064 = vmatmul.msk.bf16.gmra.mxu3 %vm178_vm0, %v3379_v30 }
  0x80   :  { %3057 = vmatmul.msk.bf16.gmra.mxu2 %vm178_vm0, %v3380_v31 }
  0x81   :  { %3065 = vmatmul.msk.bf16.gmra.mxu3 %vm178_vm0, %v3380_v31 }
  0x8d   :  { %v212_v51 = vpop.f32.mrf.mxu0 }
  0x8e   :  { %v3785_v61 = vadd.f32 %v212_v51, %v3778_v58 }
  0x8f   :  { %v261_v52 = vpop.f32.mrf.mxu1 }
  0x90   :  { %3058 = vmatmul.msk.bf16.gmra.mxu2 %vm178_vm0, %v3381_v18  ;;  %v3788_v62 = vadd.f32 %v261_v52, %v3780_v59  ;;  %v495_v0 = vmul.f32 %v3785_v61, %v3785_v61  ;;  %v3244_v52 = vor.u32 %v3432_v42, %v3243_v41  ;;  %v3414_v42 = vld [vmem:[#allocation2 + $0x64] sm:$0xf0] }
  0x91   :  { %3066 = vmatmul.msk.bf16.gmra.mxu3 %vm178_vm0, %v3381_v18  ;;  %v3416_v18 = vld [vmem:[#allocation2 + $0x74] sm:$0xf0] }
  0x92   :  { %v496_v1 = vmul.f32 %v3788_v62, %v3788_v62  ;;  %v399_v6 = vadd.f32 %v3788_v62, %v3785_v61  ;;  %v3180_v20 = vor.u32 %v3416_v18, %v3179_v17  ;;  %1850 = vmatpush.bf16.msra.mxu3 %v3244_v52 }
  0x93   :  { %v3738_v32 = vpop.f32.mrf.mxu2 }
  0x94   :  { %v3740_v33 = vpop.f32.mrf.mxu3  ;;  %v559_v10 = vadd.f32 %v496_v1, %v495_v0  ;;  %1801 = vmatpush.bf16.msra.mxu2 %v3180_v20 }
  0x95   :  { %v214_v55 = vpop.f32.mrf.mxu0 }
  0x96   :  { %v3806_v11 = vadd.f32 %v214_v55, %v3778_v58 }
  0x97   :  { %v263_v57 = vpop.f32.mrf.mxu1 }
  0x98   :  { %v3812_v13 = vadd.f32 %v263_v57, %v3780_v59  ;;  %v499_v23 = vmul.f32 %v3806_v11, %v3806_v11 }
  0x9a   :  { %v500_v24 = vmul.f32 %v3812_v13, %v3812_v13  ;;  %v404_v39 = vadd.f32 %v3812_v13, %v3806_v11 }
  0x9b   :  { %v3742_v34 = vpop.f32.mrf.mxu2 }
  0x9c   :  { %v3744_v35 = vpop.f32.mrf.mxu3  ;;  %v564_v51 = vadd.f32 %v500_v24, %v499_v23  ;;  %v3371_v23 = vld [vmem:[#allocation2 + $0x1f0] sm:$0xf] }
  0x9d   :  { %v217_v3 = vpop.f32.mrf.mxu0 }
  0x9f   :  { %v266_v5 = vpop.f32.mrf.mxu1 }
  0xa0   :  { %3059 = vmatmul.msk.bf16.gmra.mxu2 %vm178_vm0, %v3382_v25  ;;  %v3833_v30 = vadd.f32 %v266_v5, %v3780_v59 }
  0xa1   :  { %3067 = vmatmul.msk.bf16.gmra.mxu3 %vm178_vm0, %v3382_v25 }
  0xa2   :  { %v504_v56 = vmul.f32 %v3833_v30, %v3833_v30 }
  0xa3   :  { %v3748_v36 = vpop.f32.mrf.mxu2 }
  0xa4   :  { %v3750_v37 = vpop.f32.mrf.mxu3 }
  0xa5   :  { %v219_v26 = vpop.f32.mrf.mxu0 }
  0xa6   :  { %v3862_v17 = vadd.f32 %v219_v26, %v3778_v58  ;;  %v3386_v26 = vld [vmem:[%s5731_s1 + $0x8] sm:$0xff] }
  0xa7   :  { %3114 = vmatmul.msk.bf16.gmra.mxu1 %vm1351_vm2, %v3386_v26  ;;  %3106 = vmatmul.msk.bf16.gmra.mxu0 %vm1351_vm2, %v3386_v26 }
  0xab   :  { %v3755_v43 = vpop.f32.mrf.mxu2 }
  0xac   :  { %v3757_v44 = vpop.f32.mrf.mxu3 }
  0xb0   :  { %3060 = vmatmul.msk.bf16.gmra.mxu2 %vm178_vm0, %v3383_v27 }
  0xb1   :  { %3068 = vmatmul.msk.bf16.gmra.mxu3 %vm178_vm0, %v3383_v27  ;;  %v3830_v27 = vadd.f32 %v217_v3, %v3778_v58 }
  0xb3   :  { %v3761_v47 = vpop.f32.mrf.mxu2  ;;  %v503_v55 = vmul.f32 %v3830_v27, %v3830_v27  ;;  %v409_v5 = vadd.f32 %v3833_v30, %v3830_v27 }
  0xb4   :  { %v3763_v48 = vpop.f32.mrf.mxu3 }
  0xbb   :  { %v3765_v49 = vpop.f32.mrf.mxu2 }
  0xbc   :  { %v3767_v50 = vpop.f32.mrf.mxu3 }
  0xc0   :  { %3061 = vmatmul.msk.bf16.gmra.mxu2 %vm178_vm0, %v3384_v29 }
  0xc1   :  { %3069 = vmatmul.msk.bf16.gmra.mxu3 %vm178_vm0, %v3384_v29  ;;  %v268_v29 = vpop.f32.mrf.mxu1 }
  0xc2   :  { %v3865_v18 = vadd.f32 %v268_v29, %v3780_v59 }
  0xc3   :  { %v3771_v53 = vpop.f32.mrf.mxu2 }
  0xc4   :  { %v3773_v54 = vpop.f32.mrf.mxu3 }
  0xc9   :  { %v271_v16 = vpop.f32.mrf.mxu1 }
  0xcb   :  { %v3782_v60 = vpop.f32.mrf.mxu2 }
  0xcc   :  { %v3790_v63 = vpop.f32.mrf.mxu3 }
  0xd3   :  { %v310_v7 = vpop.f32.mrf.mxu2 }
  0xd4   :  { %v3803_v8 = vadd.f32 %v310_v7, %v3796_v2  ;;  %v359_v9 = vpop.f32.mrf.mxu3 }
  0xd5   :  { %v3809_v12 = vadd.f32 %v359_v9, %v3798_v4 }
  0xd6   :  { %v400_v14 = vadd.f32 %v399_v6, %v3803_v8  ;;  %v497_v15 = vmul.f32 %v3803_v8, %v3803_v8 }
  0xd7   :  { %v498_v19 = vmul.f32 %v3809_v12, %v3809_v12 }
  0xd8   :  { %v401_v21 = vadd.f32 %v400_v14, %v3809_v12  ;;  %v560_v22 = vadd.f32 %v559_v10, %v497_v15  ;;  %v222_v10 = vpop.f32.mrf.mxu0  ;;  %v569_v14 = vadd.f32 %v504_v56, %v503_v55 }
  0xd9   :  { %v3882_v55 = vadd.f32 %v222_v10, %v3778_v58 }
  0xda   :  { %402 = vadd.xlane.f32.xlu0 %v401_v21  ;;  %v561_v25 = vadd.f32 %v560_v22, %v498_v19  ;;  %v3307_v21 = vld [vmem:[#allocation2 + $0x170] sm:$0xf]  ;;  %v3448_v22 = vld [vmem:[#allocation2 + $0x174] sm:$0xf0] }
  0xdb   :  { %v312_v28 = vpop.f32.mrf.mxu2 }
  0xdc   :  { %v3836_v31 = vadd.f32 %v312_v28, %v3796_v2  ;;  %v361_v38 = vpop.f32.mrf.mxu3  ;;  %562 = vadd.xlane.f32.xlu1 %v561_v25  ;;  %v3308_v25 = vor.u32 %v3448_v22, %v3307_v21  ;;  %v3464_v28 = vld [vmem:[#allocation2 + $0x1f4] sm:$0xf0]  ;;  %v511_v21 = vmul.f32 %v3882_v55, %v3882_v55  ;;  %v273_v22 = vpop.f32.mrf.mxu1 }
  0xdd   :  { %v3841_v40 = vadd.f32 %v361_v38, %v3798_v4  ;;  %v3171_v38 = vld [vmem:[#allocation2 + $0x60] sm:$0xf]  ;;  %v3372_v41 = vor.u32 %v3464_v28, %v3371_v23 }
  0xde   :  { %v405_v45 = vadd.f32 %v404_v39, %v3836_v31  ;;  %v501_v46 = vmul.f32 %v3836_v31, %v3836_v31  ;;  %1899 = vmatpush.bf16.msra.mxu0 %v3308_v25 }
  0xdf   :  { %v502_v0 = vmul.f32 %v3841_v40, %v3841_v40  ;;  %1948 = vmatpush.bf16.msra.mxu1 %v3372_v41 }
  0xe0   :  { %v406_v57 = vadd.f32 %v405_v45, %v3841_v40  ;;  %v565_v1 = vadd.f32 %v564_v51, %v501_v46  ;;  %v3172_v45 = vor.u32 %v3414_v42, %v3171_v38  ;;  %v507_v46 = vmul.f32 %v3862_v17, %v3862_v17  ;;  %v224_v10 = vpop.f32.mrf.mxu0 }
  0xe1   :  { %v508_v51 = vmul.f32 %v3865_v18, %v3865_v18 }
  0xe2   :  { %407 = vadd.xlane.f32.xlu0 %v406_v57  ;;  %v566_v3 = vadd.f32 %v565_v1, %v502_v0  ;;  %1802 = vmatpush.bf16.msra.mxu2 %v3172_v45  ;;  %v3886_v57 = vadd.f32 %v271_v16, %v3780_v59 }
  0xe3   :  { %v315_v6 = vpop.f32.mrf.mxu2 }
  0xe4   :  { %v3856_v7 = vadd.f32 %v315_v6, %v3796_v2  ;;  %v364_v9 = vpop.f32.mrf.mxu3  ;;  %567 = vadd.xlane.f32.xlu1 %v566_v3  ;;  %v414_v3 = vadd.f32 %v3865_v18, %v3862_v17  ;;  %v3235_v6 = vld [vmem:[#allocation2 + $0xe0] sm:$0xf]  ;;  %v512_v23 = vmul.f32 %v3886_v57, %v3886_v57  ;;  %v419_v26 = vadd.f32 %v3886_v57, %v3882_v55 }
  0xe5   :  { %v3859_v15 = vadd.f32 %v364_v9, %v3798_v4  ;;  %v3430_v9 = vld [vmem:[#allocation2 + $0xe4] sm:$0xf0] }
  0xe6   :  { %v505_v19 = vmul.f32 %v3856_v7, %v3856_v7  ;;  %v410_v20 = vadd.f32 %v409_v5, %v3856_v7  ;;  %v579_v42 = vadd.f32 %v512_v23, %v511_v21 }
  0xe7   :  { %v506_v24 = vmul.f32 %v3859_v15, %v3859_v15 }
  0xe8   :  { %v411_v29 = vadd.f32 %v410_v20, %v3859_v15  ;;  %v570_v39 = vadd.f32 %v569_v14, %v505_v19  ;;  %v574_v19 = vadd.f32 %v508_v51, %v507_v46  ;;  %v3236_v20 = vor.u32 %v3430_v9, %v3235_v6  ;;  %v3363_v6 = vld [vmem:[#allocation2 + $0x1e0] sm:$0xf] }
  0xe9   :  { %v3915_v46 = vadd.f32 %v224_v10, %v3778_v58  ;;  %v3918_v51 = vadd.f32 %v273_v22, %v3780_v59  ;;  %v3387_v10 = vld [vmem:[%s5731_s1 + $0x10] sm:$0xff] }
  0xea   :  { %412 = vadd.xlane.f32.xlu2 %v411_v29  ;;  %v571_v52 = vadd.f32 %v570_v39, %v506_v24  ;;  %1851 = vmatpush.bf16.msra.mxu3 %v3236_v20  ;;  %v227_v20 = vpop.f32.mrf.mxu0 }
  0xeb   :  { %v317_v56 = vpop.f32.mrf.mxu2  ;;  %3115 = vmatmul.msk.bf16.gmra.mxu1 %vm1351_vm2, %v3387_v10  ;;  %3107 = vmatmul.msk.bf16.gmra.mxu0 %vm1351_vm2, %v3387_v10 }
  0xec   :  { %v3889_v0 = vadd.f32 %v317_v56, %v3796_v2  ;;  %v366_v1 = vpop.f32.mrf.mxu3  ;;  %572 = vadd.xlane.f32.xlu0 %v571_v52 }
  0xed   :  { %v3894_v5 = vadd.f32 %v366_v1, %v3798_v4  ;;  %v3299_v1 = vld [vmem:[#allocation2 + $0x160] sm:$0xf] }
  0xee   :  { %v415_v14 = vadd.f32 %v414_v3, %v3889_v0  ;;  %v509_v16 = vmul.f32 %v3889_v0, %v3889_v0  ;;  %v3446_v3 = vld [vmem:[#allocation2 + $0x164] sm:$0xf0] }
  0xef   :  { %v510_v25 = vmul.f32 %v3894_v5, %v3894_v5 }
  0xf0   :  { %v416_v24 = vadd.f32 %v415_v14, %v3894_v5  ;;  %v575_v28 = vadd.f32 %v574_v19, %v509_v16  ;;  %v3300_v14 = vor.u32 %v3446_v3, %v3299_v1  ;;  %v3462_v16 = vld [vmem:[#allocation2 + $0x1e4] sm:$0xf0]  ;;  %v3163_v19 = vld [vmem:[#allocation2 + $0x50] sm:$0xf]  ;;  %v424_v3 = vadd.f32 %v3918_v51, %v3915_v46 }
  0xf1   :  { %v3364_v23 = vor.u32 %v3462_v16, %v3363_v6 }
  0xf2   :  { %417 = vadd.xlane.f32.xlu2 %v416_v24  ;;  %v576_v38 = vadd.f32 %v575_v28, %v510_v25  ;;  %v3412_v24 = vld [vmem:[#allocation2 + $0x54] sm:$0xf0]  ;;  %v276_v25 = vpop.f32.mrf.mxu1  ;;  %1900 = vmatpush.bf16.msra.mxu0 %v3300_v14 }
  0xf3   :  { %v320_v29 = vpop.f32.mrf.mxu2  ;;  %v3164_v28 = vor.u32 %v3412_v24, %v3163_v19  ;;  %1949 = vmatpush.bf16.msra.mxu1 %v3364_v23  ;;  %v3428_v14 = vld [vmem:[#allocation2 + $0xd4] sm:$0xf0] }
  0xf4   :  { %v3909_v39 = vadd.f32 %v320_v29, %v3796_v2  ;;  %v369_v41 = vpop.f32.mrf.mxu3  ;;  %577 = vadd.xlane.f32.xlu1 %v576_v38  ;;  %v516_v38 = vmul.f32 %v3918_v51, %v3918_v51 }
  0xf5   :  { %v3912_v45 = vadd.f32 %v369_v41, %v3798_v4  ;;  %v3935_v41 = vadd.f32 %v227_v20, %v3778_v58  ;;  %1803 = vmatpush.bf16.msra.mxu2 %v3164_v28 }
  0xf6   :  { %v513_v52 = vmul.f32 %v3909_v39, %v3909_v39  ;;  %v420_v56 = vadd.f32 %v419_v26, %v3909_v39  ;;  %v515_v26 = vmul.f32 %v3915_v46, %v3915_v46 }
  0xf7   :  { %v514_v9 = vmul.f32 %v3912_v45, %v3912_v45  ;;  %5777 = vst [vmem:[#allocation8_spill] sm:$0xff] %v3935_v41 }
  0xf8   :  { %v421_v21 = vadd.f32 %v420_v56, %v3912_v45  ;;  %v580_v22 = vadd.f32 %v579_v42, %v513_v52  ;;  %v3939_v52 = vadd.f32 %v276_v25, %v3780_v59  ;;  %v584_v19 = vadd.f32 %v516_v38, %v515_v26 }
  0xfa   :  { %422 = vadd.xlane.f32.xlu2 %v421_v21  ;;  %v581_v29 = vadd.f32 %v580_v22, %v514_v9  ;;  %5778 = vst [vmem:[#allocation9_spill] sm:$0xff] %v3939_v52  ;;  %v3227_v9 = vld [vmem:[#allocation2 + $0xd0] sm:$0xf]  ;;  %v519_v21 = vmul.f32 %v3935_v41, %v3935_v41  ;;  %v520_v22 = vmul.f32 %v3939_v52, %v3939_v52  ;;  %v278_v38 = vpop.f32.mrf.mxu1 }
  0xfb   :  { %v322_v42 = vpop.f32.mrf.mxu2  ;;  %v3228_v20 = vor.u32 %v3428_v14, %v3227_v9  ;;  %v429_v28 = vadd.f32 %v3939_v52, %v3935_v41  ;;  %v3410_v41 = vld [vmem:[#allocation2 + $0x44] sm:$0xf0] }
  0xfc   :  { %v3942_v56 = vadd.f32 %v322_v42, %v3796_v2  ;;  %v371_v1 = vpop.f32.mrf.mxu3  ;;  %582 = vadd.xlane.f32.xlu1 %v581_v29  ;;  %v229_v29 = vpop.f32.mrf.mxu0  ;;  %v589_v9 = vadd.f32 %v520_v22, %v519_v21 }
  0xfd   :  { %v3947_v6 = vadd.f32 %v371_v1, %v3798_v4  ;;  %1852 = vmatpush.bf16.msra.mxu3 %v3228_v20 }
  0xfe   :  { %v425_v16 = vadd.f32 %v424_v3, %v3942_v56  ;;  %v517_v10 = vmul.f32 %v3942_v56, %v3942_v56 }
  0xff   :  { %5779 = vst [vmem:[#allocation10_spill] sm:$0xff] %v3947_v6  ;;  %v518_v24 = vmul.f32 %v3947_v6, %v3947_v6 }
 0x100   :  { %v426_v23 = vadd.f32 %v425_v16, %v3947_v6  ;;  %v585_v25 = vadd.f32 %v584_v19, %v517_v10  ;;  %v3968_v16 = vadd.f32 %v229_v29, %v3778_v58  ;;  %v3971_v10 = vadd.f32 %v278_v38, %v3780_v59  ;;  %v3388_v29 = vld [vmem:[%s5731_s1 + $0x18] sm:$0xff] }
 0x101   :  { %3116 = vmatmul.msk.bf16.gmra.mxu1 %vm1351_vm2, %v3388_v29  ;;  %3108 = vmatmul.msk.bf16.gmra.mxu0 %vm1351_vm2, %v3388_v29 }
 0x102   :  { %427 = vadd.xlane.f32.xlu0 %v426_v23  ;;  %v586_v26 = vadd.f32 %v585_v25, %v518_v24  ;;  %v3291_v23 = vld [vmem:[#allocation2 + $0x150] sm:$0xf]  ;;  %v3444_v24 = vld [vmem:[#allocation2 + $0x154] sm:$0xf0] }
 0x103   :  { %v325_v42 = vpop.f32.mrf.mxu2  ;;  %v3355_v25 = vld [vmem:[#allocation2 + $0x1d0] sm:$0xf]  ;;  %v3292_v22 = vor.u32 %v3444_v24, %v3291_v23  ;;  %v524_v23 = vmul.f32 %v3971_v10, %v3971_v10 }
 0x104   :  { %v3962_v1 = vadd.f32 %v325_v42, %v3796_v2  ;;  %v374_v3 = vpop.f32.mrf.mxu3  ;;  %587 = vadd.xlane.f32.xlu2 %v586_v26  ;;  %v3460_v26 = vld [vmem:[#allocation2 + $0x1d4] sm:$0xf0]  ;;  %v3155_v42 = vld [vmem:[#allocation2 + $0x40] sm:$0xf] }
 0x105   :  { %v3965_v14 = vadd.f32 %v374_v3, %v3798_v4  ;;  %v3356_v52 = vor.u32 %v3460_v26, %v3355_v25  ;;  %1901 = vmatpush.bf16.msra.mxu0 %v3292_v22  ;;  %v3999_v25 = vadd.f32 %v3740_v33, %v3780_v59  ;;  %v3426_v22 = vld [vmem:[#allocation2 + $0xc4] sm:$0xf0] }
 0x106   :  { %5780 = vst [vmem:[#allocation11_spill] sm:$0xff] %v3962_v1  ;;  %v521_v19 = vmul.f32 %v3962_v1, %v3962_v1  ;;  %v430_v20 = vadd.f32 %v429_v28, %v3962_v1  ;;  %v3156_v28 = vor.u32 %v3410_v41, %v3155_v42  ;;  %v523_v1 = vmul.f32 %v3968_v16, %v3968_v16 }
 0x107   :  { %5781 = vst [vmem:[#allocation12_spill] sm:$0xff] %v3965_v14  ;;  %v522_v21 = vmul.f32 %v3965_v14, %v3965_v14  ;;  %1950 = vmatpush.bf16.msra.mxu1 %v3356_v52  ;;  %v434_v41 = vadd.f32 %v3971_v10, %v3968_v16 }
 0x108   :  { %v431_v38 = vadd.f32 %v430_v20, %v3965_v14  ;;  %v590_v3 = vadd.f32 %v589_v9, %v521_v19  ;;  %1804 = vmatpush.bf16.msra.mxu2 %v3156_v28  ;;  %v3995_v20 = vadd.f32 %v3738_v32, %v3778_v58  ;;  %5783 = vst [vmem:[#allocation14_spill] sm:$0xff] %v3999_v25  ;;  %v3408_v14 = vld [vmem:[#allocation2 + $0x34] sm:$0xf0] }
 0x109   :  { %v594_v29 = vadd.f32 %v524_v23, %v523_v1  ;;  %v528_v28 = vmul.f32 %v3999_v25, %v3999_v25 }
 0x10a   :  { %432 = vadd.xlane.f32.xlu0 %v431_v38  ;;  %v591_v24 = vadd.f32 %v590_v3, %v522_v21  ;;  %5782 = vst [vmem:[#allocation13_spill] sm:$0xff] %v3995_v20  ;;  %v3219_v21 = vld [vmem:[#allocation2 + $0xc0] sm:$0xf]  ;;  %v527_v33 = vmul.f32 %v3995_v20, %v3995_v20  ;;  %v439_v1 = vadd.f32 %v3999_v25, %v3995_v20 }
 0x10b   :  { %v327_v6 = vpop.f32.mrf.mxu2  ;;  %v3220_v42 = vor.u32 %v3426_v22, %v3219_v21  ;;  %v4021_v21 = vadd.f32 %v3742_v34, %v3778_v58  ;;  %v4025_v22 = vadd.f32 %v3744_v35, %v3780_v59  ;;  %v3389_v35 = vld [vmem:[%s5731_s1 + $0x20] sm:$0xff] }
 0x10c   :  { %v3989_v9 = vadd.f32 %v327_v6, %v3796_v2  ;;  %v376_v19 = vpop.f32.mrf.mxu3  ;;  %592 = vadd.xlane.f32.xlu2 %v591_v24 }
 0x10d   :  { %v4002_v52 = vadd.f32 %v376_v19, %v3798_v4  ;;  %1853 = vmatpush.bf16.msra.mxu3 %v3220_v42  ;;  %v599_v42 = vadd.f32 %v528_v28, %v527_v33  ;;  %v531_v33 = vmul.f32 %v4021_v21, %v4021_v21  ;;  %v532_v28 = vmul.f32 %v4025_v22, %v4025_v22 }
 0x10e   :  { %v435_v6 = vadd.f32 %v434_v41, %v3989_v9  ;;  %v525_v26 = vmul.f32 %v3989_v9, %v3989_v9 }
 0x10f   :  { %5784 = vst [vmem:[#allocation15_spill] sm:$0xff] %v4002_v52  ;;  %v526_v32 = vmul.f32 %v4002_v52, %v4002_v52 }
 0x110   :  { %v436_v38 = vadd.f32 %v435_v6, %v4002_v52  ;;  %v595_v3 = vadd.f32 %v594_v29, %v525_v26 }
 0x111   :  { %3117 = vmatmul.msk.bf16.gmra.mxu1 %vm1351_vm2, %v3389_v35  ;;  %3109 = vmatmul.msk.bf16.gmra.mxu0 %vm1351_vm2, %v3389_v35 }
 0x112   :  { %437 = vadd.xlane.f32.xlu1 %v436_v38  ;;  %v596_v24 = vadd.f32 %v595_v3, %v526_v32  ;;  %v3283_v38 = vld [vmem:[#allocation2 + $0x140] sm:$0xf]  ;;  %v3442_v32 = vld [vmem:[#allocation2 + $0x144] sm:$0xf0] }
 0x113   :  { %v330_v19 = vpop.f32.mrf.mxu2  ;;  %v3347_v3 = vld [vmem:[#allocation2 + $0x1c0] sm:$0xf] }
 0x114   :  { %v4017_v23 = vadd.f32 %v330_v19, %v3796_v2  ;;  %v379_v41 = vpop.f32.mrf.mxu3  ;;  %597 = vadd.xlane.f32.xlu0 %v596_v24  ;;  %v3284_v24 = vor.u32 %v3442_v32, %v3283_v38  ;;  %v3458_v19 = vld [vmem:[#allocation2 + $0x1c4] sm:$0xf0] }
 0x115   :  { %v4028_v6 = vadd.f32 %v379_v41, %v3798_v4  ;;  %v3147_v41 = vld [vmem:[#allocation2 + $0x30] sm:$0xf]  ;;  %v3348_v52 = vor.u32 %v3458_v19, %v3347_v3  ;;  %v4052_v3 = vadd.f32 %v3748_v36, %v3778_v58 }
 0x116   :  { %v529_v26 = vmul.f32 %v4017_v23, %v4017_v23  ;;  %v440_v29 = vadd.f32 %v439_v1, %v4017_v23  ;;  %1902 = vmatpush.bf16.msra.mxu0 %v3284_v24  ;;  %v3148_v1 = vor.u32 %v3408_v14, %v3147_v41 }
 0x117   :  { %5785 = vst [vmem:[#allocation16_spill] sm:$0xff] %v4028_v6  ;;  %v530_v34 = vmul.f32 %v4028_v6, %v4028_v6  ;;  %1951 = vmatpush.bf16.msra.mxu1 %v3348_v52  ;;  %v3424_v52 = vld [vmem:[#allocation2 + $0xb4] sm:$0xf0] }
 0x118   :  { %v441_v25 = vadd.f32 %v440_v29, %v4028_v6  ;;  %v600_v20 = vadd.f32 %v599_v42, %v529_v26  ;;  %1805 = vmatpush.bf16.msra.mxu2 %v3148_v1  ;;  %v444_v42 = vadd.f32 %v4025_v22, %v4021_v21  ;;  %5786 = vst [vmem:[#allocation17_spill] sm:$0xff] %v4052_v3  ;;  %v3406_v6 = vld [vmem:[#allocation2 + $0x24] sm:$0xf0] }
 0x11a   :  { %442 = vadd.xlane.f32.xlu1 %v441_v25  ;;  %v601_v38 = vadd.f32 %v600_v20, %v530_v34  ;;  %v604_v20 = vadd.f32 %v532_v28, %v531_v33  ;;  %v3211_v25 = vld [vmem:[#allocation2 + $0xb0] sm:$0xf]  ;;  %v4059_v34 = vadd.f32 %v3750_v37, %v3780_v59  ;;  %v535_v33 = vmul.f32 %v4052_v3, %v4052_v3 }
 0x11b   :  { %v332_v32 = vpop.f32.mrf.mxu2  ;;  %v3212_v35 = vor.u32 %v3424_v52, %v3211_v25  ;;  %v4082_v25 = vadd.f32 %v3757_v44, %v3780_v59  ;;  %v3390_v44 = vld [vmem:[%s5731_s1 + $0x28] sm:$0xff] }
 0x11c   :  { %v4046_v26 = vadd.f32 %v332_v32, %v3796_v2  ;;  %v381_v29 = vpop.f32.mrf.mxu3  ;;  %602 = vadd.xlane.f32.xlu0 %v601_v38  ;;  %5788 = vst [vmem:[#allocation19_spill] sm:$0xff] %v4059_v34  ;;  %v536_v37 = vmul.f32 %v4059_v34, %v4059_v34  ;;  %v449_v32 = vadd.f32 %v4059_v34, %v4052_v3 }
 0x11d   :  { %v4055_v14 = vadd.f32 %v381_v29, %v3798_v4  ;;  %1854 = vmatpush.bf16.msra.mxu3 %v3212_v35  ;;  %5791 = vst [vmem:[#allocation22_spill] sm:$0xff] %v4082_v25 }
 0x11e   :  { %v445_v24 = vadd.f32 %v444_v42, %v4046_v26  ;;  %v533_v19 = vmul.f32 %v4046_v26, %v4046_v26  ;;  %v609_v35 = vadd.f32 %v536_v37, %v535_v33  ;;  %v540_v37 = vmul.f32 %v4082_v25, %v4082_v25 }
 0x11f   :  { %5787 = vst [vmem:[#allocation18_spill] sm:$0xff] %v4055_v14  ;;  %v534_v36 = vmul.f32 %v4055_v14, %v4055_v14 }
 0x120   :  { %v446_v41 = vadd.f32 %v445_v24, %v4055_v14  ;;  %v605_v1 = vadd.f32 %v604_v20, %v533_v19  ;;  %v4078_v20 = vadd.f32 %v3755_v43, %v3778_v58 }
 0x121   :  { %3118 = vmatmul.msk.bf16.gmra.mxu1 %vm1351_vm2, %v3390_v44  ;;  %3110 = vmatmul.msk.bf16.gmra.mxu0 %vm1351_vm2, %v3390_v44 }
 0x122   :  { %447 = vadd.xlane.f32.xlu2 %v446_v41  ;;  %v606_v28 = vadd.f32 %v605_v1, %v534_v36  ;;  %5790 = vst [vmem:[#allocation21_spill] sm:$0xff] %v4078_v20  ;;  %v3275_v41 = vld [vmem:[#allocation2 + $0x130] sm:$0xf]  ;;  %v3440_v36 = vld [vmem:[#allocation2 + $0x134] sm:$0xf0]  ;;  %v539_v33 = vmul.f32 %v4078_v20, %v4078_v20 }
 0x123   :  { %v335_v38 = vpop.f32.mrf.mxu2  ;;  %v3339_v1 = vld [vmem:[#allocation2 + $0x1b0] sm:$0xf] }
 0x124   :  { %v4074_v29 = vadd.f32 %v335_v38, %v3796_v2  ;;  %v384_v42 = vpop.f32.mrf.mxu3  ;;  %607 = vadd.xlane.f32.xlu1 %v606_v28  ;;  %v3276_v28 = vor.u32 %v3440_v36, %v3275_v41  ;;  %v3456_v38 = vld [vmem:[#allocation2 + $0x1b4] sm:$0xf0] }
 0x125   :  { %v4085_v52 = vadd.f32 %v384_v42, %v3798_v4  ;;  %v3139_v42 = vld [vmem:[#allocation2 + $0x20] sm:$0xf]  ;;  %v3340_v14 = vor.u32 %v3456_v38, %v3339_v1  ;;  %v4109_v1 = vadd.f32 %v3761_v47, %v3778_v58 }
 0x126   :  { %5789 = vst [vmem:[#allocation20_spill] sm:$0xff] %v4074_v29  ;;  %v537_v24 = vmul.f32 %v4074_v29, %v4074_v29  ;;  %v450_v19 = vadd.f32 %v449_v32, %v4074_v29  ;;  %1903 = vmatpush.bf16.msra.mxu0 %v3276_v28  ;;  %v3140_v32 = vor.u32 %v3406_v6, %v3139_v42 }
 0x127   :  { %5792 = vst [vmem:[#allocation23_spill] sm:$0xff] %v4085_v52  ;;  %v538_v43 = vmul.f32 %v4085_v52, %v4085_v52  ;;  %1952 = vmatpush.bf16.msra.mxu1 %v3340_v14  ;;  %v3203_v14 = vld [vmem:[#allocation2 + $0xa0] sm:$0xf] }
 0x128   :  { %v451_v34 = vadd.f32 %v450_v19, %v4085_v52  ;;  %v610_v3 = vadd.f32 %v609_v35, %v537_v24  ;;  %1806 = vmatpush.bf16.msra.mxu2 %v3140_v32  ;;  %v454_v35 = vadd.f32 %v4082_v25, %v4078_v20  ;;  %5794 = vst [vmem:[#allocation25_spill] sm:$0xff] %v4109_v1 }
 0x12a   :  { %452 = vadd.xlane.f32.xlu2 %v451_v34  ;;  %v611_v41 = vadd.f32 %v610_v3, %v538_v43  ;;  %v614_v3 = vadd.f32 %v540_v37, %v539_v33  ;;  %v3422_v34 = vld [vmem:[#allocation2 + $0xa4] sm:$0xf0]  ;;  %v4116_v43 = vadd.f32 %v3763_v48, %v3780_v59  ;;  %v543_v33 = vmul.f32 %v4109_v1, %v4109_v1 }
 0x12b   :  { %v337_v36 = vpop.f32.mrf.mxu2  ;;  %v3204_v44 = vor.u32 %v3422_v34, %v3203_v14  ;;  %v4139_v14 = vadd.f32 %v3767_v50, %v3780_v59 }
 0x12c   :  { %v4103_v24 = vadd.f32 %v337_v36, %v3796_v2  ;;  %v386_v19 = vpop.f32.mrf.mxu3  ;;  %612 = vadd.xlane.f32.xlu1 %v611_v41  ;;  %5796 = vst [vmem:[#allocation27_spill] sm:$0xff] %v4116_v43  ;;  %v544_v48 = vmul.f32 %v4116_v43, %v4116_v43  ;;  %v459_v36 = vadd.f32 %v4116_v43, %v4109_v1 }
 0x12d   :  { %v4112_v6 = vadd.f32 %v386_v19, %v3798_v4  ;;  %1855 = vmatpush.bf16.msra.mxu3 %v3204_v44  ;;  %5799 = vst [vmem:[#allocation30_spill] sm:$0xff] %v4139_v14  ;;  %v548_v50 = vmul.f32 %v4139_v14, %v4139_v14 }
 0x12e   :  { %5793 = vst [vmem:[#allocation24_spill] sm:$0xff] %v4103_v24  ;;  %v455_v28 = vadd.f32 %v454_v35, %v4103_v24  ;;  %v541_v38 = vmul.f32 %v4103_v24, %v4103_v24  ;;  %v619_v44 = vadd.f32 %v544_v48, %v543_v33 }
 0x12f   :  { %5795 = vst [vmem:[#allocation26_spill] sm:$0xff] %v4112_v6  ;;  %v542_v47 = vmul.f32 %v4112_v6, %v4112_v6 }
 0x130   :  { %v456_v42 = vadd.f32 %v455_v28, %v4112_v6  ;;  %v615_v32 = vadd.f32 %v614_v3, %v541_v38  ;;  %v4135_v3 = vadd.f32 %v3765_v49, %v3778_v58 }
 0x132   :  { %457 = vadd.xlane.f32.xlu0 %v456_v42  ;;  %v616_v37 = vadd.f32 %v615_v32, %v542_v47  ;;  %5798 = vst [vmem:[#allocation29_spill] sm:$0xff] %v4135_v3  ;;  %v547_v32 = vmul.f32 %v4135_v3, %v4135_v3 }
 0x133   :  { %v340_v41 = vpop.f32.mrf.mxu2 }
 0x134   :  { %v4131_v19 = vadd.f32 %v340_v41, %v3796_v2  ;;  %v389_v35 = vpop.f32.mrf.mxu3  ;;  %617 = vadd.xlane.f32.xlu2 %v616_v37  ;;  %v3391_v37 = vld [vmem:[%s5731_s1 + $0x30] sm:$0xff] }
 0x135   :  { %v4142_v34 = vadd.f32 %v389_v35, %v3798_v4  ;;  %3111 = vmatmul.msk.bf16.gmra.mxu0 %vm1351_vm2, %v3391_v37  ;;  %3119 = vmatmul.msk.bf16.gmra.mxu1 %vm1351_vm2, %v3391_v37  ;;  %v464_v35 = vadd.f32 %v4139_v14, %v4135_v3 }
 0x136   :  { %5797 = vst [vmem:[#allocation28_spill] sm:$0xff] %v4131_v19  ;;  %v545_v28 = vmul.f32 %v4131_v19, %v4131_v19  ;;  %v460_v38 = vadd.f32 %v459_v36, %v4131_v19 }
 0x137   :  { %5800 = vst [vmem:[#allocation31_spill] sm:$0xff] %v4142_v34  ;;  %v546_v42 = vmul.f32 %v4142_v34, %v4142_v34 }
 0x138   :  { %v461_v47 = vadd.f32 %v460_v38, %v4142_v34  ;;  %v620_v49 = vadd.f32 %v619_v44, %v545_v28  ;;  %v624_v38 = vadd.f32 %v548_v50, %v547_v32  ;;  %v4169_v44 = vadd.f32 %v3771_v53, %v3778_v58 }
 0x13a   :  { %462 = vadd.xlane.f32.xlu0 %v461_v47  ;;  %v621_v41 = vadd.f32 %v620_v49, %v546_v42  ;;  %5803 = vst [vmem:[#allocation34_spill] sm:$0xff] %v4169_v44  ;;  %v4173_v42 = vadd.f32 %v3773_v54, %v3780_v59  ;;  %v551_v32 = vmul.f32 %v4169_v44, %v4169_v44 }
 0x13b   :  { %v342_v36 = vpop.f32.mrf.mxu2 }
 0x13c   :  { %v4160_v33 = vadd.f32 %v342_v36, %v3796_v2  ;;  %v391_v48 = vpop.f32.mrf.mxu3  ;;  %622 = vadd.xlane.f32.xlu2 %v621_v41  ;;  %5804 = vst [vmem:[#allocation35_spill] sm:$0xff] %v4173_v42  ;;  %v552_v53 = vmul.f32 %v4173_v42, %v4173_v42 }
 0x13d   :  { %v4165_v28 = vadd.f32 %v391_v48, %v3798_v4  ;;  %v469_v48 = vadd.f32 %v4173_v42, %v4169_v44  ;;  %v3438_v42 = vld [vmem:[#allocation2 + $0x124] sm:$0xf0]  ;;  %v3331_v44 = vld [vmem:[#allocation2 + $0x1a0] sm:$0xf] }
 0x13e   :  { %5801 = vst [vmem:[#allocation32_spill] sm:$0xff] %v4160_v33  ;;  %v465_v47 = vadd.f32 %v464_v35, %v4160_v33  ;;  %v549_v49 = vmul.f32 %v4160_v33, %v4160_v33  ;;  %v629_v34 = vadd.f32 %v552_v53, %v551_v32  ;;  %v3454_v53 = vld [vmem:[#allocation2 + $0x1a4] sm:$0xf0]  ;;  %v3452_v33 = vld [vmem:[#allocation2 + $0x194] sm:$0xf0] }
 0x13f   :  { %5802 = vst [vmem:[#allocation33_spill] sm:$0xff] %v4165_v28  ;;  %v550_v41 = vmul.f32 %v4165_v28, %v4165_v28 }
 0x140   :  { %v466_v37 = vadd.f32 %v465_v47, %v4165_v28  ;;  %v625_v36 = vadd.f32 %v624_v38, %v549_v49 }
 0x142   :  { %467 = vadd.xlane.f32.xlu1 %v466_v37  ;;  %v626_v54 = vadd.f32 %v625_v36, %v550_v41  ;;  %v4198_v37 = vadd.f32 %v3782_v60, %v3778_v58  ;;  %v4202_v41 = vadd.f32 %v3790_v63, %v3780_v59  ;;  %v3392_v58 = vld [vmem:[%s5731_s1 + $0x38] sm:$0xff] }
 0x143   :  { %v345_v50 = vpop.f32.mrf.mxu2 }
 0x144   :  { %v4188_v35 = vadd.f32 %v345_v50, %v3796_v2  ;;  %v394_v47 = vpop.f32.mrf.mxu3  ;;  %627 = vadd.xlane.f32.xlu0 %v626_v54  ;;  %5807 = vst [vmem:[#allocation38_spill] sm:$0xff] %v4198_v37  ;;  %v555_v59 = vmul.f32 %v4198_v37, %v4198_v37  ;;  %v556_v60 = vmul.f32 %v4202_v41, %v4202_v41 }
 0x145   :  { %v4191_v28 = vadd.f32 %v394_v47, %v3798_v4  ;;  %5808 = vst [vmem:[#allocation39_spill] sm:$0xff] %v4202_v41  ;;  %v3267_v47 = vld [vmem:[#allocation2 + $0x120] sm:$0xf]  ;;  %3112 = vmatmul.msk.bf16.gmra.mxu0 %vm1351_vm2, %v3392_v58  ;;  %3120 = vmatmul.msk.bf16.gmra.mxu1 %vm1351_vm2, %v3392_v58 }
 0x146   :  { %5805 = vst [vmem:[#allocation36_spill] sm:$0xff] %v4188_v35  ;;  %v553_v38 = vmul.f32 %v4188_v35, %v4188_v35  ;;  %v470_v49 = vadd.f32 %v469_v48, %v4188_v35  ;;  %v3268_v32 = vor.u32 %v3438_v42, %v3267_v47  ;;  %v474_v42 = vadd.f32 %v4202_v41, %v4198_v37  ;;  %v3420_v35 = vld [vmem:[#allocation2 + $0x94] sm:$0xf0]  ;;  %v3323_v37 = vld [vmem:[#allocation2 + $0x190] sm:$0xf] }
 0x147   :  { %5806 = vst [vmem:[#allocation37_spill] sm:$0xff] %v4191_v28  ;;  %v554_v36 = vmul.f32 %v4191_v28, %v4191_v28  ;;  %v3324_v19 = vor.u32 %v3452_v33, %v3323_v37  ;;  %v3315_v33 = vld [vmem:[#allocation2 + $0x180] sm:$0xf]  ;;  %v3450_v37 = vld [vmem:[#allocation2 + $0x184] sm:$0xf0] }
 0x148   :  { %v471_v54 = vadd.f32 %v470_v49, %v4191_v28  ;;  %v630_v50 = vadd.f32 %v629_v34, %v553_v38  ;;  %v3332_v49 = vor.u32 %v3454_v53, %v3331_v44  ;;  %1904 = vmatpush.bf16.msra.mxu0 %v3268_v32  ;;  %v3195_v28 = vld [vmem:[#allocation2 + $0x90] sm:$0xf] }
 0x14a   :  { %472 = vadd.xlane.f32.xlu1 %v471_v54  ;;  %v631_v48 = vadd.f32 %v630_v50, %v554_v36  ;;  %1953 = vmatpush.bf16.msra.mxu1 %v3332_v49 }
 0x14b   :  { %v347_v63 = vpop.f32.mrf.mxu2 }
 0x14c   :  { %v4215_v34 = vadd.f32 %v347_v63, %v3796_v2  ;;  %v396_v38 = vpop.f32.mrf.mxu3  ;;  %632 = vadd.xlane.f32.xlu0 %v631_v48  ;;  %v634_v48 = vadd.f32 %v556_v60, %v555_v59  ;;  %v3196_v59 = vor.u32 %v3420_v35, %v3195_v28  ;;  %v3436_v60 = vld [vmem:[#allocation2 + $0x114] sm:$0xf0] }
 0x14d   :  { %v4220_v36 = vadd.f32 %v396_v38, %v3798_v4  ;;  %v403_v54 = vpop.xlane.xlu0 %402  ;;  %v3131_v38 = vld [vmem:[#allocation2 + $0x10] sm:$0xf] }
 0x14e   :  { %5809 = vst [vmem:[#allocation40_spill] sm:$0xff] %v4215_v34  ;;  %v4223_v50 = vmul.f32 0.001953125, %v403_v54  ;;  %v475_v44 = vadd.f32 %v474_v42, %v4215_v34  ;;  %v557_v2 = vmul.f32 %v4215_v34, %v4215_v34  ;;  %v3404_v54 = vld [vmem:[#allocation2 + $0x14] sm:$0xf0]  ;;  %v3259_v34 = vld [vmem:[#allocation2 + $0x110] sm:$0xf]  ;;  %1856 = vmatpush.bf16.msra.mxu3 %v3196_v59  ;;  %1954 = vmatpush.bf16.msra.mxu1 %v3324_v19 }
 0x14f   :  { %5810 = vst [vmem:[#allocation41_spill] sm:$0xff] %v4220_v36  ;;  %v563_v47 = vpop.xlane.xlu1 %562  ;;  %v558_v32 = vmul.f32 %v4220_v36, %v4220_v36  ;;  %v3132_v42 = vor.u32 %v3404_v54, %v3131_v38  ;;  %v3316_v19 = vor.u32 %v3450_v37, %v3315_v33 }
 0x150   :  { %v639_v4 = vmul.f32 0.001953125, %v563_v47  ;;  %v655_v53 = vmul.f32 %v4223_v50, %v4223_v50  ;;  %v476_v63 = vadd.f32 %v475_v44, %v4220_v36  ;;  %v635_v49 = vadd.f32 %v634_v48, %v557_v2  ;;  %v3123_v48 = vld [vmem:[#allocation2] sm:$0xf] }
 0x151   :  { %1807 = vmatpush.bf16.msra.mxu2 %v3132_v42  ;;  %v3260_v47 = vor.u32 %v3436_v60, %v3259_v34  ;;  %v3434_v34 = vld [vmem:[#allocation2 + $0x104] sm:$0xf0] }
 0x152   :  { %v671_v41 = vsub.f32 %v639_v4, %v655_v53  ;;  %477 = vadd.xlane.f32.xlu2 %v476_v63  ;;  %v636_v58 = vadd.f32 %v635_v49, %v558_v32  ;;  %v3402_v4 = vld [vmem:[#allocation2 + $0x4] sm:$0xf0]  ;;  %v3187_v32 = vld [vmem:[#allocation2 + $0x80] sm:$0xf]  ;;  %1955 = vmatpush.bf16.msra.mxu1 %v3316_v19 }
 0x153   :  { %1905 = vmatpush.bf16.msra.mxu0 %v3260_v47  ;;  %v3124_v35 = vor.u32 %v3402_v4, %v3123_v48  ;;  %v3418_v53 = vld [vmem:[#allocation2 + $0x84] sm:$0xf0]  ;;  %v3251_v63 = vld [vmem:[#allocation2 + $0x100] sm:$0xf] }
 0x154   :  { %v4234_v14 = vadd.f32 1e-05, %v671_v41  ;;  %637 = vadd.xlane.f32.xlu1 %v636_v58  ;;  %v3188_v38 = vor.u32 %v3418_v53, %v3187_v32  ;;  %v3252_v54 = vor.u32 %v3434_v34, %v3251_v63  ;;  %v2972_v48 = vld [vmem:[%s5733_s3 + $0x1] ss:$4 sm:$0xf]  ;;  %v4257_v34 = vpop.f32.mrf.mxu1 }
 0x155   :  { %v408_v44 = vpop.xlane.xlu0 %407  ;;  %1808 = vmatpush.bf16.msra.mxu2 %v3124_v35  ;;  %v2973_v35 = vld [vmem:[%s5733_s3 + $0x2] ss:$4 sm:$0xf]  ;;  %5812 = vst [vmem:[#allocation43_spill] sm:$0xff] %v4257_v34  ;;  %v4259_v33 = vperm.slane %v2972_v48, 0  ;;  %v4261_v37 = vperm.slane %v2972_v48, 1  ;;  %v688_v34 = vsub.f32 %v3788_v62, %v4223_v50 }
 0x156   :  { %v4236_v2 = vmul.f32 0.001953125, %v408_v44  ;;  %3476 = vrsqrt.f32 %v4234_v14  ;;  %1857 = vmatpush.bf16.msra.mxu3 %v3188_v38  ;;  %v4267_v19 = vperm.slane %v2973_v35, 1  ;;  %vm773_vm4 = vweird.f32 %v4234_v14 }
 0x157   :  { %v568_v28 = vpop.xlane.xlu1 %567  ;;  %1906 = vmatpush.bf16.msra.mxu0 %v3252_v54  ;;  %v4265_v54 = vperm.slane %v2973_v35, 0 }
 0x158   :  { %v640_v41 = vmul.f32 0.001953125, %v568_v28  ;;  %v656_v49 = vmul.f32 %v4236_v2, %v4236_v2  ;;  %v4250_v28 = vpop.f32.mrf.mxu0  ;;  %v692_v62 = vsub.f32 %v3812_v13, %v4236_v2 }
 0x159   :  { %5811 = vst [vmem:[#allocation42_spill] sm:$0xff] %v4250_v28 }
 0x15a   :  { %v672_v42 = vsub.f32 %v640_v41, %v656_v49  ;;  %v4263_v41 = vperm.slane %v2972_v48, 2 }
 0x15c   :  { %v3477_v58 = vpop.eup %3476  ;;  %v4241_v59 = vadd.f32 1e-05, %v672_v42  ;;  %v687_v42 = vsub.f32 %v3785_v61, %v4223_v50  ;;  %v690_v61 = vsub.f32 %v3809_v12, %v4223_v50  ;;  %v694_v12 = vsub.f32 %v3841_v40, %v4236_v2 }
 0x15d   :  { %v413_v60 = vpop.xlane.xlu2 %412  ;;  %v768_v47 = vmul.f32 %v3477_v58, %v4234_v14  ;;  %vm774_vm3 = vweird.f32 %v3477_v58 }
 0x15e   :  { %v4244_v44 = vmul.f32 0.001953125, %v413_v60  ;;  %3478 = vrsqrt.f32 %v4241_v59  ;;  %v4271_v60 = vperm.slane %v2973_v35, 2  ;;  %vm775_vm5 = vmor %vm773_vm4, %vm774_vm3  ;;  %vm783_vm6 = vweird.f32 %v4241_v59 }
 0x15f   :  { %v573_v4 = vpop.xlane.xlu0 %572  ;;  %v769_v32 = vmul.f32 %v3477_v58, %v768_v47  ;;  %v4273_v47 = vperm.slane %v2972_v48, 3  ;;  %v691_v48 = vsub.f32 %v3806_v11, %v4236_v2 }
 0x160   :  { %v657_v53 = vmul.f32 %v4244_v44, %v4244_v44  ;;  %v641_v63 = vmul.f32 0.001953125, %v573_v4  ;;  %v4275_v4 = vperm.slane %v2973_v35, 3  ;;  %v4301_v52 = vpop.f32.mrf.mxu0 }
 0x161   :  { %v770_v49 = vmul.f32 0.5, %v769_v32  ;;  %5813 = vst [vmem:[#allocation44_spill] sm:$0xff] %v4301_v52  ;;  %v3431_v52 = vld [vmem:[#allocation2 + $0xf4] sm:$0xf] }
 0x162   :  { %v673_v38 = vsub.f32 %v641_v63, %v657_v53  ;;  %v689_v63 = vsub.f32 %v3803_v8, %v4223_v50  ;;  %v693_v8 = vsub.f32 %v3836_v31, %v4236_v2  ;;  %v4305_v2 = vpop.f32.mrf.mxu1 }
 0x163   :  { %v771_v28 = vsub.f32 1.5, %v770_v49  ;;  %5814 = vst [vmem:[#allocation45_spill] sm:$0xff] %v4305_v2  ;;  %v3181_v2 = vld [vmem:[#allocation2 + $0x78] sm:$0xf0] }
 0x164   :  { %v4279_v32 = vadd.f32 1e-05, %v673_v38  ;;  %v3479_v53 = vpop.eup %3478 }
 0x165   :  { %v418_v35 = vpop.xlane.xlu2 %417  ;;  %v772_v36 = vmul.f32 %v3477_v58, %v771_v28  ;;  %v778_v49 = vmul.f32 %v3479_v53, %v4241_v59  ;;  %vm784_vm7 = vweird.f32 %v3479_v53 }
 0x166   :  { %3480 = vrsqrt.f32 %v4279_v32  ;;  %v4297_v14 = vmul.f32 0.001953125, %v418_v35  ;;  %vm793_vm8 = vweird.f32 %v4279_v32  ;;  %vm785_vm9 = vmor %vm783_vm6, %vm784_vm7 }
 0x167   :  { %v578_v11 = vpop.xlane.xlu1 %577  ;;  %v776_v50 = vsel %vm775_vm5, %v3477_v58, %v772_v36  ;;  %v779_v28 = vmul.f32 %v3479_v53, %v778_v49 }
 0x168   :  { %v642_v38 = vmul.f32 0.001953125, %v578_v11  ;;  %v927_v43 = vmul.f32 %v776_v50, %v687_v42  ;;  %v928_v3 = vmul.f32 %v776_v50, %v688_v34  ;;  %v929_v1 = vmul.f32 %v776_v50, %v689_v63 }
 0x169   :  { %v930_v6 = vmul.f32 %v776_v50, %v690_v61  ;;  %v780_v31 = vmul.f32 0.5, %v779_v28  ;;  %v658_v40 = vmul.f32 %v4297_v14, %v4297_v14 }
 0x16a   :  { %v1000_v35 = vmul.f32 %v4259_v33, %v927_v43  ;;  %v1001_v34 = vmul.f32 %v4261_v37, %v928_v3  ;;  %v1002_v42 = vmul.f32 %v4263_v41, %v929_v1 }
 0x16b   :  { %v781_v49 = vsub.f32 1.5, %v780_v31  ;;  %v674_v11 = vsub.f32 %v642_v38, %v658_v40  ;;  %v1003_v1 = vmul.f32 %v4273_v47, %v930_v6 }
 0x16c   :  { %v4316_v61 = vpop.eup %3480  ;;  %v4323_v43 = vadd.f32 %v4265_v54, %v1000_v35  ;;  %v4334_v40 = vadd.f32 %v4267_v19, %v1001_v34  ;;  %v4341_v3 = vadd.f32 %v4271_v60, %v1002_v42  ;;  %v3415_v34 = vld [vmem:[#allocation2 + $0x74] sm:$0xf]  ;;  %v3245_v42 = vld [vmem:[#allocation2 + $0xf8] sm:$0xf0] }
 0x16d   :  { %v788_v28 = vmul.f32 %v4316_v61, %v4279_v32  ;;  %v423_v58 = vpop.xlane.xlu2 %422  ;;  %v782_v63 = vmul.f32 %v3479_v53, %v781_v49  ;;  %v4329_v31 = vadd.f32 1e-05, %v674_v11  ;;  %vm794_vm10 = vweird.f32 %v4316_v61  ;;  %v3373_v32 = vld [vmem:[#allocation2 + $0x1f8] sm:$0xf0] }
 0x16e   :  { %v4331_v38 = vmul.f32 0.001953125, %v423_v58  ;;  %v1137_v59 = vmax.f32 %v4323_v43, 0.0  ;;  %v1138_v49 = vmax.f32 %v4334_v40, 0.0  ;;  %v3248_v20 = vor.u32 %v3431_v52, %v3245_v42  ;;  %vm795_vm11 = vmor %vm793_vm8, %vm794_vm10 }
 0x16f   :  { %v789_v35 = vmul.f32 %v4316_v61, %v788_v28  ;;  %v583_v6 = vpop.xlane.xlu1 %582  ;;  %v786_v11 = vsel %vm785_vm9, %v3479_v53, %v782_v63  ;;  %3482 = vrsqrt.f32 %v4329_v31  ;;  %v1076_v53 = vadd.f32 %v4275_v4, %v1003_v1 }
 0x170   :  { %v659_v58 = vmul.f32 %v4331_v38, %v4331_v38  ;;  %v931_v50 = vmul.f32 %v786_v11, %v691_v48  ;;  %v932_v28 = vmul.f32 %v786_v11, %v692_v62  ;;  %v933_v36 = vmul.f32 %v786_v11, %v693_v8  ;;  %v4355_v62 = vpop.f32.mrf.mxu0  ;;  %2046 = vmatpush.bf16.msrb.mxu3 %v3248_v20 }
 0x171   :  { %v934_v13 = vmul.f32 %v786_v11, %v694_v12  ;;  %v790_v24 = vmul.f32 0.5, %v789_v35  ;;  %v643_v29 = vmul.f32 0.001953125, %v583_v6  ;;  %5815 = vst [vmem:[#allocation46_spill] sm:$0xff] %v4355_v62  ;;  %v3184_v11 = vor.u32 %v3415_v34, %v3181_v2  ;;  %v4357_v35 = vpop.f32.mrf.mxu1  ;;  %v3309_v34 = vld [vmem:[#allocation2 + $0x178] sm:$0xf0] }
 0x172   :  { %v1004_v63 = vmul.f32 %v4259_v33, %v931_v50  ;;  %v1005_v25 = vmul.f32 %v4261_v37, %v932_v28  ;;  %v1006_v43 = vmul.f32 %v4263_v41, %v933_v36  ;;  %5816 = vst [vmem:[#allocation47_spill] sm:$0xff] %v4357_v35  ;;  %v1139_v28 = vmax.f32 %v4341_v3, 0.0 }
 0x173   :  { %v1007_v48 = vmul.f32 %v4273_v47, %v934_v13  ;;  %v791_v8 = vsub.f32 1.5, %v790_v24  ;;  %v675_v12 = vsub.f32 %v643_v29, %v659_v58  ;;  %1997 = vmatpush.bf16.msrb.mxu2 %v3184_v11  ;;  %v3447_v58 = vld [vmem:[#allocation2 + $0x174] sm:$0xf]  ;;  %vm803_vm13 = vweird.f32 %v4329_v31 }
 0x174   :  { %v1077_v40 = vadd.f32 %v4265_v54, %v1004_v63  ;;  %v1078_v1 = vadd.f32 %v4267_v19, %v1005_v25  ;;  %v1079_v50 = vadd.f32 %v4271_v60, %v1006_v43  ;;  %v1140_v43 = vmax.f32 %v1076_v53, 0.0 }
 0x175   :  { %v428_v6 = vpop.xlane.xlu0 %427  ;;  %v4363_v36 = vpop.eup %3482  ;;  %v792_v13 = vmul.f32 %v4316_v61, %v791_v8  ;;  %v4366_v62 = vadd.f32 1e-05, %v675_v12  ;;  %v1080_v52 = vadd.f32 %v4275_v4, %v1007_v48  ;;  %v3463_v48 = vld [vmem:[#allocation2 + $0x1f4] sm:$0xf]  ;;  %v3312_v42 = vor.u32 %v3447_v58, %v3309_v34 }
 0x176   :  { %v4368_v29 = vmul.f32 0.001953125, %v428_v6  ;;  %v798_v25 = vmul.f32 %v4363_v36, %v4329_v31  ;;  %v1141_v2 = vmax.f32 %v1077_v40, 0.0  ;;  %v1142_v3 = vmax.f32 %v1078_v1, 0.0 }
 0x177   :  { %v588_v24 = vpop.xlane.xlu2 %587  ;;  %v796_v63 = vsel %vm795_vm11, %v4316_v61, %v792_v13  ;;  %3484 = vrsqrt.f32 %v4366_v62  ;;  %v1143_v40 = vmax.f32 %v1079_v50, 0.0  ;;  %v1144_v1 = vmax.f32 %v1080_v52, 0.0  ;;  %2095 = vmatpush.bf16.msrb.mxu0 %v3312_v42 }
 0x178   :  { %v644_v20 = vmul.f32 0.001953125, %v588_v24  ;;  %v799_v8 = vmul.f32 %v4363_v36, %v798_v25  ;;  %v660_v12 = vmul.f32 %v4368_v29, %v4368_v29  ;;  %v4384_v11 = vpack.c.bf16 %v1141_v2, %v1137_v59 }
 0x179   :  { %v4386_v6 = vpack.c.bf16 %v1142_v3, %v1138_v49  ;;  %v3376_v35 = vor.u32 %v3463_v48, %v3373_v32  ;;  %v5817_v53 = vsub.f32 %v3830_v27, %v4244_v44  ;;  %v5818_v59 = vsub.f32 %v3833_v30, %v4244_v44  ;;  %v4416_v42 = vpop.f32.mrf.mxu1 }
 0x17a   :  { %v800_v61 = vmul.f32 0.5, %v799_v8  ;;  %v676_v13 = vsub.f32 %v644_v20, %v660_v12  ;;  %1809 = vmatmul.bf16.vlgmr.msra.gmra.mxu2 %v4384_v11  ;;  %vm804_vm12 = vweird.f32 %v4363_v36  ;;  %v4397_v49 = vpack.c.bf16 %v1143_v40, %v1139_v28  ;;  %v4408_v20 = vpop.f32.mrf.mxu0  ;;  %5820 = vst [vmem:[#allocation48_spill] sm:$0xff] %v4416_v42 }
 0x17b   :  { %1858 = vmatmul.bf16.vlgmr.msra.gmra.mxu3 %v4386_v6  ;;  %v935_v25 = vmul.f32 %v796_v63, %v5817_v53  ;;  %v936_v24 = vmul.f32 %v796_v63, %v5818_v59  ;;  %v4399_v50 = vpack.c.bf16 %v1144_v1, %v1140_v43  ;;  %2144 = vmatpush.bf16.msrb.mxu1 %v3376_v35  ;;  %vm813_vm14 = vweird.f32 %v4366_v62  ;;  %vm805_vm15 = vmor %vm803_vm13, %vm804_vm12 }
 0x17c   :  { %v5819_v52 = vsub.f32 %v3856_v7, %v4244_v44  ;;  %v801_v3 = vsub.f32 1.5, %v800_v61  ;;  %v4404_v58 = vadd.f32 1e-05, %v676_v13  ;;  %1907 = vmatmul.bf16.vlgmr.msra.gmra.mxu0 %v4397_v49  ;;  %v5821_v1 = vsub.f32 %v3859_v15, %v4244_v44  ;;  %v3173_v15 = vld [vmem:[#allocation2 + $0x68] sm:$0xf0] }
 0x17d   :  { %v433_v27 = vpop.xlane.xlu0 %432  ;;  %v1008_v34 = vmul.f32 %v4259_v33, %v935_v25  ;;  %v1009_v30 = vmul.f32 %v4261_v37, %v936_v24  ;;  %v3485_v28 = vpop.eup %3484  ;;  %1956 = vmatmul.bf16.vlgmr.msra.gmra.mxu1 %v4399_v50 }
 0x17e   :  { %v937_v2 = vmul.f32 %v796_v63, %v5819_v52  ;;  %v4413_v35 = vmul.f32 0.001953125, %v433_v27  ;;  %v802_v48 = vmul.f32 %v4363_v36, %v801_v3  ;;  %v808_v32 = vmul.f32 %v3485_v28, %v4366_v62 }
 0x17f   :  { %3486 = vrsqrt.f32 %v4404_v58  ;;  %v593_v31 = vpop.xlane.xlu2 %592  ;;  %v1081_v40 = vadd.f32 %v4265_v54, %v1008_v34  ;;  %v938_v61 = vmul.f32 %v796_v63, %v5821_v1  ;;  %v1082_v25 = vadd.f32 %v4267_v19, %v1009_v30  ;;  %v3413_v34 = vld [vmem:[#allocation2 + $0x64] sm:$0xf] }
 0x180   :  { %v1010_v7 = vmul.f32 %v4263_v41, %v937_v2  ;;  %v645_v8 = vmul.f32 0.001953125, %v593_v31  ;;  %v661_v12 = vmul.f32 %v4413_v35, %v4413_v35  ;;  %v806_v13 = vsel %vm805_vm15, %v4363_v36, %v802_v48 }
 0x181   :  { %v809_v53 = vmul.f32 %v3485_v28, %v808_v32  ;;  %vm814_vm0 = vweird.f32 %v3485_v28  ;;  %v5822_v52 = vsub.f32 %v3862_v17, %v4297_v14  ;;  %v5823_v3 = vsub.f32 %v3865_v18, %v4297_v14 }
 0x182   :  { %v1083_v59 = vadd.f32 %v4271_v60, %v1010_v7  ;;  %v677_v24 = vsub.f32 %v645_v8, %v661_v12  ;;  %v1145_v63 = vmax.f32 %v1081_v40, 0.0  ;;  %v1146_v36 = vmax.f32 %v1082_v25, 0.0  ;;  %vm815_vm2 = vmor %vm813_vm14, %vm814_vm0 }
 0x183   :  { %v939_v2 = vmul.f32 %v806_v13, %v5822_v52  ;;  %v940_v27 = vmul.f32 %v806_v13, %v5823_v3  ;;  %v810_v44 = vmul.f32 0.5, %v809_v53  ;;  %v5824_v30 = vsub.f32 %v3889_v0, %v4297_v14  ;;  %v4459_v52 = vpop.f32.mrf.mxu0 }
 0x184   :  { %v4444_v7 = vadd.f32 1e-05, %v677_v24  ;;  %v5825_v31 = vsub.f32 %v3894_v5, %v4297_v14  ;;  %v1147_v53 = vmax.f32 %v1083_v59, 0.0  ;;  %v3176_v25 = vor.u32 %v3413_v34, %v3173_v15  ;;  %5826 = vst [vmem:[#allocation49_spill] sm:$0xff] %v4459_v52  ;;  %v4461_v5 = vpop.f32.mrf.mxu1 }
 0x185   :  { %v941_v48 = vmul.f32 %v806_v13, %v5824_v30  ;;  %v1012_v32 = vmul.f32 %v4259_v33, %v939_v2  ;;  %v1013_v17 = vmul.f32 %v4261_v37, %v940_v27  ;;  %v4451_v8 = vpop.eup %3486  ;;  %v811_v12 = vsub.f32 1.5, %v810_v44  ;;  %v438_v1 = vpop.xlane.xlu1 %437  ;;  %5827 = vst [vmem:[#allocation50_spill] sm:$0xff] %v4461_v5  ;;  %v3429_v44 = vld [vmem:[#allocation2 + $0xe4] sm:$0xf]  ;;  %v3237_v30 = vld [vmem:[#allocation2 + $0xe8] sm:$0xf0] }
 0x186   :  { %v942_v18 = vmul.f32 %v806_v13, %v5825_v31  ;;  %v818_v0 = vmul.f32 %v4451_v8, %v4404_v58  ;;  %vm824_vm1 = vweird.f32 %v4451_v8  ;;  %3488 = vrsqrt.f32 %v4444_v7  ;;  %1998 = vmatpush.bf16.msrb.mxu2 %v3176_v25  ;;  %v3365_v5 = vld [vmem:[#allocation2 + $0x1e8] sm:$0xf0] }
 0x187   :  { %v1014_v40 = vmul.f32 %v4263_v41, %v941_v48  ;;  %v1011_v24 = vmul.f32 %v4273_v47, %v938_v61  ;;  %v812_v14 = vmul.f32 %v3485_v28, %v811_v12  ;;  %v4463_v13 = vmul.f32 0.001953125, %v438_v1  ;;  %v598_v2 = vpop.xlane.xlu0 %597 }
 0x188   :  { %v1085_v59 = vadd.f32 %v4265_v54, %v1012_v32  ;;  %v1086_v3 = vadd.f32 %v4267_v19, %v1013_v17  ;;  %v819_v27 = vmul.f32 %v4451_v8, %v818_v0  ;;  %v646_v61 = vmul.f32 0.001953125, %v598_v2  ;;  %v3445_v0 = vld [vmem:[#allocation2 + $0x164] sm:$0xf]  ;;  %v3301_v2 = vld [vmem:[#allocation2 + $0x168] sm:$0xf0] }
 0x189   :  { %v1087_v34 = vadd.f32 %v4271_v60, %v1014_v40  ;;  %v1015_v15 = vmul.f32 %v4273_v47, %v942_v18  ;;  %v4473_v48 = vsel %vm815_vm2, %v3485_v28, %v812_v14  ;;  %v662_v32 = vmul.f32 %v4463_v13, %v4463_v13  ;;  %v3461_v14 = vld [vmem:[#allocation2 + $0x1e4] sm:$0xf] }
 0x18a   :  { %v1149_v17 = vmax.f32 %v1085_v59, 0.0  ;;  %v1150_v31 = vmax.f32 %v1086_v3, 0.0  ;;  %v820_v12 = vmul.f32 0.5, %v819_v27  ;;  %v1084_v62 = vadd.f32 %v4275_v4, %v1011_v24 }
 0x18b   :  { %v1151_v1 = vmax.f32 %v1087_v34, 0.0  ;;  %v1088_v25 = vadd.f32 %v4275_v4, %v1015_v15  ;;  %v678_v40 = vsub.f32 %v646_v61, %v662_v32  ;;  %v3240_v28 = vor.u32 %v3429_v44, %v3237_v30 }
 0x18c   :  { %v4479_v43 = vpack.c.bf16 %v1149_v17, %v1145_v63  ;;  %v4481_v18 = vpack.c.bf16 %v1150_v31, %v1146_v36  ;;  %v4483_v42 = vpop.eup %3488  ;;  %v821_v59 = vsub.f32 1.5, %v820_v12  ;;  %v1148_v27 = vmax.f32 %v1084_v62, 0.0 }
 0x18d   :  { %v4485_v3 = vpack.c.bf16 %v1151_v1, %v1147_v53  ;;  %v1152_v34 = vmax.f32 %v1088_v25, 0.0  ;;  %vm823_vm3 = vweird.f32 %v4404_v58  ;;  %v828_v24 = vmul.f32 %v4483_v42, %v4444_v7  ;;  %v443_v63 = vpop.xlane.xlu1 %442  ;;  %2047 = vmatpush.bf16.msrb.mxu3 %v3240_v28 }
 0x18e   :  { %v4490_v61 = vadd.f32 1e-05, %v678_v40  ;;  %1814 = vmatmul.bf16.gmra.mxu2 %v4479_v43  ;;  %1863 = vmatmul.bf16.gmra.mxu3 %v4481_v18  ;;  %v3304_v36 = vor.u32 %v3445_v0, %v3301_v2  ;;  %v822_v15 = vmul.f32 %v4451_v8, %v821_v59  ;;  %v4498_v44 = vmul.f32 0.001953125, %v443_v63  ;;  %vm825_vm4 = vmor %vm823_vm3, %vm824_vm1  ;;  %v4518_v0 = vpop.f32.mrf.mxu0 }
 0x18f   :  { %1912 = vmatmul.bf16.gmra.mxu0 %v4485_v3  ;;  %v4496_v53 = vpack.c.bf16 %v1152_v34, %v1148_v27  ;;  %v3368_v58 = vor.u32 %v3461_v14, %v3365_v5  ;;  %v829_v30 = vmul.f32 %v4483_v42, %v828_v24  ;;  %v603_v32 = vpop.xlane.xlu0 %602  ;;  %v707_v17 = vsub.f32 %v3915_v46, %v4368_v29  ;;  %v4520_v46 = vpop.f32.mrf.mxu1 }
 0x190   :  { %3490 = vrsqrt.f32 %v4490_v61  ;;  %2096 = vmatpush.bf16.msrb.mxu0 %v3304_v36  ;;  %v5828_v31 = vsub.f32 %v3882_v55, %v4331_v38  ;;  %v4511_v1 = vsel %vm825_vm4, %v4451_v8, %v822_v15  ;;  %v663_v5 = vmul.f32 %v4498_v44, %v4498_v44  ;;  %5829 = vst [vmem:[#allocation51_spill] sm:$0xff] %v4518_v0  ;;  %v3457_v0 = vld [vmem:[#allocation2 + $0x1c4] sm:$0xf] }
 0x191   :  { %1961 = vmatmul.bf16.gmra.mxu1 %v4496_v53  ;;  %v647_v62 = vmul.f32 0.001953125, %v603_v32  ;;  %v704_v25 = vsub.f32 %v3886_v57, %v4331_v38  ;;  %5830 = vst [vmem:[#allocation52_spill] sm:$0xff] %v4520_v46  ;;  %v830_v2 = vmul.f32 0.5, %v829_v30  ;;  %v947_v55 = vmul.f32 %v4511_v1, %v707_v17 }
 0x192   :  { %v943_v12 = vmul.f32 %v4473_v48, %v5828_v31  ;;  %2145 = vmatpush.bf16.msrb.mxu1 %v3368_v58  ;;  %v708_v40 = vsub.f32 %v3918_v51, %v4368_v29  ;;  %v705_v59 = vsub.f32 %v3909_v39, %v4331_v38  ;;  %v709_v57 = vsub.f32 %v3942_v56, %v4368_v29 }
 0x193   :  { %v679_v28 = vsub.f32 %v647_v62, %v663_v5  ;;  %v944_v14 = vmul.f32 %v4473_v48, %v704_v25  ;;  %v831_v27 = vsub.f32 1.5, %v830_v2  ;;  %v1020_v34 = vmul.f32 %v4259_v33, %v947_v55 }
 0x194   :  { %v1016_v8 = vmul.f32 %v4259_v33, %v943_v12  ;;  %v948_v63 = vmul.f32 %v4511_v1, %v708_v40  ;;  %v945_v15 = vmul.f32 %v4473_v48, %v705_v59  ;;  %v949_v32 = vmul.f32 %v4511_v1, %v709_v57  ;;  %v3165_v59 = vld [vmem:[#allocation2 + $0x58] sm:$0xf0] }
 0x195   :  { %v4534_v36 = vadd.f32 1e-05, %v679_v28  ;;  %v1017_v51 = vmul.f32 %v4261_v37, %v944_v14  ;;  %v448_v30 = vpop.xlane.xlu2 %447  ;;  %v1093_v39 = vadd.f32 %v4265_v54, %v1020_v34  ;;  %v832_v17 = vmul.f32 %v4483_v42, %v831_v27  ;;  %v3411_v14 = vld [vmem:[#allocation2 + $0x54] sm:$0xf] }
 0x196   :  { %v1089_v24 = vadd.f32 %v4265_v54, %v1016_v8  ;;  %v4538_v58 = vpop.eup %3490  ;;  %v1021_v56 = vmul.f32 %v4261_v37, %v948_v63  ;;  %vm833_vm5 = vweird.f32 %v4444_v7  ;;  %vm834_vm6 = vweird.f32 %v4483_v42  ;;  %v4555_v57 = vpop.f32.mrf.mxu0 }
 0x197   :  { %v838_v31 = vmul.f32 %v4538_v58, %v4490_v61  ;;  %3492 = vrsqrt.f32 %v4534_v36  ;;  %v4549_v12 = vmul.f32 0.001953125, %v448_v30  ;;  %v608_v5 = vpop.xlane.xlu1 %607  ;;  %v1157_v25 = vmax.f32 %v1093_v39, 0.0  ;;  %5831 = vst [vmem:[#allocation53_spill] sm:$0xff] %v4555_v57  ;;  %vm835_vm8 = vmor %vm833_vm5, %vm834_vm6 }
 0x198   :  { %v1153_v62 = vmax.f32 %v1089_v24, 0.0  ;;  %v1090_v2 = vadd.f32 %v4267_v19, %v1017_v51  ;;  %v648_v8 = vmul.f32 0.001953125, %v608_v5  ;;  %v1094_v40 = vadd.f32 %v4267_v19, %v1021_v56  ;;  %v4562_v51 = vpop.f32.mrf.mxu1 }
 0x199   :  { %v839_v55 = vmul.f32 %v4538_v58, %v838_v31  ;;  %v1018_v28 = vmul.f32 %v4263_v41, %v945_v15  ;;  %v664_v27 = vmul.f32 %v4549_v12, %v4549_v12  ;;  %v1022_v63 = vmul.f32 %v4263_v41, %v949_v32  ;;  %5833 = vst [vmem:[#allocation55_spill] sm:$0xff] %v4562_v51  ;;  %v5835_v32 = vld [vmem:[#allocation10_spill] sm:$0xff]  ;;  %v3425_v51 = vld [vmem:[#allocation2 + $0xc4] sm:$0xf] }
 0x19a   :  { %v4559_v34 = vpack.c.bf16 %v1157_v25, %v1153_v62  ;;  %v1154_v24 = vmax.f32 %v1090_v2, 0.0  ;;  %v1158_v39 = vmax.f32 %v1094_v40, 0.0  ;;  %v706_v15 = vsub.f32 %v3912_v45, %v4331_v38 }
 0x19b   :  { %v840_v30 = vmul.f32 0.5, %v839_v55  ;;  %v1091_v56 = vadd.f32 %v4271_v60, %v1018_v28  ;;  %vm844_vm7 = vweird.f32 %v4538_v58  ;;  %v680_v31 = vsub.f32 %v648_v8, %v664_v27  ;;  %v3427_v28 = vld [vmem:[#allocation2 + $0xd4] sm:$0xf] }
 0x19c   :  { %5832 = vst [vmem:[#allocation54_spill] sm:$0xff] %v4559_v34  ;;  %v1095_v5 = vadd.f32 %v4271_v60, %v1022_v63  ;;  %v3168_v46 = vor.u32 %v3411_v14, %v3165_v59  ;;  %v4571_v2 = vpack.c.bf16 %v1158_v39, %v1154_v24  ;;  %v710_v55 = vsub.f32 %v5835_v32, %v4368_v29  ;;  %v3229_v59 = vld [vmem:[#allocation2 + $0xd8] sm:$0xf0] }
 0x19d   :  { %v4569_v62 = vpop.eup %3492  ;;  %v841_v25 = vsub.f32 1.5, %v840_v30  ;;  %v946_v40 = vmul.f32 %v4473_v48, %v706_v15  ;;  %v4578_v38 = vadd.f32 1e-05, %v680_v31  ;;  %v1155_v8 = vmax.f32 %v1091_v56, 0.0  ;;  %v453_v27 = vpop.xlane.xlu2 %452  ;;  %v3443_v30 = vld [vmem:[#allocation2 + $0x154] sm:$0xf] }
 0x19e   :  { %5834 = vst [vmem:[#allocation56_spill] sm:$0xff] %v4571_v2  ;;  %v848_v45 = vmul.f32 %v4569_v62, %v4534_v36  ;;  %1819 = vmatmul.bf16.gmra.mxu2 %v4559_v34  ;;  %v1159_v14 = vmax.f32 %v1095_v5, 0.0  ;;  %1868 = vmatmul.bf16.gmra.mxu3 %v4571_v2  ;;  %v950_v29 = vmul.f32 %v4511_v1, %v710_v55  ;;  %v4585_v63 = vmul.f32 0.001953125, %v453_v27  ;;  %v3293_v39 = vld [vmem:[#allocation2 + $0x158] sm:$0xf0] }
 0x19f   :  { %v842_v24 = vmul.f32 %v4538_v58, %v841_v25  ;;  %v1019_v48 = vmul.f32 %v4273_v47, %v946_v40  ;;  %1999 = vmatpush.bf16.msrb.mxu2 %v3168_v46  ;;  %vm843_vm9 = vweird.f32 %v4490_v61  ;;  %3494 = vrsqrt.f32 %v4578_v38  ;;  %v613_v1 = vpop.xlane.xlu1 %612  ;;  %v3459_v31 = vld [vmem:[#allocation2 + $0x1d4] sm:$0xf]  ;;  %v3357_v46 = vld [vmem:[#allocation2 + $0x1d8] sm:$0xf0] }
 0x1a0   :  { %v849_v56 = vmul.f32 %v4569_v62, %v848_v45  ;;  %v4594_v15 = vpack.c.bf16 %v1159_v14, %v1155_v8  ;;  %v4597_v5 = vsel %vm835_vm8, %v4483_v42, %v832_v17  ;;  %vm845_vm10 = vmor %vm843_vm9, %vm844_vm7  ;;  %v1023_v7 = vmul.f32 %v4273_v47, %v950_v29  ;;  %v5837_v14 = vld [vmem:[#allocation8_spill] sm:$0xff]  ;;  %v4612_v29 = vpop.f32.mrf.mxu0 }
 0x1a1   :  { %v1092_v25 = vadd.f32 %v4275_v4, %v1019_v48  ;;  %v3232_v61 = vor.u32 %v3427_v28, %v3229_v59  ;;  %v4604_v32 = vsel %vm845_vm10, %v4538_v58, %v842_v24  ;;  %v665_v55 = vmul.f32 %v4585_v63, %v4585_v63  ;;  %5838 = vst [vmem:[#allocation8_spill] sm:$0xff] %v4612_v29  ;;  %v5839_v59 = vld [vmem:[#allocation9_spill] sm:$0xff]  ;;  %v4618_v48 = vpop.f32.mrf.mxu1 }
 0x1a2   :  { %5836 = vst [vmem:[#allocation10_spill] sm:$0xff] %v4594_v15  ;;  %1917 = vmatmul.bf16.gmra.mxu0 %v4594_v15  ;;  %v649_v40 = vmul.f32 0.001953125, %v613_v1  ;;  %v3296_v45 = vor.u32 %v3443_v30, %v3293_v39  ;;  %v850_v42 = vmul.f32 0.5, %v849_v56  ;;  %v1096_v17 = vadd.f32 %v4275_v4, %v1023_v7 }
 0x1a3   :  { %2048 = vmatpush.bf16.msrb.mxu3 %v3232_v61  ;;  %v3360_v8 = vor.u32 %v3459_v31, %v3357_v46  ;;  %v711_v27 = vsub.f32 %v5837_v14, %v4413_v35  ;;  %v715_v58 = vsub.f32 %v3968_v16, %v4463_v13  ;;  %v712_v24 = vsub.f32 %v5839_v59, %v4413_v35  ;;  %v5842_v14 = vld [vmem:[#allocation11_spill] sm:$0xff] }
 0x1a4   :  { %v681_v28 = vsub.f32 %v649_v40, %v665_v55  ;;  %2097 = vmatpush.bf16.msrb.mxu0 %v3296_v45  ;;  %5840 = vst [vmem:[#allocation9_spill] sm:$0xff] %v4618_v48  ;;  %v1156_v30 = vmax.f32 %v1092_v25, 0.0  ;;  %v1160_v39 = vmax.f32 %v1096_v17, 0.0  ;;  %v851_v16 = vsub.f32 1.5, %v850_v42 }
 0x1a5   :  { %2146 = vmatpush.bf16.msrb.mxu1 %v3360_v8  ;;  %v951_v56 = vmul.f32 %v4597_v5, %v711_v27  ;;  %v4621_v1 = vpop.eup %3494  ;;  %v458_v46 = vpop.xlane.xlu0 %457  ;;  %v955_v7 = vmul.f32 %v4604_v32, %v715_v58  ;;  %v952_v61 = vmul.f32 %v4597_v5, %v712_v24  ;;  %v716_v8 = vsub.f32 %v3971_v10, %v4463_v13 }
 0x1a6   :  { %v4623_v31 = vadd.f32 1e-05, %v681_v28  ;;  %v858_v55 = vmul.f32 %v4621_v1, %v4578_v38  ;;  %v4629_v40 = vpack.c.bf16 %v1160_v39, %v1156_v30  ;;  %v4631_v25 = vmul.f32 0.001953125, %v458_v46 }
 0x1a7   :  { %v618_v45 = vpop.xlane.xlu2 %617  ;;  %v1024_v17 = vmul.f32 %v4259_v33, %v951_v56  ;;  %v713_v27 = vsub.f32 %v5842_v14, %v4413_v35  ;;  %v1028_v59 = vmul.f32 %v4259_v33, %v955_v7  ;;  %v956_v30 = vmul.f32 %v4604_v32, %v716_v8 }
 0x1a8   :  { %5841 = vst [vmem:[#allocation57_spill] sm:$0xff] %v4629_v40  ;;  %3496 = vrsqrt.f32 %v4623_v31  ;;  %v859_v42 = vmul.f32 %v4621_v1, %v858_v55  ;;  %1966 = vmatmul.bf16.gmra.mxu1 %v4629_v40  ;;  %v650_v28 = vmul.f32 0.001953125, %v618_v45  ;;  %v666_v58 = vmul.f32 %v4631_v25, %v4631_v25 }
 0x1a9   :  { %v1097_v24 = vadd.f32 %v4265_v54, %v1024_v17  ;;  %v1025_v39 = vmul.f32 %v4261_v37, %v952_v61  ;;  %v717_v10 = vsub.f32 %v3989_v9, %v4463_v13  ;;  %v1101_v55 = vadd.f32 %v4265_v54, %v1028_v59 }
 0x1aa   :  { %v860_v56 = vmul.f32 0.5, %v859_v42  ;;  %v682_v46 = vsub.f32 %v650_v28, %v666_v58  ;;  %v953_v45 = vmul.f32 %v4597_v5, %v713_v27  ;;  %vm853_vm11 = vweird.f32 %v4534_v36  ;;  %v4659_v28 = vpop.f32.mrf.mxu0 }
 0x1ab   :  { %vm854_vm12 = vweird.f32 %v4569_v62  ;;  %v1029_v7 = vmul.f32 %v4261_v37, %v956_v30  ;;  %v1098_v17 = vadd.f32 %v4267_v19, %v1025_v39  ;;  %v957_v8 = vmul.f32 %v4604_v32, %v717_v10  ;;  %5843 = vst [vmem:[#allocation11_spill] sm:$0xff] %v4659_v28  ;;  %v4666_v39 = vpop.f32.mrf.mxu1 }
 0x1ac   :  { %v861_v61 = vsub.f32 1.5, %v860_v56  ;;  %v4656_v14 = vadd.f32 1e-05, %v682_v46  ;;  %v1165_v9 = vmax.f32 %v1101_v55, 0.0  ;;  %v1026_v42 = vmul.f32 %v4263_v41, %v953_v45  ;;  %5844 = vst [vmem:[#allocation58_spill] sm:$0xff] %v4666_v39  ;;  %vm855_vm14 = vmor %vm853_vm11, %vm854_vm12 }
 0x1ad   :  { %v852_v27 = vmul.f32 %v4569_v62, %v851_v16  ;;  %v1161_v59 = vmax.f32 %v1097_v24, 0.0  ;;  %v1102_v48 = vadd.f32 %v4267_v19, %v1029_v7  ;;  %v1030_v30 = vmul.f32 %v4263_v41, %v957_v8  ;;  %v3409_v46 = vld [vmem:[#allocation2 + $0x44] sm:$0xf]  ;;  %v3157_v55 = vld [vmem:[#allocation2 + $0x48] sm:$0xf0]  ;;  %v463_v28 = vpop.xlane.xlu0 %462 }
 0x1ae   :  { %v4661_v58 = vpop.eup %3496  ;;  %vm864_vm13 = vweird.f32 %v4621_v1  ;;  %3498 = vrsqrt.f32 %v4656_v14  ;;  %v1162_v56 = vmax.f32 %v1098_v17, 0.0  ;;  %v1099_v24 = vadd.f32 %v4271_v60, %v1026_v42  ;;  %v5845_v7 = vld [vmem:[#allocation12_spill] sm:$0xff]  ;;  %v3221_v39 = vld [vmem:[#allocation2 + $0xc8] sm:$0xf0]  ;;  %v5846_v17 = vld [vmem:[#allocation15_spill] sm:$0xff] }
 0x1af   :  { %v868_v10 = vmul.f32 %v4661_v58, %v4623_v31  ;;  %v4672_v45 = vpack.c.bf16 %v1165_v9, %v1161_v59  ;;  %v1166_v16 = vmax.f32 %v1102_v48, 0.0  ;;  %v714_v8 = vsub.f32 %v5845_v7, %v4413_v35  ;;  %v623_v9 = vpop.xlane.xlu2 %622  ;;  %v3441_v59 = vld [vmem:[#allocation2 + $0x144] sm:$0xf]  ;;  %v3285_v48 = vld [vmem:[#allocation2 + $0x148] sm:$0xf0] }
 0x1b0   :  { %v862_v29 = vmul.f32 %v4621_v1, %v861_v61  ;;  %v1103_v40 = vadd.f32 %v4271_v60, %v1030_v30  ;;  %v718_v15 = vsub.f32 %v5846_v17, %v4463_v13  ;;  %v1163_v35 = vmax.f32 %v1099_v24, 0.0  ;;  %v3349_v61 = vld [vmem:[#allocation2 + $0x1c8] sm:$0xf0] }
 0x1b1   :  { %v869_v57 = vmul.f32 %v4661_v58, %v868_v10  ;;  %1824 = vmatmul.bf16.gmra.mxu2 %v4672_v45  ;;  %v4683_v42 = vpack.c.bf16 %v1166_v16, %v1162_v56  ;;  %v954_v7 = vmul.f32 %v4597_v5, %v714_v8  ;;  %v3160_v2 = vor.u32 %v3409_v46, %v3157_v55  ;;  %v5847_v55 = vld [vmem:[#allocation13_spill] sm:$0xff] }
 0x1b2   :  { %v1167_v10 = vmax.f32 %v1103_v40, 0.0  ;;  %v958_v30 = vmul.f32 %v4604_v32, %v718_v15  ;;  %v3224_v52 = vor.u32 %v3425_v51, %v3221_v39  ;;  %v4689_v17 = vmul.f32 0.001953125, %v463_v28  ;;  %v4711_v40 = vpop.f32.mrf.mxu0 }
 0x1b3   :  { %v870_v34 = vmul.f32 0.5, %v869_v57  ;;  %1873 = vmatmul.bf16.gmra.mxu3 %v4683_v42  ;;  %v1027_v13 = vmul.f32 %v4273_v47, %v954_v7  ;;  %2000 = vmatpush.bf16.msrb.mxu2 %v3160_v2  ;;  %v651_v56 = vmul.f32 0.001953125, %v623_v9  ;;  %v3288_v16 = vor.u32 %v3441_v59, %v3285_v48 }
 0x1b4   :  { %v4691_v24 = vpop.eup %3498  ;;  %vm863_vm15 = vweird.f32 %v4578_v38  ;;  %v4698_v57 = vpack.c.bf16 %v1167_v10, %v1163_v35  ;;  %v1031_v51 = vmul.f32 %v4273_v47, %v958_v30  ;;  %2049 = vmatpush.bf16.msrb.mxu3 %v3224_v52  ;;  %v3352_v15 = vor.u32 %v3457_v0, %v3349_v61 }
 0x1b5   :  { %v4702_v2 = vsel %vm855_vm14, %v4569_v62, %v852_v27  ;;  %vm865_vm0 = vmor %vm863_vm15, %vm864_vm13  ;;  %v878_v5 = vmul.f32 %v4691_v24, %v4656_v14  ;;  %v1100_v36 = vadd.f32 %v4275_v4, %v1027_v13  ;;  %v667_v38 = vmul.f32 %v4689_v17, %v4689_v17  ;;  %2098 = vmatpush.bf16.msrb.mxu0 %v3288_v16  ;;  %v468_v32 = vpop.xlane.xlu1 %467 }
 0x1b6   :  { %v4714_v52 = vsel %vm865_vm0, %v4621_v1, %v862_v29  ;;  %v871_v0 = vsub.f32 1.5, %v870_v34  ;;  %1922 = vmatmul.bf16.gmra.mxu0 %v4698_v57  ;;  %v1104_v62 = vadd.f32 %v4275_v4, %v1031_v51  ;;  %v4718_v28 = vmul.f32 0.001953125, %v468_v32  ;;  %2147 = vmatpush.bf16.msrb.mxu1 %v3352_v15  ;;  %v4725_v29 = vpop.f32.mrf.mxu1 }
 0x1b7   :  { %v879_v27 = vmul.f32 %v4691_v24, %v878_v5  ;;  %v683_v39 = vsub.f32 %v651_v56, %v667_v38  ;;  %v628_v46 = vpop.xlane.xlu0 %627  ;;  %v719_v8 = vsub.f32 %v5847_v55, %v4498_v44  ;;  %v723_v9 = vsub.f32 %v4021_v21, %v4549_v12  ;;  %5848 = vst [vmem:[#allocation12_spill] sm:$0xff] %v4725_v29  ;;  %v5849_v21 = vld [vmem:[#allocation14_spill] sm:$0xff] }
 0x1b8   :  { %v1164_v34 = vmax.f32 %v1100_v36, 0.0  ;;  %v1168_v1 = vmax.f32 %v1104_v62, 0.0  ;;  %v668_v59 = vmul.f32 %v4718_v28, %v4718_v28  ;;  %v652_v48 = vmul.f32 0.001953125, %v628_v46  ;;  %v3149_v46 = vld [vmem:[#allocation2 + $0x38] sm:$0xf0] }
 0x1b9   :  { %vm874_vm1 = vweird.f32 %v4661_v58  ;;  %v4730_v35 = vadd.f32 1e-05, %v683_v39  ;;  %v959_v7 = vmul.f32 %v4702_v2, %v719_v8  ;;  %v963_v61 = vmul.f32 %v4714_v52, %v723_v9 }
 0x1ba   :  { %v4734_v10 = vpack.c.bf16 %v1168_v1, %v1164_v34  ;;  %v684_v30 = vsub.f32 %v652_v48, %v668_v59  ;;  %v720_v13 = vsub.f32 %v5849_v21, %v4498_v44  ;;  %v724_v56 = vsub.f32 %v4025_v22, %v4549_v12  ;;  %v4766_v34 = vpop.f32.mrf.mxu0  ;;  %v5850_v21 = vld [vmem:[#allocation16_spill] sm:$0xff] }
 0x1bb   :  { %v872_v16 = vmul.f32 %v4661_v58, %v871_v0  ;;  %v880_v51 = vmul.f32 0.5, %v879_v27  ;;  %3500 = vrsqrt.f32 %v4730_v35  ;;  %v1032_v15 = vmul.f32 %v4259_v33, %v959_v7 }
 0x1bc   :  { %1971 = vmatmul.bf16.gmra.mxu1 %v4734_v10  ;;  %v4744_v5 = vadd.f32 1e-05, %v684_v30  ;;  %v1036_v36 = vmul.f32 %v4259_v33, %v963_v61  ;;  %v960_v38 = vmul.f32 %v4702_v2, %v720_v13  ;;  %v964_v32 = vmul.f32 %v4714_v52, %v724_v56 }
 0x1bd   :  { %vm873_vm2 = vweird.f32 %v4623_v31  ;;  %v1105_v22 = vadd.f32 %v4265_v54, %v1032_v15  ;;  %v721_v0 = vsub.f32 %v4017_v23, %v4498_v44  ;;  %vm884_vm4 = vweird.f32 %v4691_v24  ;;  %v3407_v31 = vld [vmem:[#allocation2 + $0x34] sm:$0xf]  ;;  %v473_v7 = vpop.xlane.xlu1 %472 }
 0x1be   :  { %vm875_vm3 = vmor %vm873_vm2, %vm874_vm1  ;;  %3502 = vrsqrt.f32 %v4744_v5  ;;  %v1109_v62 = vadd.f32 %v4265_v54, %v1036_v36  ;;  %v1033_v27 = vmul.f32 %v4261_v37, %v960_v38  ;;  %v725_v39 = vsub.f32 %v4046_v26, %v4549_v12  ;;  %v4777_v15 = vpop.f32.mrf.mxu1 }
 0x1bf   :  { %v4762_v55 = vsel %vm875_vm3, %v4661_v58, %v872_v16  ;;  %v881_v23 = vsub.f32 1.5, %v880_v51  ;;  %v1037_v8 = vmul.f32 %v4261_v37, %v964_v32  ;;  %v961_v9 = vmul.f32 %v4702_v2, %v721_v0  ;;  %v3423_v16 = vld [vmem:[#allocation2 + $0xb4] sm:$0xf]  ;;  %v3213_v51 = vld [vmem:[#allocation2 + $0xb8] sm:$0xf0]  ;;  %5851 = vst [vmem:[#allocation15_spill] sm:$0xff] %v4777_v15 }
 0x1c0   :  { %vm883_vm5 = vweird.f32 %v4656_v14  ;;  %v1169_v1 = vmax.f32 %v1105_v22, 0.0  ;;  %v1173_v59 = vmax.f32 %v1109_v62, 0.0  ;;  %v1106_v48 = vadd.f32 %v4267_v19, %v1033_v27  ;;  %v5852_v22 = vld [vmem:[#allocation18_spill] sm:$0xff] }
 0x1c1   :  { %v965_v26 = vmul.f32 %v4714_v52, %v725_v39  ;;  %v4771_v61 = vpop.eup %3500  ;;  %v1110_v58 = vadd.f32 %v4267_v19, %v1037_v8  ;;  %v1034_v30 = vmul.f32 %v4263_v41, %v961_v9  ;;  %v722_v13 = vsub.f32 %v5850_v21, %v4498_v44  ;;  %vm885_vm7 = vmor %vm883_vm5, %vm884_vm4 }
 0x1c2   :  { %v3152_v56 = vor.u32 %v3407_v31, %v3149_v46  ;;  %v888_v36 = vmul.f32 %v4771_v61, %v4730_v35  ;;  %v4781_v38 = vpack.c.bf16 %v1173_v59, %v1169_v1  ;;  %v1170_v32 = vmax.f32 %v1106_v48, 0.0 }
 0x1c3   :  { %v726_v0 = vsub.f32 %v5852_v22, %v4549_v12  ;;  %v1174_v62 = vmax.f32 %v1110_v58, 0.0  ;;  %v1038_v27 = vmul.f32 %v4263_v41, %v965_v26  ;;  %v1107_v39 = vadd.f32 %v4271_v60, %v1034_v30  ;;  %v633_v12 = vpop.xlane.xlu0 %632  ;;  %v3439_v58 = vld [vmem:[#allocation2 + $0x134] sm:$0xf]  ;;  %v3277_v30 = vld [vmem:[#allocation2 + $0x138] sm:$0xf0] }
 0x1c4   :  { %v962_v44 = vmul.f32 %v4702_v2, %v722_v13  ;;  %2001 = vmatpush.bf16.msrb.mxu2 %v3152_v56  ;;  %v4788_v31 = vpop.eup %3502  ;;  %v889_v46 = vmul.f32 %v4771_v61, %v888_v36  ;;  %v3216_v9 = vor.u32 %v3423_v16, %v3213_v51  ;;  %v4793_v1 = vmul.f32 0.001953125, %v473_v7  ;;  %v3341_v22 = vld [vmem:[#allocation2 + $0x1b8] sm:$0xf0] }
 0x1c5   :  { %1829 = vmatmul.bf16.gmra.mxu2 %v4781_v38  ;;  %v966_v8 = vmul.f32 %v4714_v52, %v726_v0  ;;  %v882_v59 = vmul.f32 %v4691_v24, %v881_v23  ;;  %v898_v48 = vmul.f32 %v4788_v31, %v4744_v5  ;;  %v4798_v26 = vpack.c.bf16 %v1174_v62, %v1170_v32  ;;  %v478_v7 = vpop.xlane.xlu2 %477  ;;  %v3455_v32 = vld [vmem:[#allocation2 + $0x1b4] sm:$0xf] }
 0x1c6   :  { %v1111_v2 = vadd.f32 %v4271_v60, %v1038_v27  ;;  %v890_v21 = vmul.f32 0.5, %v889_v46  ;;  %v1171_v13 = vmax.f32 %v1107_v39, 0.0  ;;  %v1035_v56 = vmul.f32 %v4273_v47, %v962_v44  ;;  %2050 = vmatpush.bf16.msrb.mxu3 %v3216_v9 }
 0x1c7   :  { %v1039_v52 = vmul.f32 %v4273_v47, %v966_v8  ;;  %vm893_vm6 = vweird.f32 %v4730_v35  ;;  %v899_v23 = vmul.f32 %v4788_v31, %v898_v48  ;;  %1878 = vmatmul.bf16.gmra.mxu3 %v4798_v26  ;;  %v669_v51 = vmul.f32 %v4793_v1, %v4793_v1  ;;  %v638_v44 = vpop.xlane.xlu1 %637  ;;  %v4819_v48 = vpop.f32.mrf.mxu0 }
 0x1c8   :  { %v1175_v16 = vmax.f32 %v1111_v2, 0.0  ;;  %v653_v36 = vmul.f32 0.001953125, %v633_v12  ;;  %v891_v0 = vsub.f32 1.5, %v890_v21  ;;  %v1108_v62 = vadd.f32 %v4275_v4, %v1035_v56  ;;  %5853 = vst [vmem:[#allocation13_spill] sm:$0xff] %v4819_v48 }
 0x1c9   :  { %v1112_v27 = vadd.f32 %v4275_v4, %v1039_v52  ;;  %v3280_v39 = vor.u32 %v3439_v58, %v3277_v30  ;;  %v900_v46 = vmul.f32 0.5, %v899_v23  ;;  %vm903_vm8 = vweird.f32 %v4744_v5  ;;  %v5861_v5 = vld [vmem:[#allocation23_spill] sm:$0xff] }
 0x1ca   :  { %v4815_v8 = vpack.c.bf16 %v1175_v16, %v1171_v13  ;;  %v685_v9 = vsub.f32 %v653_v36, %v669_v51  ;;  %v4817_v12 = vmul.f32 0.001953125, %v478_v7  ;;  %v4822_v2 = vsel %vm885_vm7, %v4691_v24, %v882_v59  ;;  %v4829_v7 = vpop.f32.mrf.mxu1  ;;  %v5855_v24 = vld [vmem:[#allocation17_spill] sm:$0xff] }
 0x1cb   :  { %v1172_v58 = vmax.f32 %v1108_v62, 0.0  ;;  %v1176_v30 = vmax.f32 %v1112_v27, 0.0  ;;  %2099 = vmatpush.bf16.msrb.mxu0 %v3280_v39  ;;  %v3344_v21 = vor.u32 %v3455_v32, %v3341_v22  ;;  %v901_v56 = vsub.f32 1.5, %v900_v46  ;;  %5854 = vst [vmem:[#allocation14_spill] sm:$0xff] %v4829_v7  ;;  %v5856_v16 = vld [vmem:[#allocation21_spill] sm:$0xff]  ;;  %v5857_v27 = vld [vmem:[#allocation19_spill] sm:$0xff] }
 0x1cc   :  { %1927 = vmatmul.bf16.gmra.mxu0 %v4815_v8  ;;  %v4825_v14 = vadd.f32 1e-05, %v685_v9  ;;  %v670_v13 = vmul.f32 %v4817_v12, %v4817_v12  ;;  %v654_v52 = vmul.f32 0.001953125, %v638_v44  ;;  %vm894_vm9 = vweird.f32 %v4771_v61  ;;  %v5858_v44 = vld [vmem:[#allocation22_spill] sm:$0xff] }
 0x1cd   :  { %v4832_v23 = vpack.c.bf16 %v1176_v30, %v1172_v58  ;;  %2148 = vmatpush.bf16.msrb.mxu1 %v3344_v21  ;;  %v727_v59 = vsub.f32 %v5855_v24, %v4585_v63  ;;  %v731_v51 = vsub.f32 %v5856_v16, %v4631_v25  ;;  %v892_v36 = vmul.f32 %v4771_v61, %v891_v0  ;;  %v5859_v58 = vld [vmem:[#allocation20_spill] sm:$0xff]  ;;  %vm895_vm11 = vmor %vm893_vm6, %vm894_vm9 }
 0x1ce   :  { %vm904_vm10 = vweird.f32 %v4788_v31  ;;  %3504 = vrsqrt.f32 %v4825_v14  ;;  %v686_v32 = vsub.f32 %v654_v52, %v670_v13  ;;  %v728_v39 = vsub.f32 %v5857_v27, %v4585_v63  ;;  %v5860_v21 = vld [vmem:[#allocation24_spill] sm:$0xff] }
 0x1cf   :  { %1976 = vmatmul.bf16.gmra.mxu1 %v4832_v23  ;;  %v967_v22 = vmul.f32 %v4762_v55, %v727_v59  ;;  %v971_v62 = vmul.f32 %v4822_v2, %v731_v51  ;;  %v732_v46 = vsub.f32 %v5858_v44, %v4631_v25  ;;  %v902_v9 = vmul.f32 %v4788_v31, %v901_v56  ;;  %vm905_vm12 = vmor %vm903_vm8, %vm904_vm10 }
 0x1d0   :  { %v4849_v0 = vadd.f32 1e-05, %v686_v32  ;;  %v729_v30 = vsub.f32 %v5859_v58, %v4585_v63  ;;  %v733_v13 = vsub.f32 %v5860_v21, %v4631_v25  ;;  %v968_v59 = vmul.f32 %v4762_v55, %v728_v39  ;;  %v4886_v58 = vpop.f32.mrf.mxu0 }
 0x1d1   :  { %v1040_v52 = vmul.f32 %v4259_v33, %v967_v22  ;;  %v1044_v24 = vmul.f32 %v4259_v33, %v971_v62  ;;  %v972_v56 = vmul.f32 %v4822_v2, %v732_v46  ;;  %v4864_v16 = vsel %vm895_vm11, %v4771_v61, %v892_v36  ;;  %5862 = vst [vmem:[#allocation16_spill] sm:$0xff] %v4886_v58  ;;  %v3269_v58 = vld [vmem:[#allocation2 + $0x128] sm:$0xf0] }
 0x1d2   :  { %3506 = vrsqrt.f32 %v4849_v0  ;;  %v969_v51 = vmul.f32 %v4762_v55, %v729_v30  ;;  %v973_v32 = vmul.f32 %v4822_v2, %v733_v13  ;;  %v1041_v62 = vmul.f32 %v4261_v37, %v968_v59 }
 0x1d3   :  { %v1113_v35 = vadd.f32 %v4265_v54, %v1040_v52  ;;  %v1117_v22 = vadd.f32 %v4265_v54, %v1044_v24  ;;  %v1045_v61 = vmul.f32 %v4261_v37, %v972_v56  ;;  %v4880_v27 = vsel %vm905_vm12, %v4788_v31, %v902_v9  ;;  %v5863_v52 = vld [vmem:[#allocation26_spill] sm:$0xff]  ;;  %v3405_v56 = vld [vmem:[#allocation2 + $0x24] sm:$0xf] }
 0x1d4   :  { %v4877_v36 = vpop.eup %3504  ;;  %v1042_v39 = vmul.f32 %v4263_v41, %v969_v51  ;;  %v1046_v44 = vmul.f32 %v4263_v41, %v973_v32  ;;  %v730_v46 = vsub.f32 %v5861_v5, %v4585_v63  ;;  %vm913_vm13 = vweird.f32 %v4825_v14  ;;  %v3141_v51 = vld [vmem:[#allocation2 + $0x28] sm:$0xf0]  ;;  %v4897_v32 = vpop.f32.mrf.mxu1 }
 0x1d5   :  { %v908_v30 = vmul.f32 %v4877_v36, %v4825_v14  ;;  %v1177_v21 = vmax.f32 %v1113_v35, 0.0  ;;  %v1181_v13 = vmax.f32 %v1117_v22, 0.0  ;;  %v734_v31 = vsub.f32 %v5863_v52, %v4631_v25  ;;  %5864 = vst [vmem:[#allocation18_spill] sm:$0xff] %v4897_v32  ;;  %v3421_v22 = vld [vmem:[#allocation2 + $0xa4] sm:$0xf] }
 0x1d6   :  { %v1114_v9 = vadd.f32 %v4267_v19, %v1041_v62  ;;  %v1118_v24 = vadd.f32 %v4267_v19, %v1045_v61  ;;  %v1115_v59 = vadd.f32 %v4271_v60, %v1042_v39  ;;  %v1119_v63 = vadd.f32 %v4271_v60, %v1046_v44  ;;  %v3205_v62 = vld [vmem:[#allocation2 + $0xa8] sm:$0xf0]  ;;  %v3437_v52 = vld [vmem:[#allocation2 + $0x124] sm:$0xf] }
 0x1d7   :  { %v909_v5 = vmul.f32 %v4877_v36, %v908_v30  ;;  %v4900_v7 = vpack.c.bf16 %v1181_v13, %v1177_v21  ;;  %v970_v35 = vmul.f32 %v4762_v55, %v730_v46  ;;  %v974_v25 = vmul.f32 %v4822_v2, %v734_v31  ;;  %v3453_v2 = vld [vmem:[#allocation2 + $0x1a4] sm:$0xf]  ;;  %v3333_v46 = vld [vmem:[#allocation2 + $0x1a8] sm:$0xf0] }
 0x1d8   :  { %v3507_v61 = vpop.eup %3506  ;;  %v1178_v15 = vmax.f32 %v1114_v9, 0.0  ;;  %v1182_v39 = vmax.f32 %v1118_v24, 0.0  ;;  %v1179_v29 = vmax.f32 %v1115_v59, 0.0  ;;  %v1183_v44 = vmax.f32 %v1119_v63, 0.0 }
 0x1d9   :  { %v910_v48 = vmul.f32 0.5, %v909_v5  ;;  %vm914_vm14 = vweird.f32 %v4877_v36  ;;  %v918_v30 = vmul.f32 %v3507_v61, %v4849_v0  ;;  %vm923_vm15 = vweird.f32 %v4849_v0  ;;  %1834 = vmatmul.bf16.gmra.mxu2 %v4900_v7 }
 0x1da   :  { %v1043_v55 = vmul.f32 %v4273_v47, %v970_v35  ;;  %v4909_v21 = vpack.c.bf16 %v1182_v39, %v1178_v15  ;;  %v4911_v13 = vpack.c.bf16 %v1183_v44, %v1179_v29  ;;  %v1047_v31 = vmul.f32 %v4273_v47, %v974_v25  ;;  %vm915_vm1 = vmor %vm913_vm13, %vm914_vm14 }
 0x1db   :  { %v3144_v9 = vor.u32 %v3405_v56, %v3141_v51  ;;  %v911_v24 = vsub.f32 1.5, %v910_v48  ;;  %v919_v59 = vmul.f32 %v3507_v61, %v918_v30  ;;  %v3208_v5 = vor.u32 %v3421_v22, %v3205_v62  ;;  %v5865_v48 = vld [vmem:[#allocation25_spill] sm:$0xff]  ;;  %v5867_v22 = vld [vmem:[#allocation27_spill] sm:$0xff] }
 0x1dc   :  { %v1116_v63 = vadd.f32 %v4275_v4, %v1043_v55  ;;  %vm924_vm0 = vweird.f32 %v3507_v61  ;;  %1883 = vmatmul.bf16.gmra.mxu3 %v4909_v21  ;;  %1932 = vmatmul.bf16.gmra.mxu0 %v4911_v13  ;;  %v1120_v35 = vadd.f32 %v4275_v4, %v1047_v31  ;;  %v3272_v32 = vor.u32 %v3437_v52, %v3269_v58  ;;  %v5866_v58 = vld [vmem:[#allocation29_spill] sm:$0xff]  ;;  %v5868_v52 = vld [vmem:[#allocation30_spill] sm:$0xff]  ;;  %v4931_v55 = vpop.f32.mrf.mxu0 }
 0x1dd   :  { %v3336_v15 = vor.u32 %v3453_v2, %v3333_v46  ;;  %v912_v29 = vmul.f32 %v4877_v36, %v911_v24  ;;  %v920_v39 = vmul.f32 0.5, %v919_v59  ;;  %2002 = vmatpush.bf16.msrb.mxu2 %v3144_v9  ;;  %2051 = vmatpush.bf16.msrb.mxu3 %v3208_v5  ;;  %v735_v56 = vsub.f32 %v5865_v48, %v4689_v17  ;;  %v4944_v5 = vpop.f32.mrf.mxu1  ;;  %vm925_vm2 = vmor %vm923_vm15, %vm924_vm0 }
 0x1de   :  { %v1180_v44 = vmax.f32 %v1116_v63, 0.0  ;;  %v1184_v51 = vmax.f32 %v1120_v35, 0.0  ;;  %2100 = vmatpush.bf16.msrb.mxu0 %v3272_v32  ;;  %v739_v25 = vsub.f32 %v5866_v58, %v4718_v28  ;;  %v736_v62 = vsub.f32 %v5867_v22, %v4689_v17  ;;  %5869 = vst [vmem:[#allocation17_spill] sm:$0xff] %v4931_v55  ;;  %v5870_v32 = vld [vmem:[#allocation28_spill] sm:$0xff] }
 0x1df   :  { %2149 = vmatpush.bf16.msrb.mxu1 %v3336_v15  ;;  %v740_v30 = vsub.f32 %v5868_v52, %v4718_v28  ;;  %v4934_v2 = vsel %vm915_vm1, %v4877_v36, %v912_v29  ;;  %v921_v46 = vsub.f32 1.5, %v920_v39  ;;  %v975_v14 = vmul.f32 %v4864_v16, %v735_v56  ;;  %5872 = vst [vmem:[#allocation19_spill] sm:$0xff] %v4944_v5  ;;  %v5873_v15 = vld [vmem:[#allocation32_spill] sm:$0xff]  ;;  %v3403_v52 = vld [vmem:[#allocation2 + $0x14] sm:$0xf] }
 0x1e0   :  { %v737_v31 = vsub.f32 %v5870_v32, %v4689_v17  ;;  %v4939_v9 = vpack.c.bf16 %v1184_v51, %v1180_v44  ;;  %v979_v24 = vmul.f32 %v4880_v27, %v739_v25  ;;  %v976_v59 = vmul.f32 %v4864_v16, %v736_v62  ;;  %v5874_v51 = vld [vmem:[#allocation31_spill] sm:$0xff] }
 0x1e1   :  { %v980_v63 = vmul.f32 %v4880_v27, %v740_v30  ;;  %v922_v35 = vmul.f32 %v3507_v61, %v921_v46  ;;  %v1048_v36 = vmul.f32 %v4259_v33, %v975_v14  ;;  %v741_v29 = vsub.f32 %v5873_v15, %v4718_v28  ;;  %v3133_v30 = vld [vmem:[#allocation2 + $0x18] sm:$0xf0] }
 0x1e2   :  { %5871 = vst [vmem:[#allocation21_spill] sm:$0xff] %v4939_v9  ;;  %v977_v39 = vmul.f32 %v4864_v16, %v737_v31  ;;  %1981 = vmatmul.bf16.gmra.mxu1 %v4939_v9  ;;  %v1052_v44 = vmul.f32 %v4259_v33, %v979_v24  ;;  %v1049_v48 = vmul.f32 %v4261_v37, %v976_v59  ;;  %v5875_v31 = vld [vmem:[#allocation33_spill] sm:$0xff]  ;;  %v3435_v59 = vld [vmem:[#allocation2 + $0x114] sm:$0xf]  ;;  %v3325_v5 = vld [vmem:[#allocation2 + $0x198] sm:$0xf0] }
 0x1e3   :  { %v1053_v56 = vmul.f32 %v4261_v37, %v980_v63  ;;  %v738_v58 = vsub.f32 %v5874_v51, %v4689_v17  ;;  %v4959_v25 = vsel %vm925_vm2, %v3507_v61, %v922_v35  ;;  %v1121_v22 = vadd.f32 %v4265_v54, %v1048_v36  ;;  %v3419_v17 = vld [vmem:[#allocation2 + $0x94] sm:$0xf]  ;;  %v3197_v61 = vld [vmem:[#allocation2 + $0x98] sm:$0xf0] }
 0x1e4   :  { %v981_v62 = vmul.f32 %v4880_v27, %v741_v29  ;;  %v1050_v0 = vmul.f32 %v4263_v41, %v977_v39  ;;  %v1125_v46 = vadd.f32 %v4265_v54, %v1052_v44  ;;  %v1122_v14 = vadd.f32 %v4267_v19, %v1049_v48  ;;  %v3261_v29 = vld [vmem:[#allocation2 + $0x118] sm:$0xf0]  ;;  %v3451_v39 = vld [vmem:[#allocation2 + $0x194] sm:$0xf] }
 0x1e5   :  { %v1126_v32 = vadd.f32 %v4267_v19, %v1053_v56  ;;  %v742_v24 = vsub.f32 %v5875_v31, %v4718_v28  ;;  %v1185_v63 = vmax.f32 %v1121_v22, 0.0  ;;  %v978_v15 = vmul.f32 %v4864_v16, %v738_v58 }
 0x1e6   :  { %v1054_v35 = vmul.f32 %v4263_v41, %v981_v62  ;;  %v1123_v36 = vadd.f32 %v4271_v60, %v1050_v0  ;;  %v1189_v44 = vmax.f32 %v1125_v46, 0.0  ;;  %v1186_v51 = vmax.f32 %v1122_v14, 0.0  ;;  %v4980_v0 = vpop.f32.mrf.mxu0 }
 0x1e7   :  { %v1190_v48 = vmax.f32 %v1126_v32, 0.0  ;;  %v982_v56 = vmul.f32 %v4880_v27, %v742_v24  ;;  %v1051_v55 = vmul.f32 %v4273_v47, %v978_v15  ;;  %v3136_v22 = vor.u32 %v3403_v52, %v3133_v30  ;;  %v4985_v52 = vpop.f32.mrf.mxu1  ;;  %v5876_v30 = vld [vmem:[#allocation34_spill] sm:$0xff] }
 0x1e8   :  { %v1127_v28 = vadd.f32 %v4271_v60, %v1054_v35  ;;  %v1187_v31 = vmax.f32 %v1123_v36, 0.0  ;;  %v4975_v9 = vpack.c.bf16 %v1189_v44, %v1185_v63  ;;  %v3200_v58 = vor.u32 %v3419_v17, %v3197_v61  ;;  %v5877_v17 = vld [vmem:[#allocation38_spill] sm:$0xff] }
 0x1e9   :  { %v4977_v62 = vpack.c.bf16 %v1190_v48, %v1186_v51  ;;  %v1055_v16 = vmul.f32 %v4273_v47, %v982_v56  ;;  %v1124_v14 = vadd.f32 %v4275_v4, %v1051_v55  ;;  %2003 = vmatpush.bf16.msrb.mxu2 %v3136_v22  ;;  %v3264_v27 = vor.u32 %v3435_v59, %v3261_v29  ;;  %v5878_v55 = vld [vmem:[#allocation35_spill] sm:$0xff]  ;;  %v5880_v51 = vld [vmem:[#allocation36_spill] sm:$0xff] }
 0x1ea   :  { %v1191_v46 = vmax.f32 %v1127_v28, 0.0  ;;  %v3328_v32 = vor.u32 %v3451_v39, %v3325_v5  ;;  %1839 = vmatmul.bf16.gmra.mxu2 %v4975_v9  ;;  %2052 = vmatpush.bf16.msrb.mxu3 %v3200_v58  ;;  %v743_v63 = vsub.f32 %v5876_v30, %v4793_v1  ;;  %v747_v61 = vsub.f32 %v5877_v17, %v4817_v12  ;;  %v5879_v59 = vld [vmem:[#allocation39_spill] sm:$0xff]  ;;  %v5883_v17 = vld [vmem:[#allocation41_spill] sm:$0xff] }
 0x1eb   :  { %v1128_v24 = vadd.f32 %v4275_v4, %v1055_v16  ;;  %v1188_v36 = vmax.f32 %v1124_v14, 0.0  ;;  %2101 = vmatpush.bf16.msrb.mxu0 %v3264_v27  ;;  %v744_v5 = vsub.f32 %v5878_v55, %v4793_v1  ;;  %v748_v15 = vsub.f32 %v5879_v59, %v4817_v12  ;;  %v5882_v16 = vld [vmem:[#allocation37_spill] sm:$0xff] }
 0x1ec   :  { %v4991_v35 = vpack.c.bf16 %v1191_v46, %v1187_v31  ;;  %2150 = vmatpush.bf16.msrb.mxu1 %v3328_v32  ;;  %1888 = vmatmul.bf16.gmra.mxu3 %v4977_v62  ;;  %v983_v39 = vmul.f32 %v4934_v2, %v743_v63  ;;  %v987_v44 = vmul.f32 %v4959_v25, %v747_v61  ;;  %v5881_v31 = vld [vmem:[#allocation40_spill] sm:$0xff] }
 0x1ed   :  { %v1192_v29 = vmax.f32 %v1128_v24, 0.0  ;;  %v745_v48 = vsub.f32 %v5880_v51, %v4793_v1  ;;  %v984_v56 = vmul.f32 %v4934_v2, %v744_v5  ;;  %v988_v28 = vmul.f32 %v4959_v25, %v748_v15  ;;  %v3189_v51 = vld [vmem:[#allocation2 + $0x88] sm:$0xf0] }
 0x1ee   :  { %1937 = vmatmul.bf16.gmra.mxu0 %v4991_v35  ;;  %v749_v22 = vsub.f32 %v5881_v31, %v4817_v12  ;;  %v746_v58 = vsub.f32 %v5882_v16, %v4793_v1  ;;  %v1056_v14 = vmul.f32 %v4259_v33, %v983_v39  ;;  %v1060_v27 = vmul.f32 %v4259_v33, %v987_v44  ;;  %v3125_v39 = vld [vmem:[#allocation2 + $0x8] sm:$0xf0]  ;;  %v3417_v44 = vld [vmem:[#allocation2 + $0x84] sm:$0xf] }
 0x1ef   :  { %v5009_v46 = vpack.c.bf16 %v1192_v29, %v1188_v36  ;;  %v985_v32 = vmul.f32 %v4934_v2, %v745_v48  ;;  %v1057_v24 = vmul.f32 %v4261_v37, %v984_v56  ;;  %v1061_v30 = vmul.f32 %v4261_v37, %v988_v28  ;;  %v3401_v29 = vld [vmem:[#allocation2 + $0x4] sm:$0xf]  ;;  %v3253_v28 = vld [vmem:[#allocation2 + $0x108] sm:$0xf0] }
 0x1f0   :  { %v989_v63 = vmul.f32 %v4959_v25, %v749_v22  ;;  %v750_v61 = vsub.f32 %v5883_v17, %v4817_v12  ;;  %v1129_v55 = vadd.f32 %v4265_v54, %v1056_v14  ;;  %v1133_v1 = vadd.f32 %v4265_v54, %v1060_v27  ;;  %v5028_v54 = vpop.f32.mrf.mxu0  ;;  %v3433_v48 = vld [vmem:[#allocation2 + $0x104] sm:$0xf]  ;;  %v3317_v31 = vld [vmem:[#allocation2 + $0x188] sm:$0xf0]  ;;  %v5034_v14 = vpop.f32.mrf.mxu1 }
 0x1f1   :  { %v1058_v36 = vmul.f32 %v4263_v41, %v985_v32  ;;  %v986_v5 = vmul.f32 %v4934_v2, %v746_v58  ;;  %v1130_v33 = vadd.f32 %v4267_v19, %v1057_v24  ;;  %v1134_v59 = vadd.f32 %v4267_v19, %v1061_v30 }
 0x1f2   :  { %v1062_v15 = vmul.f32 %v4263_v41, %v989_v63  ;;  %v990_v37 = vmul.f32 %v4959_v25, %v750_v61  ;;  %1986 = vmatmul.bf16.gmra.mxu1 %v5009_v46  ;;  %v1197_v12 = vmax.f32 %v1133_v1, 0.0  ;;  %v3449_v41 = vld [vmem:[#allocation2 + $0x184] sm:$0xf]  ;;  %v1193_v25 = vmax.f32 %v1129_v55, 0.0 }
 0x1f3   :  { %v1131_v2 = vadd.f32 %v4271_v60, %v1058_v36  ;;  %v1198_v22 = vmax.f32 %v1134_v59, 0.0  ;;  %v1059_v16 = vmul.f32 %v4273_v47, %v986_v5  ;;  %v3128_v58 = vor.u32 %v3401_v29, %v3125_v39  ;;  %v5884_v39 = vld [vmem:[#allocation42_spill] sm:$0xff] }
 0x1f4   :  { %v1135_v56 = vadd.f32 %v4271_v60, %v1062_v15  ;;  %v1063_v19 = vmul.f32 %v4273_v47, %v990_v37  ;;  %v1194_v27 = vmax.f32 %v1130_v33, 0.0  ;;  %v3192_v24 = vor.u32 %v3417_v44, %v3189_v51 }
 0x1f5   :  { %v5036_v30 = vpack.c.bf16 %v1197_v12, %v1193_v25  ;;  %2004 = vmatpush.bf16.msrb.mxu2 %v3128_v58  ;;  %v3256_v60 = vor.u32 %v3433_v48, %v3253_v28  ;;  %v3320_v17 = vor.u32 %v3449_v41, %v3317_v31  ;;  %v1195_v61 = vmax.f32 %v1131_v2, 0.0 }
 0x1f6   :  { %v1199_v32 = vmax.f32 %v1135_v56, 0.0  ;;  %v1136_v63 = vadd.f32 %v4275_v4, %v1063_v19  ;;  %2053 = vmatpush.bf16.msrb.mxu3 %v3192_v24  ;;  %v5039_v1 = vpack.c.bf16 %v1198_v22, %v1194_v27  ;;  %v1132_v55 = vadd.f32 %v4275_v4, %v1059_v16  ;;  %v5885_v22 = vld [vmem:[#allocation46_spill] sm:$0xff] }
 0x1f7   :  { %2102 = vmatpush.bf16.msrb.mxu0 %v3256_v60  ;;  %2151 = vmatpush.bf16.msrb.mxu1 %v3320_v17 }
 0x1f8   :  { %v5042_v47 = vpack.c.bf16 %v1199_v32, %v1195_v61  ;;  %v1200_v36 = vmax.f32 %v1136_v63, 0.0  ;;  %v1196_v5 = vmax.f32 %v1132_v55, 0.0  ;;  %v5886_v55 = vld [vmem:[#allocation49_spill] sm:$0xff] }
 0x1f9   :  { %v1908_v33 = vpop.f32.mrf.mxu0 }
 0x1fa   :  { %1844 = vmatmul.bf16.gmra.mxu2 %v5036_v30  ;;  %v5047_v59 = vpack.c.bf16 %v1200_v36, %v1196_v5  ;;  %v1957_v15 = vpop.f32.mrf.mxu1 }
 0x1fc   :  { %1893 = vmatmul.bf16.gmra.mxu3 %v5039_v1 }
 0x1fd   :  { %v1810_v37 = vpop.f32.mrf.mxu2 }
 0x1fe   :  { %1942 = vmatmul.bf16.gmra.mxu0 %v5042_v47  ;;  %v1859_v29 = vpop.f32.mrf.mxu3  ;;  %v1811_v4 = vadd.f32 %v1810_v37, %v5884_v39  ;;  %v5887_v37 = vld [vmem:[#allocation54_spill] sm:$0xff] }
 0x200   :  { %v1860_v44 = vadd.f32 %v1859_v29, %v1811_v4  ;;  %v5888_v29 = vld [vmem:[#allocation51_spill] sm:$0xff] }
 0x201   :  { %v5051_v51 = vpop.f32.mrf.mxu0 }
 0x202   :  { %1991 = vmatmul.bf16.gmra.mxu1 %v5047_v59  ;;  %v1909_v12 = vadd.f32 %v1908_v33, %v1860_v44  ;;  %v5059_v19 = vpop.f32.mrf.mxu1  ;;  %v5889_v44 = vld [vmem:[#allocation56_spill] sm:$0xff] }
 0x204   :  { %v5053_v48 = vadd.f32 %v1957_v15, %v1909_v12 }
 0x205   :  { %v5055_v2 = vpop.f32.mrf.mxu2 }
 0x206   :  { %v5057_v56 = vpop.f32.mrf.mxu3 }
 0x20a   :  { %2005 = vmatmul.bf16.vlgmr.msrb.gmra.mxu2 %v4384_v11 }
 0x20c   :  { %2054 = vmatmul.bf16.vlgmr.msrb.gmra.mxu3 %v4386_v6  ;;  %v1913_v28 = vpop.f32.mrf.mxu0 }
 0x20e   :  { %2103 = vmatmul.bf16.vlgmr.msrb.gmra.mxu0 %v4397_v49  ;;  %v1962_v25 = vpop.f32.mrf.mxu1 }
 0x211   :  { %v1815_v41 = vpop.f32.mrf.mxu2  ;;  %v1864_v31 = vpop.f32.mrf.mxu3 }
 0x212   :  { %2152 = vmatmul.bf16.vlgmr.msrb.gmra.mxu1 %v4399_v50  ;;  %v1816_v16 = vadd.f32 %v1815_v41, %v5885_v22 }
 0x214   :  { %v1865_v58 = vadd.f32 %v1864_v31, %v1816_v16  ;;  %v1915_v32 = vpop.f32.mrf.mxu0  ;;  %v5891_v31 = vld [vmem:[#allocation57_spill] sm:$0xff] }
 0x215   :  { %v5892_v16 = vld [vmem:[#allocation53_spill] sm:$0xff] }
 0x216   :  { %v1914_v27 = vadd.f32 %v1913_v28, %v1865_v58  ;;  %v5071_v6 = vpop.f32.mrf.mxu1  ;;  %v5890_v28 = vld [vmem:[#allocation10_spill] sm:$0xff] }
 0x218   :  { %v5066_v24 = vadd.f32 %v1962_v25, %v1914_v27 }
 0x219   :  { %v1817_v63 = vpop.f32.mrf.mxu2  ;;  %v1866_v60 = vpop.f32.mrf.mxu3 }
 0x21a   :  { %2010 = vmatmul.bf16.gmra.mxu2 %v4479_v43  ;;  %v1818_v11 = vadd.f32 %v1817_v63, %v4408_v20 }
 0x21c   :  { %2059 = vmatmul.bf16.gmra.mxu3 %v4481_v18  ;;  %v1867_v49 = vadd.f32 %v1866_v60, %v1818_v11 }
 0x21e   :  { %2108 = vmatmul.bf16.gmra.mxu0 %v4485_v3  ;;  %v5074_v50 = vadd.f32 %v1915_v32, %v1867_v49 }
 0x21f   :  { %v1918_v17 = vpop.f32.mrf.mxu0 }
 0x221   :  { %v1820_v61 = vpop.f32.mrf.mxu2  ;;  %v1869_v5 = vpop.f32.mrf.mxu3 }
 0x222   :  { %2157 = vmatmul.bf16.gmra.mxu1 %v4496_v53  ;;  %v1821_v36 = vadd.f32 %v1820_v61, %v5886_v55 }
 0x224   :  { %v1870_v33 = vadd.f32 %v1869_v5, %v1821_v36 }
 0x225   :  { %v1967_v43 = vpop.f32.mrf.mxu1 }
 0x226   :  { %v1919_v15 = vadd.f32 %v1918_v17, %v1870_v33  ;;  %v5893_v17 = vld [vmem:[#allocation8_spill] sm:$0xff] }
 0x227   :  { %v1920_v3 = vpop.f32.mrf.mxu0 }
 0x228   :  { %v5078_v20 = vadd.f32 %v1967_v43, %v1919_v15 }
 0x229   :  { %v1822_v18 = vpop.f32.mrf.mxu2  ;;  %v1871_v4 = vpop.f32.mrf.mxu3 }
 0x22a   :  { %2015 = vmatmul.bf16.gmra.mxu2 %v5887_v37  ;;  %v1823_v39 = vadd.f32 %v1822_v18, %v5888_v29  ;;  %v5894_v37 = vld [vmem:[#allocation11_spill] sm:$0xff] }
 0x22c   :  { %2064 = vmatmul.bf16.gmra.mxu3 %v5889_v44  ;;  %v1872_v12 = vadd.f32 %v1871_v4, %v1823_v39 }
 0x22d   :  { %v5086_v41 = vpop.f32.mrf.mxu1 }
 0x22e   :  { %2113 = vmatmul.bf16.gmra.mxu0 %v5890_v28  ;;  %v5084_v53 = vadd.f32 %v1920_v3, %v1872_v12 }
 0x232   :  { %2162 = vmatmul.bf16.gmra.mxu1 %v5891_v31 }
 0x233   :  { %v1923_v25 = vpop.f32.mrf.mxu0 }
 0x234   :  { %v1825_v22 = vpop.f32.mrf.mxu2 }
 0x235   :  { %v1826_v58 = vadd.f32 %v1825_v22, %v5892_v16 }
 0x236   :  { %v1874_v27 = vpop.f32.mrf.mxu3 }
 0x237   :  { %v1875_v32 = vadd.f32 %v1874_v27, %v1826_v58 }
 0x239   :  { %v1972_v63 = vpop.f32.mrf.mxu1  ;;  %v1924_v60 = vadd.f32 %v1923_v25, %v1875_v32  ;;  %v5895_v32 = vld [vmem:[#allocation21_spill] sm:$0xff] }
 0x23a   :  { %2020 = vmatmul.bf16.gmra.mxu2 %v4672_v45 }
 0x23b   :  { %v5092_v11 = vadd.f32 %v1972_v63, %v1924_v60  ;;  %v1925_v55 = vpop.f32.mrf.mxu0 }
 0x23c   :  { %2069 = vmatmul.bf16.gmra.mxu3 %v4683_v42  ;;  %v1827_v49 = vpop.f32.mrf.mxu2 }
 0x23d   :  { %v1828_v61 = vadd.f32 %v1827_v49, %v5893_v17  ;;  %v5896_v17 = vld [vmem:[#allocation13_spill] sm:$0xff] }
 0x23e   :  { %2118 = vmatmul.bf16.gmra.mxu0 %v4698_v57  ;;  %v1876_v36 = vpop.f32.mrf.mxu3 }
 0x23f   :  { %v1877_v5 = vadd.f32 %v1876_v36, %v1828_v61 }
 0x241   :  { %v1974_v33 = vpop.f32.mrf.mxu1  ;;  %v1926_v43 = vadd.f32 %v1925_v55, %v1877_v5 }
 0x242   :  { %2167 = vmatmul.bf16.gmra.mxu1 %v4734_v10 }
 0x243   :  { %v5097_v15 = vadd.f32 %v1974_v33, %v1926_v43  ;;  %v5897_v33 = vld [vmem:[#allocation16_spill] sm:$0xff] }
 0x248   :  { %v1830_v45 = vpop.f32.mrf.mxu2 }
 0x249   :  { %v1928_v18 = vpop.f32.mrf.mxu0  ;;  %v1831_v42 = vadd.f32 %v1830_v45, %v5894_v37 }
 0x24a   :  { %2025 = vmatmul.bf16.gmra.mxu2 %v4781_v38  ;;  %v1879_v29 = vpop.f32.mrf.mxu3 }
 0x24b   :  { %v1880_v39 = vadd.f32 %v1879_v29, %v1831_v42 }
 0x24c   :  { %v1977_v57 = vpop.f32.mrf.mxu1  ;;  %2074 = vmatmul.bf16.gmra.mxu3 %v4798_v26 }
 0x24d   :  { %v1929_v3 = vadd.f32 %v1928_v18, %v1880_v39 }
 0x24e   :  { %2123 = vmatmul.bf16.gmra.mxu0 %v4815_v8 }
 0x24f   :  { %v5103_v4 = vadd.f32 %v1977_v57, %v1929_v3 }
 0x250   :  { %v1832_v10 = vpop.f32.mrf.mxu2 }
 0x251   :  { %v1930_v44 = vpop.f32.mrf.mxu0  ;;  %v1833_v12 = vadd.f32 %v1832_v10, %v4711_v40 }
 0x252   :  { %2172 = vmatmul.bf16.gmra.mxu1 %v4832_v23  ;;  %v1881_v28 = vpop.f32.mrf.mxu3 }
 0x253   :  { %v1882_v31 = vadd.f32 %v1881_v28, %v1833_v12 }
 0x254   :  { %v1979_v25 = vpop.f32.mrf.mxu1 }
 0x255   :  { %v1931_v38 = vadd.f32 %v1930_v44, %v1882_v31 }
 0x257   :  { %v5107_v22 = vadd.f32 %v1979_v25, %v1931_v38 }
 0x259   :  { %v1933_v16 = vpop.f32.mrf.mxu0 }
 0x25a   :  { %2030 = vmatmul.bf16.gmra.mxu2 %v4900_v7 }
 0x25c   :  { %2079 = vmatmul.bf16.gmra.mxu3 %v4909_v21  ;;  %v1835_v26 = vpop.f32.mrf.mxu2 }
 0x25d   :  { %v1836_v8 = vadd.f32 %v1835_v26, %v4766_v34 }
 0x25e   :  { %2128 = vmatmul.bf16.gmra.mxu0 %v4911_v13 }
 0x25f   :  { %v1982_v58 = vpop.f32.mrf.mxu1  ;;  %v1884_v40 = vpop.f32.mrf.mxu3 }
 0x260   :  { %v1885_v27 = vadd.f32 %v1884_v40, %v1836_v8 }
 0x261   :  { %v1935_v23 = vpop.f32.mrf.mxu0 }
 0x262   :  { %2177 = vmatmul.bf16.gmra.mxu1 %v5895_v32  ;;  %v1934_v63 = vadd.f32 %v1933_v16, %v1885_v27 }
 0x264   :  { %v5114_v60 = vadd.f32 %v1982_v58, %v1934_v63  ;;  %v1837_v49 = vpop.f32.mrf.mxu2  ;;  %v5899_v63 = vld [vmem:[#allocation44_spill] sm:$0xff] }
 0x265   :  { %v1838_v61 = vadd.f32 %v1837_v49, %v5896_v17 }
 0x267   :  { %v1984_v7 = vpop.f32.mrf.mxu1  ;;  %v1886_v55 = vpop.f32.mrf.mxu3 }
 0x268   :  { %v1887_v21 = vadd.f32 %v1886_v55, %v1838_v61  ;;  %v5900_v61 = vld [vmem:[#allocation43_spill] sm:$0xff] }
 0x26a   :  { %v1936_v36 = vadd.f32 %v1935_v23, %v1887_v21  ;;  %2035 = vmatmul.bf16.gmra.mxu2 %v4975_v9  ;;  %v5898_v9 = vld [vmem:[#allocation17_spill] sm:$0xff] }
 0x26b   :  { %v1938_v5 = vpop.f32.mrf.mxu0 }
 0x26c   :  { %v5118_v34 = vadd.f32 %v1984_v7, %v1936_v36  ;;  %2084 = vmatmul.bf16.gmra.mxu3 %v4977_v62 }
 0x26d   :  { %v1840_v13 = vpop.f32.mrf.mxu2 }
 0x26e   :  { %2133 = vmatmul.bf16.gmra.mxu0 %v4991_v35  ;;  %v1841_v43 = vadd.f32 %v1840_v13, %v5897_v33 }
 0x26f   :  { %v1987_v45 = vpop.f32.mrf.mxu1  ;;  %v1889_v18 = vpop.f32.mrf.mxu3 }
 0x270   :  { %v1890_v37 = vadd.f32 %v1889_v18, %v1841_v43 }
 0x272   :  { %2182 = vmatmul.bf16.gmra.mxu1 %v5009_v46  ;;  %v1939_v42 = vadd.f32 %v1938_v5, %v1890_v37 }
 0x273   :  { %v1940_v29 = vpop.f32.mrf.mxu0 }
 0x274   :  { %v5124_v57 = vadd.f32 %v1987_v45, %v1939_v42  ;;  %v5901_v42 = vld [vmem:[#allocation45_spill] sm:$0xff] }
 0x275   :  { %v1842_v39 = vpop.f32.mrf.mxu2 }
 0x276   :  { %v1843_v3 = vadd.f32 %v1842_v39, %v5898_v9 }
 0x277   :  { %v1989_v10 = vpop.f32.mrf.mxu1  ;;  %v1891_v44 = vpop.f32.mrf.mxu3 }
 0x278   :  { %v1892_v62 = vadd.f32 %v1891_v44, %v1843_v3 }
 0x27a   :  { %v1941_v12 = vadd.f32 %v1940_v29, %v1892_v62  ;;  %2040 = vmatmul.bf16.gmra.mxu2 %v5036_v30 }
 0x27b   :  { %v1943_v35 = vpop.f32.mrf.mxu0 }
 0x27c   :  { %v5128_v28 = vadd.f32 %v1989_v10, %v1941_v12  ;;  %2089 = vmatmul.bf16.gmra.mxu3 %v5039_v1 }
 0x27d   :  { %v1845_v46 = vpop.f32.mrf.mxu2 }
 0x27e   :  { %2138 = vmatmul.bf16.gmra.mxu0 %v5042_v47  ;;  %v1846_v31 = vadd.f32 %v1845_v46, %v4980_v0  ;;  %v1813_v0 = vadd.f32 %v5055_v2, %v5899_v63 }
 0x27f   :  { %v1992_v25 = vpop.f32.mrf.mxu1  ;;  %v1894_v38 = vpop.f32.mrf.mxu3 }
 0x280   :  { %v1895_v16 = vadd.f32 %v1894_v38, %v1846_v31  ;;  %v1862_v55 = vadd.f32 %v5057_v56, %v1813_v0 }
 0x282   :  { %2187 = vmatmul.bf16.gmra.mxu1 %v5047_v59  ;;  %v1944_v26 = vadd.f32 %v1943_v35, %v1895_v16  ;;  %v1201_v59 = vld [vmem:[%s5736_s6] ss:$8 sm:$0x3]  ;;  %v1911_v2 = vadd.f32 %v5051_v51, %v1862_v55  ;;  %v1965_v55 = vadd.f32 %v5071_v6, %v5074_v50 }
 0x283   :  { %v1945_v8 = vpop.f32.mrf.mxu0  ;;  %v5146_v36 = vperm.slane %v1201_v59, 0  ;;  %v5148_v43 = vperm.slane %v1201_v59, 1 }
 0x284   :  { %v5134_v58 = vadd.f32 %v1992_v25, %v1944_v26  ;;  %v1960_v39 = vadd.f32 %v5059_v19, %v1911_v2  ;;  %v5902_v25 = vld [vmem:[#allocation47_spill] sm:$0xff] }
 0x285   :  { %v1847_v40 = vpop.f32.mrf.mxu2  ;;  %v5153_v18 = vadd.f32 %v5146_v36, %v5053_v48  ;;  %v5181_v0 = vadd.f32 %v5146_v36, %v5066_v24  ;;  %v5196_v6 = vadd.f32 %v5146_v36, %v1965_v55  ;;  %v5906_v55 = vld [vmem:[#allocation55_spill] sm:$0xff] }
 0x286   :  { %v1848_v30 = vadd.f32 %v1847_v40, %v5028_v54  ;;  %v5167_v19 = vadd.f32 %v5146_v36, %v1960_v39 }
 0x287   :  { %v1994_v27 = vpop.f32.mrf.mxu1  ;;  %v1896_v23 = vpop.f32.mrf.mxu3  ;;  %v2294_v51 = vmul.f32 %v5153_v18, %v5153_v18 }
 0x288   :  { %v1897_v1 = vadd.f32 %v1896_v23, %v1848_v30 }
 0x28a   :  { %v1946_v32 = vadd.f32 %v1945_v8, %v1897_v1 }
 0x28b   :  { %v2104_v47 = vpop.f32.mrf.mxu0 }
 0x28c   :  { %v5139_v49 = vadd.f32 %v1994_v27, %v1946_v32  ;;  %v2296_v27 = vmul.f32 %v5167_v19, %v5167_v19 }
 0x28d   :  { %v2006_v17 = vpop.f32.mrf.mxu2 }
 0x28e   :  { %v2007_v7 = vadd.f32 %v2006_v17, %v5900_v61  ;;  %v5903_v17 = vld [vmem:[#allocation48_spill] sm:$0xff] }
 0x28f   :  { %v2153_v54 = vpop.f32.mrf.mxu1  ;;  %v2055_v21 = vpop.f32.mrf.mxu3 }
 0x290   :  { %v2056_v5 = vadd.f32 %v2055_v21, %v2007_v7 }
 0x292   :  { %v2105_v13 = vadd.f32 %v2104_v47, %v2056_v5 }
 0x293   :  { %v2106_v33 = vpop.f32.mrf.mxu0 }
 0x294   :  { %v2154_v45 = vadd.f32 %v2153_v54, %v2105_v13 }
 0x295   :  { %v2008_v37 = vpop.f32.mrf.mxu2 }
 0x296   :  { %v2009_v29 = vadd.f32 %v2008_v37, %v5901_v42  ;;  %v5157_v56 = vadd.f32 %v5148_v43, %v2154_v45 }
 0x297   :  { %v2155_v9 = vpop.f32.mrf.mxu1  ;;  %v2057_v3 = vpop.f32.mrf.mxu3 }
 0x298   :  { %v2058_v10 = vadd.f32 %v2057_v3, %v2009_v29  ;;  %v2230_v44 = vadd.f32 %v5157_v56, %v5153_v18  ;;  %v2295_v48 = vmul.f32 %v5157_v56, %v5157_v56  ;;  %v5904_v29 = vld [vmem:[#allocation50_spill] sm:$0xff] }
 0x29a   :  { %v2107_v62 = vadd.f32 %v2106_v33, %v2058_v10  ;;  %2231 = vadd.xlane.f32.xlu2 %v2230_v44  ;;  %v2326_v35 = vadd.f32 %v2295_v48, %v2294_v51  ;;  %v2298_v33 = vmul.f32 %v5181_v0, %v5181_v0  ;;  %v2300_v48 = vmul.f32 %v5196_v6, %v5196_v6 }
 0x29b   :  { %v2109_v12 = vpop.f32.mrf.mxu0 }
 0x29c   :  { %v2156_v46 = vadd.f32 %v2155_v9, %v2107_v62  ;;  %2327 = vadd.xlane.f32.xlu1 %v2326_v35 }
 0x29d   :  { %v2011_v31 = vpop.f32.mrf.mxu2 }
 0x29e   :  { %v2012_v38 = vadd.f32 %v2011_v31, %v5902_v25  ;;  %v5171_v16 = vadd.f32 %v5148_v43, %v2156_v46  ;;  %v5210_v25 = vadd.f32 %v5146_v36, %v5078_v20 }
 0x29f   :  { %v2158_v26 = vpop.f32.mrf.mxu1  ;;  %v2060_v8 = vpop.f32.mrf.mxu3 }
 0x2a0   :  { %v2061_v40 = vadd.f32 %v2060_v8, %v2012_v38  ;;  %v2233_v30 = vadd.f32 %v5171_v16, %v5167_v19  ;;  %v2297_v23 = vmul.f32 %v5171_v16, %v5171_v16 }
 0x2a2   :  { %v2110_v1 = vadd.f32 %v2109_v12, %v2061_v40  ;;  %2234 = vadd.xlane.f32.xlu0 %v2233_v30  ;;  %v2329_v47 = vadd.f32 %v2297_v23, %v2296_v27  ;;  %v1970_v30 = vadd.f32 %v5086_v41, %v5084_v53 }
 0x2a3   :  { %v2111_v32 = vpop.f32.mrf.mxu0 }
 0x2a4   :  { %v2159_v63 = vadd.f32 %v2158_v26, %v2110_v1  ;;  %2330 = vadd.xlane.f32.xlu2 %v2329_v47  ;;  %v5905_v26 = vld [vmem:[#allocation52_spill] sm:$0xff]  ;;  %v2302_v47 = vmul.f32 %v5210_v25, %v5210_v25  ;;  %v5225_v53 = vadd.f32 %v5146_v36, %v1970_v30  ;;  %v5908_v30 = vld [vmem:[#allocation58_spill] sm:$0xff] }
 0x2a5   :  { %v2013_v59 = vpop.f32.mrf.mxu2 }
 0x2a6   :  { %v2014_v61 = vadd.f32 %v2013_v59, %v5903_v17  ;;  %v5185_v7 = vadd.f32 %v5148_v43, %v2159_v63 }
 0x2a7   :  { %v2160_v54 = vpop.f32.mrf.mxu1  ;;  %v2062_v21 = vpop.f32.mrf.mxu3 }
 0x2a8   :  { %v2063_v5 = vadd.f32 %v2062_v21, %v2014_v61  ;;  %v2236_v13 = vadd.f32 %v5185_v7, %v5181_v0  ;;  %v2299_v24 = vmul.f32 %v5185_v7, %v5185_v7 }
 0x2aa   :  { %v2112_v2 = vadd.f32 %v2111_v32, %v2063_v5  ;;  %2237 = vadd.xlane.f32.xlu1 %v2236_v13  ;;  %v2332_v37 = vadd.f32 %v2299_v24, %v2298_v33 }
 0x2ab   :  { %v2114_v45 = vpop.f32.mrf.mxu0 }
 0x2ac   :  { %v2161_v42 = vadd.f32 %v2160_v54, %v2112_v2  ;;  %2333 = vadd.xlane.f32.xlu0 %v2332_v37  ;;  %v2304_v2 = vmul.f32 %v5225_v53, %v5225_v53 }
 0x2ad   :  { %v2016_v50 = vpop.f32.mrf.mxu2 }
 0x2ae   :  { %v2017_v39 = vadd.f32 %v2016_v50, %v5904_v29  ;;  %v5200_v9 = vadd.f32 %v5148_v43, %v2161_v42 }
 0x2af   :  { %v2163_v3 = vpop.f32.mrf.mxu1  ;;  %v2065_v10 = vpop.f32.mrf.mxu3 }
 0x2b0   :  { %v2066_v44 = vadd.f32 %v2065_v10, %v2017_v39  ;;  %v2239_v51 = vadd.f32 %v5200_v9, %v5196_v6  ;;  %v2301_v62 = vmul.f32 %v5200_v9, %v5200_v9 }
 0x2b2   :  { %v2115_v12 = vadd.f32 %v2114_v45, %v2066_v44  ;;  %2240 = vadd.xlane.f32.xlu2 %v2239_v51  ;;  %v2335_v46 = vadd.f32 %v2301_v62, %v2300_v48  ;;  %v5240_v44 = vadd.f32 %v5146_v36, %v5092_v11 }
 0x2b3   :  { %v2116_v35 = vpop.f32.mrf.mxu0 }
 0x2b4   :  { %v2164_v31 = vadd.f32 %v2163_v3, %v2115_v12  ;;  %2336 = vadd.xlane.f32.xlu1 %v2335_v46  ;;  %v5907_v3 = vld [vmem:[#allocation9_spill] sm:$0xff] }
 0x2b5   :  { %v2018_v38 = vpop.f32.mrf.mxu2 }
 0x2b6   :  { %v2019_v8 = vadd.f32 %v2018_v38, %v5905_v26  ;;  %v5214_v40 = vadd.f32 %v5148_v43, %v2164_v31  ;;  %v5249_v38 = vadd.f32 %v5146_v36, %v5097_v15 }
 0x2b7   :  { %v2165_v27 = vpop.f32.mrf.mxu1  ;;  %v2067_v23 = vpop.f32.mrf.mxu3 }
 0x2b8   :  { %v2068_v1 = vadd.f32 %v2067_v23, %v2019_v8  ;;  %v2242_v32 = vadd.f32 %v5214_v40, %v5210_v25  ;;  %v2303_v20 = vmul.f32 %v5214_v40, %v5214_v40 }
 0x2ba   :  { %v2117_v63 = vadd.f32 %v2116_v35, %v2068_v1  ;;  %2243 = vadd.xlane.f32.xlu0 %v2242_v32  ;;  %v2338_v17 = vadd.f32 %v2303_v20, %v2302_v47  ;;  %v2306_v1 = vmul.f32 %v5240_v44, %v5240_v44  ;;  %v2308_v20 = vmul.f32 %v5249_v38, %v5249_v38 }
 0x2bb   :  { %v2119_v59 = vpop.f32.mrf.mxu0 }
 0x2bc   :  { %v2166_v61 = vadd.f32 %v2165_v27, %v2117_v63  ;;  %2339 = vadd.xlane.f32.xlu2 %v2338_v17 }
 0x2bd   :  { %v2021_v41 = vpop.f32.mrf.mxu2 }
 0x2be   :  { %v2022_v54 = vadd.f32 %v2021_v41, %v5906_v55  ;;  %v5229_v21 = vadd.f32 %v5148_v43, %v2166_v61 }
 0x2bf   :  { %v2168_v5 = vpop.f32.mrf.mxu1  ;;  %v2070_v13 = vpop.f32.mrf.mxu3 }
 0x2c0   :  { %v2071_v33 = vadd.f32 %v2070_v13, %v2022_v54  ;;  %v2245_v24 = vadd.f32 %v5229_v21, %v5225_v53  ;;  %v2305_v45 = vmul.f32 %v5229_v21, %v5229_v21  ;;  %v5267_v54 = vadd.f32 %v5146_v36, %v5103_v4 }
 0x2c2   :  { %v2120_v37 = vadd.f32 %v2119_v59, %v2071_v33  ;;  %2246 = vadd.xlane.f32.xlu1 %v2245_v24  ;;  %v2341_v50 = vadd.f32 %v2305_v45, %v2304_v2  ;;  %v5909_v24 = vld [vmem:[#allocation12_spill] sm:$0xff] }
 0x2c3   :  { %v2121_v42 = vpop.f32.mrf.mxu0 }
 0x2c4   :  { %v2169_v29 = vadd.f32 %v2168_v5, %v2120_v37  ;;  %2342 = vadd.xlane.f32.xlu0 %v2341_v50  ;;  %v2310_v50 = vmul.f32 %v5267_v54, %v5267_v54 }
 0x2c5   :  { %v2023_v39 = vpop.f32.mrf.mxu2 }
 0x2c6   :  { %v2024_v10 = vadd.f32 %v2023_v39, %v5907_v3  ;;  %v5243_v51 = vadd.f32 %v5148_v43, %v2169_v29 }
 0x2c7   :  { %v2170_v48 = vpop.f32.mrf.mxu1  ;;  %v2072_v62 = vpop.f32.mrf.mxu3 }
 0x2c8   :  { %v2073_v12 = vadd.f32 %v2072_v62, %v2024_v10  ;;  %v2248_v35 = vadd.f32 %v5243_v51, %v5240_v44  ;;  %v2307_v11 = vmul.f32 %v5243_v51, %v5243_v51  ;;  %v5281_v62 = vadd.f32 %v5146_v36, %v5107_v22 }
 0x2ca   :  { %v2122_v46 = vadd.f32 %v2121_v42, %v2073_v12  ;;  %2249 = vadd.xlane.f32.xlu2 %v2248_v35  ;;  %v2344_v59 = vadd.f32 %v2307_v11, %v2306_v1  ;;  %v5910_v35 = vld [vmem:[#allocation15_spill] sm:$0xff] }
 0x2cb   :  { %v2124_v31 = vpop.f32.mrf.mxu0 }
 0x2cc   :  { %v2171_v26 = vadd.f32 %v2170_v48, %v2122_v46 }
 0x2cd   :  { %v2026_v8 = vpop.f32.mrf.mxu2 }
 0x2ce   :  { %v2027_v27 = vadd.f32 %v2026_v8, %v5908_v30  ;;  %v5255_v23 = vadd.f32 %v5148_v43, %v2171_v26  ;;  %v2312_v30 = vmul.f32 %v5281_v62, %v5281_v62 }
 0x2cf   :  { %v2173_v32 = vpop.f32.mrf.mxu1  ;;  %v2075_v47 = vpop.f32.mrf.mxu3 }
 0x2d0   :  { %v2076_v15 = vadd.f32 %v2075_v47, %v2027_v27  ;;  %v2251_v63 = vadd.f32 %v5255_v23, %v5249_v38  ;;  %v2309_v17 = vmul.f32 %v5255_v23, %v5255_v23 }
 0x2d2   :  { %v2125_v61 = vadd.f32 %v2124_v31, %v2076_v15  ;;  %2252 = vadd.xlane.f32.xlu0 %v2251_v63  ;;  %2345 = vadd.xlane.f32.xlu2 %v2344_v59  ;;  %v2347_v55 = vadd.f32 %v2309_v17, %v2308_v20  ;;  %v5295_v20 = vadd.f32 %v5146_v36, %v5114_v60  ;;  %v5911_v17 = vld [vmem:[#allocation14_spill] sm:$0xff] }
 0x2d3   :  { %v2126_v41 = vpop.f32.mrf.mxu0 }
 0x2d4   :  { %v2174_v5 = vadd.f32 %v2173_v32, %v2125_v61  ;;  %2348 = vadd.xlane.f32.xlu1 %v2347_v55 }
 0x2d5   :  { %v2028_v13 = vpop.f32.mrf.mxu2 }
 0x2d6   :  { %v5270_v33 = vadd.f32 %v5148_v43, %v2174_v5  ;;  %v2029_v2 = vadd.f32 %v2028_v13, %v5909_v24  ;;  %v2314_v13 = vmul.f32 %v5295_v20, %v5295_v20 }
 0x2d7   :  { %v2175_v45 = vpop.f32.mrf.mxu1  ;;  %v2077_v37 = vpop.f32.mrf.mxu3 }
 0x2d8   :  { %v2078_v42 = vadd.f32 %v2077_v37, %v2029_v2  ;;  %v2311_v29 = vmul.f32 %v5270_v33, %v5270_v33  ;;  %v2254_v10 = vadd.f32 %v5270_v33, %v5267_v54 }
 0x2da   :  { %v2127_v39 = vadd.f32 %v2126_v41, %v2078_v42  ;;  %v2350_v3 = vadd.f32 %v2311_v29, %v2310_v50  ;;  %v5309_v42 = vadd.f32 %v5146_v36, %v5118_v34 }
 0x2db   :  { %v2129_v4 = vpop.f32.mrf.mxu0 }
 0x2dc   :  { %v2176_v48 = vadd.f32 %v2175_v45, %v2127_v39  ;;  %2351 = vadd.xlane.f32.xlu0 %v2350_v3  ;;  %2255 = vadd.xlane.f32.xlu1 %v2254_v10 }
 0x2dd   :  { %v2031_v12 = vpop.f32.mrf.mxu2 }
 0x2de   :  { %v2032_v46 = vadd.f32 %v2031_v12, %v5910_v35  ;;  %v5285_v31 = vadd.f32 %v5148_v43, %v2176_v48  ;;  %v2316_v35 = vmul.f32 %v5309_v42, %v5309_v42 }
 0x2df   :  { %v2178_v26 = vpop.f32.mrf.mxu1  ;;  %v2080_v11 = vpop.f32.mrf.mxu3 }
 0x2e0   :  { %v2081_v8 = vadd.f32 %v2080_v11, %v2032_v46  ;;  %v2313_v27 = vmul.f32 %v5285_v31, %v5285_v31  ;;  %v2257_v22 = vadd.f32 %v5285_v31, %v5281_v62 }
 0x2e2   :  { %v2130_v1 = vadd.f32 %v2129_v4, %v2081_v8  ;;  %v2353_v47 = vadd.f32 %v2313_v27, %v2312_v30  ;;  %v5912_v4 = vld [vmem:[#allocation18_spill] sm:$0xff]  ;;  %v5323_v30 = vadd.f32 %v5146_v36, %v5124_v57 }
 0x2e3   :  { %v2131_v32 = vpop.f32.mrf.mxu0 }
 0x2e4   :  { %v2179_v15 = vadd.f32 %v2178_v26, %v2130_v1  ;;  %2258 = vadd.xlane.f32.xlu0 %v2257_v22  ;;  %2354 = vadd.xlane.f32.xlu2 %v2353_v47 }
 0x2e5   :  { %v2033_v63 = vpop.f32.mrf.mxu2 }
 0x2e6   :  { %v5298_v59 = vadd.f32 %v5148_v43, %v2179_v15  ;;  %v2034_v61 = vadd.f32 %v2033_v63, %v5911_v17 }
 0x2e7   :  { %v2180_v41 = vpop.f32.mrf.mxu1  ;;  %v2082_v55 = vpop.f32.mrf.mxu3 }
 0x2e8   :  { %v2083_v5 = vadd.f32 %v2082_v55, %v2034_v61  ;;  %v2315_v24 = vmul.f32 %v5298_v59, %v5298_v59  ;;  %v2260_v45 = vadd.f32 %v5298_v59, %v5295_v20  ;;  %v2318_v61 = vmul.f32 %v5323_v30, %v5323_v30 }
 0x2ea   :  { %v2132_v60 = vadd.f32 %v2131_v32, %v2083_v5  ;;  %v2356_v2 = vadd.f32 %v2315_v24, %v2314_v13  ;;  %v5913_v32 = vld [vmem:[#allocation19_spill] sm:$0xff]  ;;  %v5337_v13 = vadd.f32 %v5146_v36, %v5128_v28 }
 0x2eb   :  { %v2134_v37 = vpop.f32.mrf.mxu0 }
 0x2ec   :  { %v2181_v50 = vadd.f32 %v2180_v41, %v2132_v60  ;;  %2357 = vadd.xlane.f32.xlu1 %v2356_v2  ;;  %2261 = vadd.xlane.f32.xlu2 %v2260_v45 }
 0x2ed   :  { %v2036_v29 = vpop.f32.mrf.mxu2 }
 0x2ee   :  { %v5312_v39 = vadd.f32 %v5148_v43, %v2181_v50  ;;  %v2037_v3 = vadd.f32 %v2036_v29, %v5912_v4  ;;  %v2320_v4 = vmul.f32 %v5337_v13, %v5337_v13 }
 0x2ef   :  { %v2183_v10 = vpop.f32.mrf.mxu1  ;;  %v2085_v48 = vpop.f32.mrf.mxu3 }
 0x2f0   :  { %v2086_v12 = vadd.f32 %v2085_v48, %v2037_v3  ;;  %v2317_v46 = vmul.f32 %v5312_v39, %v5312_v39  ;;  %v2263_v11 = vadd.f32 %v5312_v39, %v5309_v42 }
 0x2f2   :  { %v2135_v34 = vadd.f32 %v2134_v37, %v2086_v12  ;;  %v2359_v26 = vadd.f32 %v2317_v46, %v2316_v35  ;;  %v5351_v35 = vadd.f32 %v5146_v36, %v5134_v58 }
 0x2f3   :  { %v2136_v27 = vpop.f32.mrf.mxu0 }
 0x2f4   :  { %v2184_v8 = vadd.f32 %v2183_v10, %v2135_v34  ;;  %2360 = vadd.xlane.f32.xlu0 %v2359_v26  ;;  %2264 = vadd.xlane.f32.xlu1 %v2263_v11 }
 0x2f5   :  { %v2038_v1 = vpop.f32.mrf.mxu2 }
 0x2f6   :  { %v2039_v22 = vadd.f32 %v2038_v1, %v5913_v32  ;;  %v5327_v47 = vadd.f32 %v5148_v43, %v2184_v8 }
 0x2f7   :  { %v2185_v15 = vpop.f32.mrf.mxu1  ;;  %v2087_v63 = vpop.f32.mrf.mxu3 }
 0x2f8   :  { %v2088_v17 = vadd.f32 %v2087_v63, %v2039_v22  ;;  %v2319_v41 = vmul.f32 %v5327_v47, %v5327_v47  ;;  %v2266_v57 = vadd.f32 %v5327_v47, %v5323_v30 }
 0x2fa   :  { %v2137_v55 = vadd.f32 %v2136_v27, %v2088_v17  ;;  %v2362_v5 = vadd.f32 %v2319_v41, %v2318_v61  ;;  %v2322_v27 = vmul.f32 %v5351_v35, %v5351_v35 }
 0x2fb   :  { %v2139_v37 = vpop.f32.mrf.mxu0 }
 0x2fc   :  { %v2186_v24 = vadd.f32 %v2185_v15, %v2137_v55  ;;  %2267 = vadd.xlane.f32.xlu0 %v2266_v57  ;;  %2363 = vadd.xlane.f32.xlu2 %v2362_v5  ;;  %v5368_v57 = vadd.f32 %v5146_v36, %v5139_v49 }
 0x2fd   :  { %v2041_v60 = vpop.f32.mrf.mxu2 }
 0x2fe   :  { %v5340_v2 = vadd.f32 %v5148_v43, %v2186_v24  ;;  %v2042_v45 = vadd.f32 %v2041_v60, %v4985_v52  ;;  %v2324_v49 = vmul.f32 %v5368_v57, %v5368_v57 }
 0x2ff   :  { %v2090_v50 = vpop.f32.mrf.mxu3  ;;  %v2188_v28 = vpop.f32.mrf.mxu1 }
 0x300   :  { %v2091_v29 = vadd.f32 %v2090_v50, %v2042_v45  ;;  %v2321_v3 = vmul.f32 %v5340_v2, %v5340_v2  ;;  %v2269_v12 = vadd.f32 %v5340_v2, %v5337_v13 }
 0x302   :  { %v2140_v10 = vadd.f32 %v2139_v37, %v2091_v29  ;;  %v2365_v48 = vadd.f32 %v2321_v3, %v2320_v4 }
 0x303   :  { %v2141_v32 = vpop.f32.mrf.mxu0 }
 0x304   :  { %v2189_v52 = vadd.f32 %v2188_v28, %v2140_v10  ;;  %2366 = vadd.xlane.f32.xlu1 %v2365_v48  ;;  %2270 = vadd.xlane.f32.xlu2 %v2269_v12 }
 0x305   :  { %v2043_v46 = vpop.f32.mrf.mxu2 }
 0x306   :  { %v5354_v34 = vadd.f32 %v5148_v43, %v2189_v52  ;;  %v2044_v26 = vadd.f32 %v2043_v46, %v5034_v14 }
 0x307   :  { %v2092_v11 = vpop.f32.mrf.mxu3  ;;  %v2190_v63 = vpop.f32.mrf.mxu1 }
 0x308   :  { %v2093_v8 = vadd.f32 %v2092_v11, %v2044_v26  ;;  %v2323_v1 = vmul.f32 %v5354_v34, %v5354_v34  ;;  %v2272_v15 = vadd.f32 %v5354_v34, %v5351_v35 }
 0x30a   :  { %v2142_v58 = vadd.f32 %v2141_v32, %v2093_v8  ;;  %v2368_v22 = vadd.f32 %v2323_v1, %v2322_v27 }
 0x30c   :  { %v2191_v17 = vadd.f32 %v2190_v63, %v2142_v58  ;;  %2369 = vadd.xlane.f32.xlu2 %v2368_v22  ;;  %2273 = vadd.xlane.f32.xlu1 %v2272_v15 }
 0x30d   :  { %v2232_v61 = vpop.xlane.xlu2 %2231 }
 0x30e   :  { %v2278_v14 = vmul.f32 0.003937008, %v2232_v61  ;;  %v5364_v41 = vadd.f32 %v5148_v43, %v2191_v17 }
 0x30f   :  { %v2328_v55 = vpop.xlane.xlu1 %2327 }
 0x310   :  { %v2374_v5 = vmul.f32 0.003937008, %v2328_v55  ;;  %v2390_v24 = vmul.f32 %v2278_v14, %v2278_v14  ;;  %v2275_v60 = vadd.f32 %v5364_v41, %v5368_v57  ;;  %v2325_v29 = vmul.f32 %v5364_v41, %v5364_v41 }
 0x312   :  { %v2406_v45 = vsub.f32 %v2374_v5, %v2390_v24  ;;  %2276 = vadd.xlane.f32.xlu0 %v2275_v60  ;;  %v2371_v28 = vadd.f32 %v2325_v29, %v2324_v49  ;;  %v2422_v24 = vsub.f32 %v5153_v18, %v2278_v14  ;;  %v2423_v60 = vsub.f32 %v5157_v56, %v2278_v14  ;;  %v3072_v14 = vld [vmem:[%s5736_s6 + $0x3] ss:$8 sm:$0x3] }
 0x314   :  { %v2454_v37 = vadd.f32 1e-05, %v2406_v45 }
 0x315   :  { %v2235_v50 = vpop.xlane.xlu0 %2234 }
 0x316   :  { %3508 = vrsqrt.f32 %v2454_v37  ;;  %v5374_v43 = vmul.f32 0.003937008, %v2235_v50  ;;  %vm2476_vm4 = vweird.f32 %v2454_v37 }
 0x317   :  { %v2331_v4 = vpop.xlane.xlu2 %2330 }
 0x318   :  { %v2391_v36 = vmul.f32 %v5374_v43, %v5374_v43  ;;  %v2375_v3 = vmul.f32 0.003937008, %v2331_v4  ;;  %v3070_v4 = vld [vmem:[%s5736_s6 + $0x1] ss:$8 sm:$0x3] }
 0x31a   :  { %v2407_v10 = vsub.f32 %v2375_v3, %v2391_v36  ;;  %2372 = vadd.xlane.f32.xlu0 %v2371_v28 }
 0x31c   :  { %v3509_v48 = vpop.eup %3508  ;;  %v2455_v12 = vadd.f32 1e-05, %v2407_v10  ;;  %v5399_v10 = vperm.slane %v3070_v4, 0 }
 0x31d   :  { %v2471_v52 = vmul.f32 %v3509_v48, %v2454_v37  ;;  %v2238_v46 = vpop.xlane.xlu1 %2237  ;;  %vm2477_vm3 = vweird.f32 %v3509_v48  ;;  %v3071_v37 = vld [vmem:[%s5736_s6 + $0x2] ss:$8 sm:$0x3] }
 0x31e   :  { %3510 = vrsqrt.f32 %v2455_v12  ;;  %v5380_v26 = vmul.f32 0.003937008, %v2238_v46  ;;  %vm2478_vm5 = vmor %vm2476_vm4, %vm2477_vm3  ;;  %v5408_v46 = vperm.slane %v3071_v37, 1  ;;  %vm2486_vm7 = vweird.f32 %v2455_v12 }
 0x31f   :  { %v2472_v11 = vmul.f32 %v3509_v48, %v2471_v52  ;;  %v2334_v8 = vpop.xlane.xlu0 %2333  ;;  %v5406_v52 = vperm.slane %v3071_v37, 0  ;;  %v5424_v37 = vperm.slane %v3072_v14, 1 }
 0x320   :  { %v2376_v27 = vmul.f32 0.003937008, %v2334_v8  ;;  %v2392_v1 = vmul.f32 %v5380_v26, %v5380_v26 }
 0x321   :  { %v2473_v32 = vmul.f32 0.5, %v2472_v11 }
 0x322   :  { %v2408_v58 = vsub.f32 %v2376_v27, %v2392_v1 }
 0x323   :  { %v2474_v22 = vsub.f32 1.5, %v2473_v32 }
 0x324   :  { %v3511_v15 = vpop.eup %3510  ;;  %v5384_v63 = vadd.f32 1e-05, %v2408_v58 }
 0x325   :  { %v2475_v17 = vmul.f32 %v3509_v48, %v2474_v22  ;;  %v2481_v61 = vmul.f32 %v3511_v15, %v2455_v12  ;;  %v2241_v55 = vpop.xlane.xlu2 %2240  ;;  %vm2487_vm6 = vweird.f32 %v3511_v15 }
 0x326   :  { %3512 = vrsqrt.f32 %v5384_v63  ;;  %v5387_v5 = vmul.f32 0.003937008, %v2241_v55  ;;  %v5416_v55 = vperm.slane %v3072_v14, 0  ;;  %vm2488_vm8 = vmor %vm2486_vm7, %vm2487_vm6  ;;  %vm2496_vm10 = vweird.f32 %v5384_v63 }
 0x327   :  { %v2479_v45 = vsel %vm2478_vm5, %v3509_v48, %v2475_v17  ;;  %v2482_v50 = vmul.f32 %v3511_v15, %v2481_v61  ;;  %v2337_v29 = vpop.xlane.xlu1 %2336  ;;  %v5404_v48 = vperm.slane %v3070_v4, 1 }
 0x328   :  { %v2377_v49 = vmul.f32 0.003937008, %v2337_v29  ;;  %v2393_v36 = vmul.f32 %v5387_v5, %v5387_v5  ;;  %v2630_v28 = vmul.f32 %v2479_v45, %v2422_v24  ;;  %v2631_v18 = vmul.f32 %v2479_v45, %v2423_v60 }
 0x329   :  { %v2483_v3 = vmul.f32 0.5, %v2482_v50  ;;  %v2424_v24 = vsub.f32 %v5167_v19, %v5374_v43 }
 0x32a   :  { %v2409_v56 = vsub.f32 %v2377_v49, %v2393_v36  ;;  %v2667_v8 = vmul.f32 %v5399_v10, %v2630_v28  ;;  %v2668_v32 = vmul.f32 %v5404_v48, %v2631_v18  ;;  %v2425_v49 = vsub.f32 %v5171_v16, %v5374_v43 }
 0x32b   :  { %v2484_v11 = vsub.f32 1.5, %v2483_v3 }
 0x32c   :  { %v3513_v27 = vpop.eup %3512  ;;  %v5411_v1 = vadd.f32 1e-05, %v2409_v56  ;;  %v2704_v61 = vadd.f32 %v5406_v52, %v2667_v8  ;;  %v2705_v12 = vadd.f32 %v5408_v46, %v2668_v32 }
 0x32d   :  { %v2485_v58 = vmul.f32 %v3511_v15, %v2484_v11  ;;  %v2491_v22 = vmul.f32 %v3513_v27, %v5384_v63  ;;  %v2244_v17 = vpop.xlane.xlu0 %2243  ;;  %vm2497_vm9 = vweird.f32 %v3513_v27 }
 0x32e   :  { %3514 = vrsqrt.f32 %v5411_v1  ;;  %v5421_v60 = vmul.f32 0.003937008, %v2244_v17  ;;  %v2736_v4 = vmax.f32 %v2704_v61, 0.0  ;;  %v2737_v28 = vmax.f32 %v2705_v12, 0.0  ;;  %vm2498_vm11 = vmor %vm2496_vm10, %vm2497_vm9 }
 0x32f   :  { %v2489_v45 = vsel %vm2488_vm8, %v3511_v15, %v2485_v58  ;;  %v2492_v50 = vmul.f32 %v3513_v27, %v2491_v22  ;;  %v2340_v29 = vpop.xlane.xlu2 %2339  ;;  %vm2506_vm13 = vweird.f32 %v5411_v1 }
 0x330   :  { %v2394_v36 = vmul.f32 %v5421_v60, %v5421_v60  ;;  %v2378_v19 = vmul.f32 0.003937008, %v2340_v29  ;;  %v2773_v18 = vmul.f32 %v5416_v55, %v2736_v4  ;;  %v2632_v56 = vmul.f32 %v2489_v45, %v2424_v24 }
 0x331   :  { %v2493_v3 = vmul.f32 0.5, %v2492_v50  ;;  %v2633_v8 = vmul.f32 %v2489_v45, %v2425_v49  ;;  %v2774_v32 = vmul.f32 %v5424_v37, %v2737_v28  ;;  %v2426_v50 = vsub.f32 %v5181_v0, %v5380_v26 }
 0x332   :  { %v2410_v11 = vsub.f32 %v2378_v19, %v2394_v36  ;;  %v2669_v14 = vmul.f32 %v5399_v10, %v2632_v56  ;;  %v2427_v36 = vsub.f32 %v5185_v7, %v5380_v26 }
 0x333   :  { %v2494_v15 = vsub.f32 1.5, %v2493_v3  ;;  %v2670_v16 = vmul.f32 %v5404_v48, %v2633_v8  ;;  %v2805_v61 = vadd.f32 %v2774_v32, %v2773_v18 }
 0x334   :  { %v3515_v58 = vpop.eup %3514  ;;  %v5433_v22 = vadd.f32 1e-05, %v2410_v11  ;;  %v2706_v45 = vadd.f32 %v5406_v52, %v2669_v14 }
 0x335   :  { %v2495_v43 = vmul.f32 %v3513_v27, %v2494_v15  ;;  %v2501_v17 = vmul.f32 %v3515_v58, %v5411_v1  ;;  %v2247_v24 = vpop.xlane.xlu1 %2246  ;;  %2806 = vadd.xlane.f32.xlu1 %v2805_v61  ;;  %v2707_v63 = vadd.f32 %v5408_v46, %v2670_v16  ;;  %vm2507_vm12 = vweird.f32 %v3515_v58 }
 0x336   :  { %3516 = vrsqrt.f32 %v5433_v22  ;;  %v5439_v12 = vmul.f32 0.003937008, %v2247_v24  ;;  %v2738_v18 = vmax.f32 %v2706_v45, 0.0  ;;  %vm2508_vm14 = vmor %vm2506_vm13, %vm2507_vm12  ;;  %v2429_v1 = vsub.f32 %v5200_v9, %v5387_v5 }
 0x337   :  { %v2499_v29 = vsel %vm2498_vm11, %v3513_v27, %v2495_v43  ;;  %v2502_v4 = vmul.f32 %v3515_v58, %v2501_v17  ;;  %v2343_v49 = vpop.xlane.xlu0 %2342  ;;  %v2739_v56 = vmax.f32 %v2707_v63, 0.0  ;;  %vm2516_vm0 = vweird.f32 %v5433_v22 }
 0x338   :  { %v2379_v19 = vmul.f32 0.003937008, %v2343_v49  ;;  %v2395_v3 = vmul.f32 %v5439_v12, %v5439_v12  ;;  %v2634_v11 = vmul.f32 %v2499_v29, %v2426_v50  ;;  %v2635_v0 = vmul.f32 %v2499_v29, %v2427_v36 }
 0x339   :  { %v2503_v28 = vmul.f32 0.5, %v2502_v4  ;;  %v2775_v15 = vmul.f32 %v5416_v55, %v2738_v18  ;;  %v2776_v32 = vmul.f32 %v5424_v37, %v2739_v56  ;;  %v2428_v50 = vsub.f32 %v5196_v6, %v5387_v5 }
 0x33a   :  { %v2411_v8 = vsub.f32 %v2379_v19, %v2395_v3  ;;  %v2671_v14 = vmul.f32 %v5399_v10, %v2634_v11  ;;  %v2672_v26 = vmul.f32 %v5404_v48, %v2635_v0  ;;  %v3595_v56 = vmov 0  }
 0x33b   :  { %v2504_v27 = vsub.f32 1.5, %v2503_v28  ;;  %v2808_v61 = vadd.f32 %v2776_v32, %v2775_v15  ;;  %3474 = vset.pattern.permute.xlu1 %v3595_v56  ;;  %3475 = vset.pattern.permute.xlu0 %v3595_v56 }
 0x33c   :  { %v3517_v16 = vpop.eup %3516  ;;  %v5452_v7 = vadd.f32 1e-05, %v2411_v8  ;;  %v2708_v45 = vadd.f32 %v5406_v52, %v2671_v14  ;;  %v2709_v49 = vadd.f32 %v5408_v46, %v2672_v26 }
 0x33d   :  { %v2505_v43 = vmul.f32 %v3515_v58, %v2504_v27  ;;  %v2511_v17 = vmul.f32 %v3517_v16, %v5433_v22  ;;  %v2250_v24 = vpop.xlane.xlu2 %2249  ;;  %2809 = vadd.xlane.f32.xlu2 %v2808_v61  ;;  %vm2517_vm15 = vweird.f32 %v3517_v16 }
 0x33e   :  { %3518 = vrsqrt.f32 %v5452_v7  ;;  %v5465_v63 = vmul.f32 0.003937008, %v2250_v24  ;;  %v2740_v36 = vmax.f32 %v2708_v45, 0.0  ;;  %v2741_v3 = vmax.f32 %v2709_v49, 0.0  ;;  %vm2518_vm1 = vmor %vm2516_vm0, %vm2517_vm15 }
 0x33f   :  { %v2509_v29 = vsel %vm2508_vm14, %v3515_v58, %v2505_v43  ;;  %v2512_v4 = vmul.f32 %v3517_v16, %v2511_v17  ;;  %vm2526_vm3 = vweird.f32 %v5452_v7 }
 0x340   :  { %v2636_v28 = vmul.f32 %v2509_v29, %v2428_v50  ;;  %v2777_v18 = vmul.f32 %v5416_v55, %v2740_v36  ;;  %v2637_v11 = vmul.f32 %v2509_v29, %v2429_v1  ;;  %v2778_v58 = vmul.f32 %v5424_v37, %v2741_v3 }
 0x341   :  { %v2513_v19 = vmul.f32 0.5, %v2512_v4  ;;  %v2396_v14 = vmul.f32 %v5465_v63, %v5465_v63  ;;  %v2430_v29 = vsub.f32 %v5210_v25, %v5421_v60  ;;  %v2431_v4 = vsub.f32 %v5214_v40, %v5421_v60 }
 0x342   :  { %v2673_v8 = vmul.f32 %v5399_v10, %v2636_v28  ;;  %v2674_v9 = vmul.f32 %v5404_v48, %v2637_v11  ;;  %v2811_v15 = vadd.f32 %v2778_v58, %v2777_v18 }
 0x343   :  { %v2514_v6 = vsub.f32 1.5, %v2513_v19 }
 0x344   :  { %v3519_v0 = vpop.eup %3518  ;;  %v2710_v61 = vadd.f32 %v5406_v52, %v2673_v8  ;;  %v2711_v24 = vadd.f32 %v5408_v46, %v2674_v9  ;;  %2812 = vadd.xlane.f32.xlu0 %v2811_v15 }
 0x345   :  { %v2515_v5 = vmul.f32 %v3517_v16, %v2514_v6  ;;  %v2521_v27 = vmul.f32 %v3519_v0, %v5452_v7  ;;  %v2253_v32 = vpop.xlane.xlu0 %2252  ;;  %v2346_v26 = vpop.xlane.xlu2 %2345  ;;  %vm2527_vm2 = vweird.f32 %v3519_v0 }
 0x346   :  { %v5475_v43 = vmul.f32 0.003937008, %v2253_v32  ;;  %v2380_v17 = vmul.f32 0.003937008, %v2346_v26  ;;  %v2742_v3 = vmax.f32 %v2710_v61, 0.0  ;;  %v2743_v28 = vmax.f32 %v2711_v24, 0.0  ;;  %vm2528_vm4 = vmor %vm2526_vm3, %vm2527_vm2 }
 0x347   :  { %v2519_v22 = vsel %vm2518_vm1, %v3517_v16, %v2515_v5  ;;  %v2522_v45 = vmul.f32 %v3519_v0, %v2521_v27  ;;  %v2349_v50 = vpop.xlane.xlu1 %2348  ;;  %v1208_v27 = vld [vmem:[%s5736_s6 + $0x4] ss:$0 sm:$0xff]  ;;  %v2433_v26 = vsub.f32 %v5229_v21, %v5439_v12  ;;  %s3596_s6 = smov [#allocation5]  }
 0x348   :  { %v2412_v49 = vsub.f32 %v2380_v17, %v2396_v14  ;;  %v2397_v1 = vmul.f32 %v5475_v43, %v5475_v43  ;;  %v2381_v19 = vmul.f32 0.003937008, %v2349_v50  ;;  %v2638_v16 = vmul.f32 %v2519_v22, %v2430_v29  ;;  %s2960_s10 = sshll.u32 %s3596_s6, 4  ;;  %s2961_s10 = int_to_ptr.vmem [resolvable:$true] %s2960_s10 }
 0x349   :  { %v2523_v36 = vmul.f32 0.5, %v2522_v45  ;;  %v2639_v56 = vmul.f32 %v2519_v22, %v2431_v4  ;;  %v2779_v25 = vmul.f32 %v5416_v55, %v2742_v3  ;;  %v2780_v58 = vmul.f32 %v5424_v37, %v2743_v28 }
 0x34a   :  { %v5485_v18 = vadd.f32 1e-05, %v2412_v49  ;;  %v2413_v6 = vsub.f32 %v2381_v19, %v2397_v1  ;;  %v2675_v40 = vmul.f32 %v5399_v10, %v2638_v16  ;;  %v2432_v14 = vsub.f32 %v5225_v53, %v5439_v12 }
 0x34b   :  { %v2524_v11 = vsub.f32 1.5, %v2523_v36  ;;  %v2676_v60 = vmul.f32 %v5404_v48, %v2639_v56  ;;  %v2814_v5 = vadd.f32 %v2780_v58, %v2779_v25 }
 0x34c   :  { %3520 = vrsqrt.f32 %v5485_v18  ;;  %v5493_v9 = vadd.f32 1e-05, %v2413_v6  ;;  %v2712_v15 = vadd.f32 %v5406_v52, %v2675_v40  ;;  %vm2536_vm7 = vweird.f32 %v5485_v18 }
 0x34d   :  { %v2525_v8 = vmul.f32 %v3519_v0, %v2524_v11  ;;  %v2713_v32 = vadd.f32 %v5408_v46, %v2676_v60  ;;  %2815 = vadd.xlane.f32.xlu2 %v2814_v5 }
 0x34e   :  { %3522 = vrsqrt.f32 %v5493_v9  ;;  %2855 = vperm.xlu1 %3474, %v1208_v27   ;;  %v2744_v22 = vmax.f32 %v2712_v15, 0.0  ;;  %vm2546_vm9 = vweird.f32 %v5493_v9 }
 0x34f   :  { %v2529_v7 = vsel %vm2528_vm4, %v3519_v0, %v2525_v8  ;;  %v2352_v17 = vpop.xlane.xlu0 %2351  ;;  %v2256_v61 = vpop.xlane.xlu1 %2255  ;;  %v2745_v45 = vmax.f32 %v2713_v32, 0.0 }
 0x350   :  { %v5506_v24 = vmul.f32 0.003937008, %v2256_v61  ;;  %v2640_v50 = vmul.f32 %v2529_v7, %v2432_v14  ;;  %v2641_v29 = vmul.f32 %v2529_v7, %v2433_v26  ;;  %v2382_v49 = vmul.f32 0.003937008, %v2352_v17 }
 0x351   :  { %v2781_v21 = vmul.f32 %v5416_v55, %v2744_v22  ;;  %v2782_v0 = vmul.f32 %v5424_v37, %v2745_v45 }
 0x352   :  { %v3521_v4 = vpop.eup %3520  ;;  %v2398_v53 = vmul.f32 %v5506_v24, %v5506_v24  ;;  %v2677_v1 = vmul.f32 %v5399_v10, %v2640_v50  ;;  %v2678_v19 = vmul.f32 %v5404_v48, %v2641_v29 }
 0x353   :  { %v2531_v12 = vmul.f32 %v3521_v4, %v5485_v18  ;;  %v2817_v16 = vadd.f32 %v2782_v0, %v2781_v21  ;;  %vm2537_vm5 = vweird.f32 %v3521_v4  ;;  %v2435_v0 = vsub.f32 %v5243_v51, %v5465_v63 }
 0x354   :  { %v2414_v36 = vsub.f32 %v2382_v49, %v2398_v53  ;;  %v3523_v3 = vpop.eup %3522  ;;  %v2714_v56 = vadd.f32 %v5406_v52, %v2677_v1  ;;  %v2715_v25 = vadd.f32 %v5408_v46, %v2678_v19  ;;  %vm2538_vm8 = vmor %vm2536_vm7, %vm2537_vm5 }
 0x355   :  { %v2532_v28 = vmul.f32 %v3521_v4, %v2531_v12  ;;  %v2541_v11 = vmul.f32 %v3523_v3, %v5493_v9  ;;  %2818 = vadd.xlane.f32.xlu0 %v2817_v16  ;;  %vm2547_vm6 = vweird.f32 %v3523_v3  ;;  %v2434_v12 = vsub.f32 %v5240_v44, %v5465_v63 }
 0x356   :  { %v5517_v6 = vadd.f32 1e-05, %v2414_v36  ;;  %v2746_v8 = vmax.f32 %v2714_v56, 0.0  ;;  %v2747_v32 = vmax.f32 %v2715_v25, 0.0  ;;  %vm2548_vm10 = vmor %vm2546_vm9, %vm2547_vm6  ;;  %v2437_v9 = vsub.f32 %v5255_v23, %v5475_v43 }
 0x357   :  { %v2533_v58 = vmul.f32 0.5, %v2532_v28  ;;  %v2259_v40 = vpop.xlane.xlu0 %2258  ;;  %v2355_v60 = vpop.xlane.xlu2 %2354  ;;  %v2542_v5 = vmul.f32 %v3523_v3, %v2541_v11  ;;  %v2436_v28 = vsub.f32 %v5249_v38, %v5475_v43 }
 0x358   :  { %3524 = vrsqrt.f32 %v5517_v6  ;;  %v5521_v27 = vmul.f32 0.003937008, %v2259_v40  ;;  %v2783_v14 = vmul.f32 %v5416_v55, %v2746_v8  ;;  %v2383_v17 = vmul.f32 0.003937008, %v2355_v60 }
 0x359   :  { %v2534_v15 = vsub.f32 1.5, %v2533_v58  ;;  %v2543_v26 = vmul.f32 0.5, %v2542_v5  ;;  %v2784_v22 = vmul.f32 %v5424_v37, %v2747_v32  ;;  %v2439_v32 = vsub.f32 %v5270_v33, %v5506_v24 }
 0x35a   :  { %v2399_v7 = vmul.f32 %v5521_v27, %v5521_v27  ;;  %vm2556_vm12 = vweird.f32 %v5517_v6 }
 0x35b   :  { %v2535_v61 = vmul.f32 %v3521_v4, %v2534_v15  ;;  %v2544_v45 = vsub.f32 1.5, %v2543_v26  ;;  %v2820_v29 = vadd.f32 %v2784_v22, %v2783_v14 }
 0x35c   :  { %v2415_v50 = vsub.f32 %v2383_v17, %v2399_v7 }
 0x35d   :  { %v2545_v53 = vmul.f32 %v3523_v3, %v2544_v45  ;;  %v2539_v1 = vsel %vm2538_vm8, %v3521_v4, %v2535_v61  ;;  %2821 = vadd.xlane.f32.xlu2 %v2820_v29 }
 0x35e   :  { %v3525_v49 = vpop.eup %3524  ;;  %v5529_v21 = vadd.f32 1e-05, %v2415_v50  ;;  %v2642_v51 = vmul.f32 %v2539_v1, %v2434_v12  ;;  %v2643_v63 = vmul.f32 %v2539_v1, %v2435_v0 }
 0x35f   :  { %v2551_v36 = vmul.f32 %v3525_v49, %v5517_v6  ;;  %v2358_v18 = vpop.xlane.xlu1 %2357  ;;  %v2262_v19 = vpop.xlane.xlu2 %2261  ;;  %v2549_v16 = vsel %vm2548_vm10, %v3523_v3, %v2545_v53  ;;  %v2438_v3 = vsub.f32 %v5267_v54, %v5506_v24  ;;  %vm2557_vm11 = vweird.f32 %v3525_v49 }
 0x360   :  { %3526 = vrsqrt.f32 %v5529_v21  ;;  %v5541_v56 = vmul.f32 0.003937008, %v2262_v19  ;;  %v2644_v4 = vmul.f32 %v2549_v16, %v2436_v28  ;;  %v2645_v11 = vmul.f32 %v2549_v16, %v2437_v9  ;;  %vm2558_vm13 = vmor %vm2556_vm12, %vm2557_vm11 }
 0x361   :  { %v2552_v44 = vmul.f32 %v3525_v49, %v2551_v36  ;;  %v2384_v58 = vmul.f32 0.003937008, %v2358_v18  ;;  %v2679_v38 = vmul.f32 %v5399_v10, %v2642_v51  ;;  %v2680_v60 = vmul.f32 %v5404_v48, %v2643_v63 }
 0x362   :  { %v2400_v40 = vmul.f32 %v5541_v56, %v5541_v56  ;;  %v2681_v23 = vmul.f32 %v5399_v10, %v2644_v4  ;;  %v2682_v43 = vmul.f32 %v5404_v48, %v2645_v11  ;;  %vm2566_vm15 = vweird.f32 %v5529_v21 }
 0x363   :  { %v2553_v25 = vmul.f32 0.5, %v2552_v44  ;;  %v2716_v14 = vadd.f32 %v5406_v52, %v2679_v38  ;;  %v2717_v26 = vadd.f32 %v5408_v46, %v2680_v60 }
 0x364   :  { %v2416_v5 = vsub.f32 %v2384_v58, %v2400_v40  ;;  %v2718_v45 = vadd.f32 %v5406_v52, %v2681_v23  ;;  %v2719_v24 = vadd.f32 %v5408_v46, %v2682_v43 }
 0x365   :  { %v2554_v8 = vsub.f32 1.5, %v2553_v25  ;;  %v2748_v29 = vmax.f32 %v2716_v14, 0.0  ;;  %v2749_v33 = vmax.f32 %v2717_v26, 0.0 }
 0x366   :  { %v3527_v15 = vpop.eup %3526  ;;  %v5557_v61 = vadd.f32 1e-05, %v2416_v5  ;;  %v2750_v16 = vmax.f32 %v2718_v45, 0.0  ;;  %v2751_v44 = vmax.f32 %v2719_v24, 0.0 }
 0x367   :  { %v2555_v7 = vmul.f32 %v3525_v49, %v2554_v8  ;;  %v2561_v17 = vmul.f32 %v3527_v15, %v5529_v21  ;;  %v2361_v22 = vpop.xlane.xlu0 %2360  ;;  %v2265_v54 = vpop.xlane.xlu1 %2264  ;;  %v2785_v19 = vmul.f32 %v5416_v55, %v2748_v29  ;;  %v2786_v28 = vmul.f32 %v5424_v37, %v2749_v33 }
 0x368   :  { %v5560_v50 = vmul.f32 0.003937008, %v2265_v54  ;;  %3528 = vrsqrt.f32 %v5557_v61  ;;  %v2385_v1 = vmul.f32 0.003937008, %v2361_v22  ;;  %vm2567_vm14 = vweird.f32 %v3527_v15 }
 0x369   :  { %v2559_v6 = vsel %vm2558_vm13, %v3525_v49, %v2555_v7  ;;  %v2562_v53 = vmul.f32 %v3527_v15, %v2561_v17  ;;  %v2823_v63 = vadd.f32 %v2786_v28, %v2785_v19  ;;  %v2787_v25 = vmul.f32 %v5416_v55, %v2750_v16  ;;  %vm2568_vm0 = vmor %vm2566_vm15, %vm2567_vm14 }
 0x36a   :  { %v2646_v12 = vmul.f32 %v2559_v6, %v2438_v3  ;;  %v2647_v0 = vmul.f32 %v2559_v6, %v2439_v32  ;;  %v2401_v36 = vmul.f32 %v5560_v50, %v5560_v50  ;;  %v2788_v58 = vmul.f32 %v5424_v37, %v2751_v44 }
 0x36b   :  { %v2563_v18 = vmul.f32 0.5, %v2562_v53  ;;  %2824 = vadd.xlane.f32.xlu0 %v2823_v63  ;;  %v2440_v8 = vsub.f32 %v5281_v62, %v5521_v27  ;;  %v2441_v32 = vsub.f32 %v5285_v31, %v5521_v27  ;;  %vm2576_vm2 = vweird.f32 %v5557_v61 }
 0x36c   :  { %v2417_v9 = vsub.f32 %v2385_v1, %v2401_v36  ;;  %v2683_v51 = vmul.f32 %v5399_v10, %v2646_v12  ;;  %v2684_v4 = vmul.f32 %v5404_v48, %v2647_v0  ;;  %v2826_v26 = vadd.f32 %v2788_v58, %v2787_v25 }
 0x36d   :  { %v2564_v49 = vsub.f32 1.5, %v2563_v18  ;;  %v2442_v36 = vsub.f32 %v5295_v20, %v5541_v56  ;;  %v2443_v63 = vsub.f32 %v5298_v59, %v5541_v56 }
 0x36e   :  { %v5570_v11 = vadd.f32 1e-05, %v2417_v9  ;;  %v2720_v40 = vadd.f32 %v5406_v52, %v2683_v51  ;;  %v3529_v38 = vpop.eup %3528  ;;  %v2721_v3 = vadd.f32 %v5408_v46, %v2684_v4  ;;  %2827 = vadd.xlane.f32.xlu2 %v2826_v26 }
 0x36f   :  { %v2565_v60 = vmul.f32 %v3527_v15, %v2564_v49  ;;  %v2268_v23 = vpop.xlane.xlu0 %2267  ;;  %v2364_v43 = vpop.xlane.xlu2 %2363  ;;  %v2571_v5 = vmul.f32 %v3529_v38, %v5557_v61  ;;  %vm2577_vm1 = vweird.f32 %v3529_v38 }
 0x370   :  { %3530 = vrsqrt.f32 %v5570_v11  ;;  %v5584_v21 = vmul.f32 0.003937008, %v2268_v23  ;;  %v2752_v17 = vmax.f32 %v2720_v40, 0.0  ;;  %v2753_v22 = vmax.f32 %v2721_v3, 0.0  ;;  %vm2578_vm3 = vmor %vm2576_vm2, %vm2577_vm1 }
 0x371   :  { %v2569_v14 = vsel %vm2568_vm0, %v3527_v15, %v2565_v60  ;;  %v2572_v7 = vmul.f32 %v3529_v38, %v2571_v5  ;;  %v2386_v45 = vmul.f32 0.003937008, %v2364_v43  ;;  %vm2586_vm5 = vweird.f32 %v5570_v11 }
 0x372   :  { %v2648_v54 = vmul.f32 %v2569_v14, %v2440_v8  ;;  %v2402_v62 = vmul.f32 %v5584_v21, %v5584_v21  ;;  %v2649_v29 = vmul.f32 %v2569_v14, %v2441_v32  ;;  %v2789_v24 = vmul.f32 %v5416_v55, %v2752_v17 }
 0x373   :  { %v2573_v33 = vmul.f32 0.5, %v2572_v7  ;;  %v2790_v6 = vmul.f32 %v5424_v37, %v2753_v22 }
 0x374   :  { %v2685_v31 = vmul.f32 %v5399_v10, %v2648_v54  ;;  %v2418_v27 = vsub.f32 %v2386_v45, %v2402_v62  ;;  %v2686_v15 = vmul.f32 %v5404_v48, %v2649_v29  ;;  %v2444_v54 = vsub.f32 %v5309_v42, %v5560_v50 }
 0x375   :  { %v2574_v12 = vsub.f32 1.5, %v2573_v33  ;;  %v2829_v0 = vadd.f32 %v2790_v6, %v2789_v24  ;;  %v2445_v62 = vsub.f32 %v5312_v39, %v5560_v50 }
 0x376   :  { %v3531_v53 = vpop.eup %3530  ;;  %v2722_v1 = vadd.f32 %v5406_v52, %v2685_v31  ;;  %v5596_v19 = vadd.f32 1e-05, %v2418_v27  ;;  %v2723_v16 = vadd.f32 %v5408_v46, %v2686_v15 }
 0x377   :  { %v2581_v18 = vmul.f32 %v3531_v53, %v5570_v11  ;;  %v2367_v28 = vpop.xlane.xlu1 %2366  ;;  %v2271_v9 = vpop.xlane.xlu2 %2270  ;;  %v2575_v44 = vmul.f32 %v3529_v38, %v2574_v12  ;;  %2830 = vadd.xlane.f32.xlu0 %v2829_v0  ;;  %vm2587_vm4 = vweird.f32 %v3531_v53 }
 0x378   :  { %v5600_v51 = vmul.f32 0.003937008, %v2271_v9  ;;  %v2754_v49 = vmax.f32 %v2722_v1, 0.0  ;;  %3532 = vrsqrt.f32 %v5596_v19  ;;  %v2755_v4 = vmax.f32 %v2723_v16, 0.0  ;;  %vm2588_vm6 = vmor %vm2586_vm5, %vm2587_vm4 }
 0x379   :  { %v2582_v20 = vmul.f32 %v3531_v53, %v2581_v18  ;;  %v2579_v25 = vsel %vm2578_vm3, %v3529_v38, %v2575_v44  ;;  %v2387_v58 = vmul.f32 0.003937008, %v2367_v28  ;;  %vm2596_vm8 = vweird.f32 %v5596_v19 }
 0x37a   :  { %v2403_v40 = vmul.f32 %v5600_v51, %v5600_v51  ;;  %v2650_v60 = vmul.f32 %v2579_v25, %v2442_v36  ;;  %v2651_v61 = vmul.f32 %v2579_v25, %v2443_v63  ;;  %v2791_v43 = vmul.f32 %v5416_v55, %v2754_v49 }
 0x37b   :  { %v2583_v23 = vmul.f32 0.5, %v2582_v20  ;;  %v2792_v8 = vmul.f32 %v5424_v37, %v2755_v4  ;;  %v2446_v25 = vsub.f32 %v5323_v30, %v5584_v21  ;;  %vm2895_vm3 = vcmask 130112  }
 0x37c   :  { %v2419_v3 = vsub.f32 %v2387_v58, %v2403_v40  ;;  %v2687_v56 = vmul.f32 %v5399_v10, %v2650_v60  ;;  %v2688_v5 = vmul.f32 %v5404_v48, %v2651_v61  ;;  %v2447_v58 = vsub.f32 %v5327_v47, %v5584_v21 }
 0x37d   :  { %v2584_v59 = vsub.f32 1.5, %v2583_v23  ;;  %v2832_v38 = vadd.f32 %v2792_v8, %v2791_v43  ;;  %vm2899_vm4 = vcmask 195712   ;;  %vm2903_vm5 = vcmask 261312  }
 0x37e   :  { %v5612_v32 = vadd.f32 1e-05, %v2419_v3  ;;  %v3533_v14 = vpop.eup %3532  ;;  %v2724_v17 = vadd.f32 %v5406_v52, %v2687_v56  ;;  %v2725_v22 = vadd.f32 %v5408_v46, %v2688_v5 }
 0x37f   :  { %v2585_v26 = vmul.f32 %v3531_v53, %v2584_v59  ;;  %v2274_v7 = vpop.xlane.xlu1 %2273  ;;  %v2591_v45 = vmul.f32 %v3533_v14, %v5596_v19  ;;  %2833 = vadd.xlane.f32.xlu2 %v2832_v38  ;;  %v2370_v29 = vpop.xlane.xlu2 %2369  ;;  %vm2597_vm7 = vweird.f32 %v3533_v14 }
 0x380   :  { %3534 = vrsqrt.f32 %v5612_v32  ;;  %v5623_v11 = vmul.f32 0.003937008, %v2274_v7  ;;  %v2756_v24 = vmax.f32 %v2724_v17, 0.0  ;;  %v2757_v15 = vmax.f32 %v2725_v22, 0.0  ;;  %vm2598_vm9 = vmor %vm2596_vm8, %vm2597_vm7 }
 0x381   :  { %v2589_v33 = vsel %vm2588_vm6, %v3531_v53, %v2585_v26  ;;  %v2592_v27 = vmul.f32 %v3533_v14, %v2591_v45  ;;  %v2388_v12 = vmul.f32 0.003937008, %v2370_v29  ;;  %vm2606_vm11 = vweird.f32 %v5612_v32 }
 0x382   :  { %v2652_v6 = vmul.f32 %v2589_v33, %v2444_v54  ;;  %v2653_v31 = vmul.f32 %v2589_v33, %v2445_v62  ;;  %v2404_v42 = vmul.f32 %v5623_v11, %v5623_v11  ;;  %v2793_v39 = vmul.f32 %v5416_v55, %v2756_v24 }
 0x383   :  { %v2593_v50 = vmul.f32 0.5, %v2592_v27  ;;  %v2794_v0 = vmul.f32 %v5424_v37, %v2757_v15  ;;  %v2448_v54 = vsub.f32 %v5337_v13, %v5600_v51  ;;  %v2449_v62 = vsub.f32 %v5340_v2, %v5600_v51 }
 0x384   :  { %v2420_v1 = vsub.f32 %v2388_v12, %v2404_v42  ;;  %v2689_v9 = vmul.f32 %v5399_v10, %v2652_v6  ;;  %v2690_v16 = vmul.f32 %v5404_v48, %v2653_v31  ;;  %vm2907_vm6 = vcmask 326912  }
 0x385   :  { %v2594_v53 = vsub.f32 1.5, %v2593_v50  ;;  %v2277_v18 = vpop.xlane.xlu0 %2276  ;;  %v2835_v28 = vadd.f32 %v2794_v0, %v2793_v39  ;;  %vm2911_vm7 = vcmask 392512   ;;  %vm2915_vm8 = vcmask 458112  }
 0x386   :  { %v3535_v36 = vpop.eup %3534  ;;  %v5632_v49 = vadd.f32 1e-05, %v2420_v1  ;;  %v2726_v20 = vadd.f32 %v5406_v52, %v2689_v9  ;;  %v2727_v4 = vadd.f32 %v5408_v46, %v2690_v16  ;;  %v5643_v61 = vmul.f32 0.003937008, %v2277_v18 }
 0x387   :  { %v2601_v44 = vmul.f32 %v3535_v36, %v5612_v32  ;;  %v2595_v63 = vmul.f32 %v3533_v14, %v2594_v53  ;;  %2836 = vadd.xlane.f32.xlu1 %v2835_v28  ;;  %vm2607_vm10 = vweird.f32 %v3535_v36  ;;  %v2450_v9 = vsub.f32 %v5351_v35, %v5623_v11 }
 0x388   :  { %3536 = vrsqrt.f32 %v5632_v49  ;;  %v2758_v19 = vmax.f32 %v2726_v20, 0.0  ;;  %v2759_v43 = vmax.f32 %v2727_v4, 0.0  ;;  %v2405_v5 = vmul.f32 %v5643_v61, %v5643_v61  ;;  %vm2608_vm12 = vmor %vm2606_vm11, %vm2607_vm10 }
 0x389   :  { %v2602_v40 = vmul.f32 %v3535_v36, %v2601_v44  ;;  %v2599_v60 = vsel %vm2598_vm9, %v3533_v14, %v2595_v63  ;;  %vm2616_vm14 = vweird.f32 %v5632_v49  ;;  %v2451_v16 = vsub.f32 %v5354_v34, %v5623_v11 }
 0x38a   :  { %v2654_v3 = vmul.f32 %v2599_v60, %v2446_v25  ;;  %v2655_v8 = vmul.f32 %v2599_v60, %v2447_v58  ;;  %v2795_v59 = vmul.f32 %v5416_v55, %v2758_v19  ;;  %v2796_v56 = vmul.f32 %v5424_v37, %v2759_v43 }
 0x38b   :  { %v2603_v23 = vmul.f32 0.5, %v2602_v40  ;;  %vm2919_vm9 = vcmask 523712   ;;  %vm2923_vm10 = vcmask 589312   ;;  %vm2927_vm11 = vcmask 654912  }
 0x38c   :  { %v2691_v47 = vmul.f32 %v5399_v10, %v2654_v3  ;;  %v2692_v21 = vmul.f32 %v5404_v48, %v2655_v8  ;;  %v2838_v17 = vadd.f32 %v2796_v56, %v2795_v59 }
 0x38d   :  { %v2604_v30 = vsub.f32 1.5, %v2603_v23  ;;  %v2373_v38 = vpop.xlane.xlu0 %2372 }
 0x38e   :  { %v3537_v14 = vpop.eup %3536  ;;  %v2389_v7 = vmul.f32 0.003937008, %v2373_v38  ;;  %v2728_v22 = vadd.f32 %v5406_v52, %v2691_v47  ;;  %v2729_v45 = vadd.f32 %v5408_v46, %v2692_v21  ;;  %2839 = vadd.xlane.f32.xlu0 %v2838_v17  ;;  %v2452_v47 = vsub.f32 %v5368_v57, %v5643_v61 }
 0x38f   :  { %v2605_v26 = vmul.f32 %v3535_v36, %v2604_v30  ;;  %v2611_v32 = vmul.f32 %v3537_v14, %v5632_v49  ;;  %vm2617_vm13 = vweird.f32 %v3537_v14  ;;  %v2453_v21 = vsub.f32 %v5364_v41, %v5643_v61 }
 0x390   :  { %v2421_v33 = vsub.f32 %v2389_v7, %v2405_v5  ;;  %v2760_v24 = vmax.f32 %v2728_v22, 0.0  ;;  %v2761_v15 = vmax.f32 %v2729_v45, 0.0  ;;  %vm2618_vm15 = vmor %vm2616_vm14, %vm2617_vm13  ;;  %vm2935_vm13 = vcmask 786112  }
 0x391   :  { %v2609_v29 = vsel %vm2608_vm12, %v3535_v36, %v2605_v26  ;;  %v2612_v27 = vmul.f32 %v3537_v14, %v2611_v32  ;;  %vm2931_vm12 = vcmask 720512   ;;  %vm2939_vm14 = vcmask 851712  }
 0x392   :  { %v2656_v6 = vmul.f32 %v2609_v29, %v2448_v54  ;;  %v2657_v31 = vmul.f32 %v2609_v29, %v2449_v62  ;;  %v2469_v12 = vadd.f32 1e-05, %v2421_v33  ;;  %v2797_v13 = vmul.f32 %v5416_v55, %v2760_v24 }
 0x393   :  { %v2613_v42 = vmul.f32 0.5, %v2612_v27  ;;  %v2798_v2 = vmul.f32 %v5424_v37, %v2761_v15 }
 0x394   :  { %v2693_v51 = vmul.f32 %v5399_v10, %v2656_v6  ;;  %v2694_v39 = vmul.f32 %v5404_v48, %v2657_v31  ;;  %3538 = vrsqrt.f32 %v2469_v12  ;;  %vm2626_vm1 = vweird.f32 %v2469_v12 }
 0x395   :  { %v2614_v50 = vsub.f32 1.5, %v2613_v42  ;;  %v2841_v0 = vadd.f32 %v2798_v2, %v2797_v13 }
 0x396   :  { %v2730_v1 = vadd.f32 %v5406_v52, %v2693_v51  ;;  %v2731_v36 = vadd.f32 %v5408_v46, %v2694_v39 }
 0x397   :  { %v2615_v53 = vmul.f32 %v3537_v14, %v2614_v50  ;;  %2842 = vadd.xlane.f32.xlu2 %v2841_v0 }
 0x398   :  { %v2762_v18 = vmax.f32 %v2730_v1, 0.0  ;;  %v2763_v28 = vmax.f32 %v2731_v36, 0.0 }
 0x399   :  { %v2619_v44 = vsel %vm2618_vm15, %v3537_v14, %v2615_v53  ;;  %vm2943_vm15 = vcmask 917312  }
 0x39a   :  { %v2799_v63 = vmul.f32 %v5416_v55, %v2762_v18  ;;  %v2800_v20 = vmul.f32 %v5424_v37, %v2763_v28  ;;  %v3539_v4 = vpop.eup %3538  ;;  %v2658_v25 = vmul.f32 %v2619_v44, %v2450_v9  ;;  %v2659_v58 = vmul.f32 %v2619_v44, %v2451_v16 }
 0x39b   :  { %v2621_v40 = vmul.f32 %v3539_v4, %v2469_v12  ;;  %vm2627_vm0 = vweird.f32 %v3539_v4 }
 0x39c   :  { %v2844_v49 = vadd.f32 %v2800_v20, %v2799_v63  ;;  %v2695_v60 = vmul.f32 %v5399_v10, %v2658_v25  ;;  %v2696_v19 = vmul.f32 %v5404_v48, %v2659_v58  ;;  %vm2628_vm2 = vmor %vm2626_vm1, %vm2627_vm0  ;;  %vm2947_vm0 = vcmask 982912  }
 0x39d   :  { %v2622_v23 = vmul.f32 %v3539_v4, %v2621_v40  ;;  %vm2951_vm1 = vcmask 1048512  }
 0x39e   :  { %2845 = vadd.xlane.f32.xlu0 %v2844_v49  ;;  %v2732_v35 = vadd.f32 %v5406_v52, %v2695_v60  ;;  %v2733_v34 = vadd.f32 %v5408_v46, %v2696_v19 }
 0x39f   :  { %v2623_v11 = vmul.f32 0.5, %v2622_v23 }
 0x3a0   :  { %v2764_v43 = vmax.f32 %v2732_v35, 0.0  ;;  %v2765_v3 = vmax.f32 %v2733_v34, 0.0 }
 0x3a1   :  { %v2624_v8 = vsub.f32 1.5, %v2623_v11 }
 0x3a2   :  { %v2801_v59 = vmul.f32 %v5416_v55, %v2764_v43  ;;  %v2802_v30 = vmul.f32 %v5424_v37, %v2765_v3 }
 0x3a3   :  { %v2625_v56 = vmul.f32 %v3539_v4, %v2624_v8 }
 0x3a4   :  { %v2847_v5 = vadd.f32 %v2802_v30, %v2801_v59 }
 0x3a5   :  { %v2629_v38 = vsel %vm2628_vm2, %v3539_v4, %v2625_v56 }
 0x3a6   :  { %2848 = vadd.xlane.f32.xlu2 %v2847_v5  ;;  %v2660_v14 = vmul.f32 %v2629_v38, %v2452_v47  ;;  %v2661_v26 = vmul.f32 %v2629_v38, %v2453_v21 }
 0x3a8   :  { %v2697_v7 = vmul.f32 %v5399_v10, %v2660_v14  ;;  %v2698_v17 = vmul.f32 %v5404_v48, %v2661_v26  ;;  %v2807_v10 = vpop.xlane.xlu1 %2806  ;;  %v2890_v48 = vlaneseq }
 0x3aa   :  { %v2734_v22 = vadd.f32 %v5406_v52, %v2697_v7  ;;  %v2735_v54 = vadd.f32 %v5408_v46, %v2698_v17  ;;  %v5689_v52 = vand.u32 127, %v2890_v48 }
 0x3ac   :  { %v2766_v62 = vmax.f32 %v2734_v22, 0.0  ;;  %v2767_v32 = vmax.f32 %v2735_v54, 0.0  ;;  %v2897_v42 = vadd.s32 4294967280, %v5689_v52  ;;  %v2901_v50 = vadd.s32 4294967272, %v5689_v52 }
 0x3ad   :  { %v2905_v0 = vadd.s32 4294967264, %v5689_v52  ;;  %v2909_v9 = vadd.s32 4294967256, %v5689_v52  ;;  %v2913_v63 = vadd.s32 4294967248, %v5689_v52  ;;  %v2917_v49 = vadd.s32 4294967240, %v5689_v52 }
 0x3ae   :  { %v2803_v57 = vmul.f32 %v5416_v55, %v2766_v62  ;;  %v2804_v41 = vmul.f32 %v5424_v37, %v2767_v32  ;;  %v2893_v55 = vadd.s32 4294967288, %v5689_v52  ;;  %v2921_v35 = vadd.s32 4294967232, %v5689_v52 }
 0x3af   :  { %v2925_v43 = vadd.s32 4294967224, %v5689_v52  ;;  %v2929_v59 = vadd.s32 4294967216, %v5689_v52  ;;  %v2933_v5 = vadd.s32 4294967208, %v5689_v52  ;;  %v2937_v17 = vadd.s32 4294967200, %v5689_v52 }
 0x3b0   :  { %v2850_v61 = vadd.f32 %v2804_v41, %v2803_v57  ;;  %v2810_v45 = vpop.xlane.xlu2 %2809  ;;  %v2941_v62 = vadd.s32 4294967192, %v5689_v52  ;;  %v2945_v41 = vadd.s32 4294967184, %v5689_v52 }
 0x3b2   :  { %2851 = vadd.xlane.f32.xlu0 %v2850_v61 }
 0x3b7   :  { %v2813_v29 = vpop.xlane.xlu0 %2812 }
 0x3c0   :  { %v2816_v33 = vpop.xlane.xlu2 %2815  ;;  %v5691_v46 = vpop.permute.xlu1 %2855 }
 0x3c1   :  { %v2858_v37 = vadd.f32 %v5691_v46, %v2807_v10  ;;  %v2859_v12 = vadd.f32 %v5691_v46, %v2810_v45  ;;  %v2860_v2 = vadd.f32 %v5691_v46, %v2813_v29  ;;  %v2861_v18 = vadd.f32 %v5691_v46, %v2816_v33 }
 0x3c3   :  { %v2892_v51 = vperm.slane %v2858_v37, %v5689_v52  ;;  %v2894_v39 = vperm.slane %v2859_v12, %v2893_v55  ;;  %v2898_v36 = vperm.slane %v2860_v2, %v2897_v42  ;;  %v2902_v58 = vperm.slane %v2861_v18, %v2901_v50 }
 0x3c5   :  { %v2896_v28 = vsel %vm2895_vm3, %v2894_v39, %v2892_v51 }
 0x3c6   :  { %v2900_v4 = vsel %vm2899_vm4, %v2898_v36, %v2896_v28 }
 0x3c7   :  { %v2904_v11 = vsel %vm2903_vm5, %v2902_v58, %v2900_v4 }
 0x3c8   :  { %v2819_v24 = vpop.xlane.xlu0 %2818 }
 0x3c9   :  { %v2862_v1 = vadd.f32 %v5691_v46, %v2819_v24 }
 0x3cb   :  { %v2906_v25 = vperm.slane %v2862_v1, %v2905_v0 }
 0x3cd   :  { %v2908_v8 = vsel %vm2907_vm6, %v2906_v25, %v2904_v11 }
 0x3d0   :  { %v2822_v6 = vpop.xlane.xlu2 %2821 }
 0x3d1   :  { %v2863_v16 = vadd.f32 %v5691_v46, %v2822_v6 }
 0x3d3   :  { %v2910_v40 = vperm.slane %v2863_v16, %v2909_v9 }
 0x3d5   :  { %v2912_v47 = vsel %vm2911_vm7, %v2910_v40, %v2908_v8 }
 0x3de   :  { %v2825_v31 = vpop.xlane.xlu0 %2824 }
 0x3df   :  { %v2864_v20 = vadd.f32 %v5691_v46, %v2825_v31  ;;  %v2949_v31 = vadd.s32 4294967176, %v5689_v52 }
 0x3e1   :  { %v2828_v27 = vpop.xlane.xlu2 %2827  ;;  %v2914_v23 = vperm.slane %v2864_v20, %v2913_v63 }
 0x3e2   :  { %v2865_v60 = vadd.f32 %v5691_v46, %v2828_v27 }
 0x3e3   :  { %v2916_v26 = vsel %vm2915_vm8, %v2914_v23, %v2912_v47 }
 0x3e4   :  { %v2918_v21 = vperm.slane %v2865_v60, %v2917_v49 }
 0x3e6   :  { %v2920_v45 = vsel %vm2919_vm9, %v2918_v21, %v2916_v26 }
 0x3ea   :  { %v2831_v15 = vpop.xlane.xlu0 %2830 }
 0x3eb   :  { %v2866_v34 = vadd.f32 %v5691_v46, %v2831_v15 }
 0x3ed   :  { %v2922_v7 = vperm.slane %v2866_v34, %v2921_v35 }
 0x3ef   :  { %v2924_v33 = vsel %vm2923_vm10, %v2922_v7, %v2920_v45 }
 0x3f2   :  { %v2834_v13 = vpop.xlane.xlu2 %2833 }
 0x3f3   :  { %v2867_v3 = vadd.f32 %v5691_v46, %v2834_v13 }
 0x3f5   :  { %v2926_v54 = vperm.slane %v2867_v3, %v2925_v43 }
 0x3f7   :  { %v2928_v6 = vsel %vm2927_vm11, %v2926_v54, %v2924_v33 }
 0x3fa   :  { %v2837_v19 = vpop.xlane.xlu1 %2836 }
 0x3fb   :  { %v2868_v30 = vadd.f32 %v5691_v46, %v2837_v19 }
 0x3fd   :  { %v2930_v57 = vperm.slane %v2868_v30, %v2929_v59 }
 0x3ff   :  { %v2932_v48 = vsel %vm2931_vm12, %v2930_v57, %v2928_v6 }
 0x401   :  { %v2840_v53 = vpop.xlane.xlu0 %2839 }
 0x402   :  { %v2869_v38 = vadd.f32 %v5691_v46, %v2840_v53 }
 0x404   :  { %v2934_v29 = vperm.slane %v2869_v38, %v2933_v5 }
 0x406   :  { %v2936_v55 = vsel %vm2935_vm13, %v2934_v29, %v2932_v48 }
 0x40a   :  { %v2843_v44 = vpop.xlane.xlu2 %2842 }
 0x40b   :  { %v2870_v22 = vadd.f32 %v5691_v46, %v2843_v44 }
 0x40d   :  { %v2938_v24 = vperm.slane %v2870_v22, %v2937_v17 }
 0x40f   :  { %v2940_v12 = vsel %vm2939_vm14, %v2938_v24, %v2936_v55 }
 0x411   :  { %v2846_v56 = vpop.xlane.xlu0 %2845 }
 0x412   :  { %v2871_v32 = vadd.f32 %v5691_v46, %v2846_v56 }
 0x414   :  { %v2942_v10 = vperm.slane %v2871_v32, %v2941_v62 }
 0x416   :  { %v2944_v13 = vsel %vm2943_vm15, %v2942_v10, %v2940_v12 }
 0x419   :  { %v2849_v14 = vpop.xlane.xlu2 %2848 }
 0x41a   :  { %v2872_v61 = vadd.f32 %v5691_v46, %v2849_v14 }
 0x41c   :  { %v2946_v27 = vperm.slane %v2872_v61, %v2945_v41 }
 0x41e   :  { %v2948_v2 = vsel %vm2947_vm0, %v2946_v27, %v2944_v13 }
 0x425   :  { %v2852_v15 = vpop.xlane.xlu0 %2851 }
 0x426   :  { %v2873_v37 = vadd.f32 %v5691_v46, %v2852_v15 }
 0x428   :  { %v2950_v42 = vperm.slane %v2873_v37, %v2949_v31 }
 0x42a   :  { %v2952_v52 = vsel %vm2951_vm1, %v2950_v42, %v2948_v2 }
 0x42b   :  { %2954 = vst [vmem:[#allocation5] sm:$0x1] %v2952_v52 }
 0x42c   :  { %2965 = dma.vmem_to_hbm [thread:$0]  %s2961_s10, 16, %s2963_s13, [#allocation4]  }
 0x42d   :  { %3590 = dma.done.wait [#allocation4], 16  }
 0x42e   :  { %3591 = vsyncadd [#allocation4], 4294967280 }
 0x42f   :  { %2970 = vsyncpa [#allocation3], 1 }
 0x430   :  { %2971 = vsyncpa [#allocation4], 1 }

</bundles_post_ra>
